<compile_context>
chip_gen: v7x
topology: tpu7x:2x2x1
jax: 0.10.0
libtpu: 0.0.40
codegen_flags: <defaults>
</compile_context>

<pallas_src>
import jax
import jax.numpy as jnp
from jax.experimental import pallas as pl
from jax.experimental.pallas import tpu as pltpu


def _encoder_bigru2_kernel(x_ref, len_ref,
                           wx0_ref, bx0_ref, wh0_ref, bhn0_ref,
                           wx1_ref, bx1_ref, wh1_ref, bhn1_ref,
                           outf_ref, outb_ref, hfin_ref,
                           xpf_scr, xpb_scr, y0f_scr, y0b_scr, mask_scr):
    """Fused 2-layer bidirectional GRU, single grid step, all VMEM-resident.

    x_ref    : (T, B, E)        time-major embedded input
    len_ref  : (B, 1) int32     sequence lengths
    wx0_ref  : (2, E, 3H)       layer-0 input->gate weights  [dir][r|z|n]
    bx0_ref  : (2, 1, 3H)       layer-0 fused input biases (b_i*+b_h* for r,z; b_in)
    wh0_ref  : (2, H, 3H)       layer-0 hidden->gate weights
    bhn0_ref : (2, 1, H)        layer-0 hidden bias of the n gate
    wx1_ref  : (2, 2, H, 3H)    layer-1 input weights, split by input half
    bx1/wh1/bhn1               analogous to layer 0
    outf_ref : (T, B, H)        layer-1 forward outputs (padded positions = 0)
    outb_ref : (T, B, H)        layer-1 backward outputs
    hfin_ref : (2, 2, B, H)     final hidden [layer, dir]
    """
    T, B, E = x_ref.shape
    H = wh0_ref.shape[1]
    G = 3 * H
    H2 = 2 * H

    # ---- per-timestep validity mask, computed ONCE (not inside the loop) ----
    t_iota = jax.lax.broadcasted_iota(jnp.int32, (T, B, H), 0)
    lens = len_ref[...]                                        # (B, 1) int32
    mask_scr[...] = (t_iota < lens[None, :, :]).astype(jnp.float32)

    # Full unroll only for tiny T; cap otherwise (vreg pressure / imem).
    unroll = T if T <= 8 else 8

    def run_layer(wh_f, wh_b, bhn_f, bhn_b, of_ref, ob_ref):
        """Fwd+bwd GRU recurrence over the projections in xpf_scr / xpb_scr."""

        def step(t, carry):
            h_f, h_b = carry
            rt = T - 1 - t
            m_f = mask_scr[t]                                  # (B, H)
            m_b = mask_scr[rt]
            xf = xpf_scr[t]                                    # (B, 3H) lane-aligned
            xb = xpb_scr[rt]

            # -------- forward direction --------
            hp_f = jnp.dot(h_f, wh_f, preferred_element_type=jnp.float32)
            rz_f = jax.nn.sigmoid(xf[:, :H2] + hp_f[:, :H2])   # one EUP push for r&z
            n_f = jnp.tanh(xf[:, H2:] + rz_f[:, :H] * (hp_f[:, H2:] + bhn_f))
            # masked update: h' = h + m*(1-z)*(n-h)  (freezes past sequence end)
            h_f = h_f + (m_f * (1.0 - rz_f[:, H:])) * (n_f - h_f)
            of_ref[t] = m_f * h_f                              # padded positions -> 0

            # -------- backward direction --------
            hp_b = jnp.dot(h_b, wh_b, preferred_element_type=jnp.float32)
            rz_b = jax.nn.sigmoid(xb[:, :H2] + hp_b[:, :H2])
            n_b = jnp.tanh(xb[:, H2:] + rz_b[:, :H] * (hp_b[:, H2:] + bhn_b))
            h_b = h_b + (m_b * (1.0 - rz_b[:, H:])) * (n_b - h_b)
            ob_ref[rt] = m_b * h_b

            return (h_f, h_b)

        h0 = jnp.zeros((B, H), jnp.float32)
        return jax.lax.fori_loop(0, T, step, (h0, h0), unroll=unroll)

    # ============================ layer 0 ============================
    # Input->gate projection hoisted out of the recurrence: one MXU matmul
    # per direction over the whole (T*B, E) slab, biases folded in.
    x2d = x_ref[...].reshape(T * B, E)
    xpf_scr[...] = (jnp.dot(x2d, wx0_ref[0], preferred_element_type=jnp.float32)
                    + bx0_ref[0]).reshape(T, B, G)
    xpb_scr[...] = (jnp.dot(x2d, wx0_ref[1], preferred_element_type=jnp.float32)
                    + bx0_ref[1]).reshape(T, B, G)
    h0f, h0b = run_layer(wh0_ref[0], wh0_ref[1], bhn0_ref[0], bhn0_ref[1],
                         y0f_scr, y0b_scr)
    hfin_ref[0, 0] = h0f
    hfin_ref[0, 1] = h0b

    # ============================ layer 1 ============================
    # Layer-1 input is concat([y0f, y0b], -1); split-weight matmuls avoid ever
    # materializing the concat:  [yf | yb] @ Wx == yf @ Wx[:H] + yb @ Wx[H:].
    yf2d = y0f_scr[...].reshape(T * B, H)
    yb2d = y0b_scr[...].reshape(T * B, H)
    xpf_scr[...] = (jnp.dot(yf2d, wx1_ref[0, 0], preferred_element_type=jnp.float32)
                    + jnp.dot(yb2d, wx1_ref[0, 1], preferred_element_type=jnp.float32)
                    + bx1_ref[0]).reshape(T, B, G)
    xpb_scr[...] = (jnp.dot(yf2d, wx1_ref[1, 0], preferred_element_type=jnp.float32)
                    + jnp.dot(yb2d, wx1_ref[1, 1], preferred_element_type=jnp.float32)
                    + bx1_ref[1]).reshape(T, B, G)
    h1f, h1b = run_layer(wh1_ref[0], wh1_ref[1], bhn1_ref[0], bhn1_ref[1],
                         outf_ref, outb_ref)
    hfin_ref[1, 0] = h1f
    hfin_ref[1, 1] = h1b


def encoder_gru2(x_tbe, lengths_b1, p0, p1):
    """Run the fused 2-layer bidirectional GRU kernel over (T, B, E) input."""
    T, B, E = x_tbe.shape
    H = p0["wh"].shape[1]
    G = 3 * H

    def full(shape):
        return pl.BlockSpec(shape, lambda i, _s=shape: (0,) * len(_s))

    outf, outb, hfin = pl.pallas_call(
        _encoder_bigru2_kernel,
        grid=(1,),
        in_specs=[
            full((T, B, E)),          # x
            full((B, 1)),             # lengths
            full(p0["wx"].shape),     # (2, E, 3H)
            full(p0["bx"].shape),     # (2, 1, 3H)
            full(p0["wh"].shape),     # (2, H, 3H)
            full(p0["bhn"].shape),    # (2, 1, H)
            full(p1["wx"].shape),     # (2, 2, H, 3H)
            full(p1["bx"].shape),     # (2, 1, 3H)
            full(p1["wh"].shape),     # (2, H, 3H)
            full(p1["bhn"].shape),    # (2, 1, H)
        ],
        out_specs=(
            full((T, B, H)),
            full((T, B, H)),
            full((2, 2, B, H)),
        ),
        out_shape=(
            jax.ShapeDtypeStruct((T, B, H), jnp.float32),      # layer-1 fwd out
            jax.ShapeDtypeStruct((T, B, H), jnp.float32),      # layer-1 bwd out
            jax.ShapeDtypeStruct((2, 2, B, H), jnp.float32),   # finals [layer,dir]
        ),
        scratch_shapes=[
            pltpu.VMEM((T, B, G), jnp.float32),   # fwd input projections (reused L0/L1)
            pltpu.VMEM((T, B, G), jnp.float32),   # bwd input projections (reused L0/L1)
            pltpu.VMEM((T, B, H), jnp.float32),   # layer-0 fwd outputs
            pltpu.VMEM((T, B, H), jnp.float32),   # layer-0 bwd outputs
            pltpu.VMEM((T, B, H), jnp.float32),   # precomputed length mask
        ],
        compiler_params=pltpu.CompilerParams(
            dimension_semantics=("arbitrary",)),
    )(x_tbe, lengths_b1,
      p0["wx"], p0["bx"], p0["wh"], p0["bhn"],
      p1["wx"], p1["bx"], p1["wh"], p1["bhn"])
    return outf, outb, hfin


def init_encoder_params(key, vocab_size, emb_size, hidden, num_layers=2):
    """Deterministic synthetic init matching PyTorch defaults:
    Embedding ~ N(0,1); GRU weights/biases ~ U(-1/sqrt(H), 1/sqrt(H)),
    pre-fused into the layout the kernel consumes."""
    assert num_layers == 2, "kernel is specialized to the module default num_layers=2"
    kb = 1.0 / float(hidden) ** 0.5
    k_emb, key = jax.random.split(key)
    emb_table = jax.random.normal(k_emb, (vocab_size, emb_size), jnp.float32)

    def make_layer(key, layer_in):
        wx_d, bx_d, wh_d, bhn_d = [], [], [], []
        for _d in range(2):  # forward, backward
            key, *ks = jax.random.split(key, 13)
            u = lambda kk, shape: jax.random.uniform(kk, shape, jnp.float32, -kb, kb)
            wxr, wxz, wxn = (u(ks[i], (layer_in, hidden)) for i in range(3))
            whr, whz, whn = (u(ks[3 + i], (hidden, hidden)) for i in range(3))
            b_ir, b_iz, b_in, b_hr, b_hz, b_hn = (
                u(ks[6 + i], (1, hidden)) for i in range(6))
            wx_d.append(jnp.concatenate([wxr, wxz, wxn], axis=1))            # (In, 3H)
            bx_d.append(jnp.concatenate([b_ir + b_hr, b_iz + b_hz, b_in],
                                        axis=1))                             # (1, 3H)
            wh_d.append(jnp.concatenate([whr, whz, whn], axis=1))             # (H, 3H)
            bhn_d.append(b_hn)                                                # (1, H)
        layer = dict(wx=jnp.stack(wx_d), bx=jnp.stack(bx_d),
                     wh=jnp.stack(wh_d), bhn=jnp.stack(bhn_d))
        return key, layer

    key, p0 = make_layer(key, emb_size)
    key, p1 = make_layer(key, 2 * hidden)
    # Split layer-1 input weights by input half (fwd rows / bwd rows) so the
    # kernel can do   [yf | yb] @ Wx  as  yf @ Wx[:H] + yb @ Wx[H:].
    p1["wx"] = p1["wx"].reshape(2, 2, hidden, 3 * hidden)   # (dir, half, H, 3H)
    return emb_table, p0, p1


def encoder_forward(emb_table, p0, p1, x_tokens, lengths):
    """Equivalent of Encoder.forward (eval mode)."""
    # Embedding lookup + layout glue in plain JAX (hot path is the GRU kernel).
    emb = emb_table[x_tokens]                         # (B, T, E)
    B, T, _E = emb.shape
    x_tbe = jnp.transpose(emb, (1, 0, 2))             # (T, B, E) time-major
    lengths_b1 = lengths.reshape(B, 1).astype(jnp.int32)
    # NOTE: assumes max(lengths) == T so the padded output length matches
    # pad_packed_sequence (which trims to max(lengths)).

    outf, outb, hfin = encoder_gru2(x_tbe, lengths_b1, p0, p1)

    H = outf.shape[-1]
    output = jnp.transpose(jnp.concatenate([outf, outb], axis=-1), (1, 0, 2))  # (B,T,2H)
    final = jnp.transpose(hfin, (0, 2, 1, 3)).reshape(2, B, 2 * H)             # (L,B,2H)
    # TODO(synk): nn.GRU inter-layer dropout (p=0.3) is training-only; this is
    # the eval-mode forward, so dropout is intentionally omitted.
    return output, final


if __name__ == "__main__":
    vocab_size, emb_size, hidden_size, num_layers = 50, 16, 32, 2
    B, T = 4, 8

    key = jax.random.PRNGKey(0)
    k_par, k_tok = jax.random.split(key)

    emb_table, p0, p1 = init_encoder_params(k_par, vocab_size, emb_size,
                                            hidden_size, num_layers)

    x = jax.random.randint(k_tok, (B, T), 0, vocab_size, dtype=jnp.int32)
    # max(lengths) == T so the padded output shape matches pad_packed_sequence.
    lengths = jnp.array([8, 5, 8, 3], dtype=jnp.int32)

    output, final = encoder_forward(emb_table, p0, p1, x, lengths)
    jax.block_until_ready((output, final))

    assert output.shape == (B, T, 2 * hidden_size)
    assert final.shape == (num_layers, B, 2 * hidden_size)
    print("KERNEL_OK")
</pallas_src>

<mosaic_0001>
module attributes {stable_mosaic.version = 11 : i64} {
  func.func @_encoder_bigru2_kernel(%arg0: i32, %arg1: memref<8x4x16xf32, #tpu.memory_space<vmem>>, %arg2: memref<4x1xi32, #tpu.memory_space<vmem>>, %arg3: memref<2x16x96xf32, #tpu.memory_space<vmem>>, %arg4: memref<2x1x96xf32, #tpu.memory_space<vmem>>, %arg5: memref<2x32x96xf32, #tpu.memory_space<vmem>>, %arg6: memref<2x1x32xf32, #tpu.memory_space<vmem>>, %arg7: memref<2x2x32x96xf32, #tpu.memory_space<vmem>>, %arg8: memref<2x1x96xf32, #tpu.memory_space<vmem>>, %arg9: memref<2x32x96xf32, #tpu.memory_space<vmem>>, %arg10: memref<2x1x32xf32, #tpu.memory_space<vmem>>, %arg11: memref<8x4x32xf32, #tpu.memory_space<vmem>>, %arg12: memref<8x4x32xf32, #tpu.memory_space<vmem>>, %arg13: memref<2x2x4x32xf32, #tpu.memory_space<vmem>>, %arg14: memref<8x4x96xf32, #tpu.memory_space<vmem>>, %arg15: memref<8x4x96xf32, #tpu.memory_space<vmem>>, %arg16: memref<8x4x32xf32, #tpu.memory_space<vmem>>, %arg17: memref<8x4x32xf32, #tpu.memory_space<vmem>>, %arg18: memref<8x4x32xf32, #tpu.memory_space<vmem>>) attributes {dimension_semantics = [#tpu.dimension_semantics<arbitrary>], iteration_bounds = array<i64: 1>, scalar_prefetch = 0 : i64, scratch_operands = 5 : i64, tpu.core_type = #tpu.core_type<tc>, window_params = [{pipeline_mode = #tpu.pipeline_mode<synchronous>, transform_indices = @transform_0, window_bounds = array<i64: 8, 4, 16>}, {pipeline_mode = #tpu.pipeline_mode<synchronous>, transform_indices = @transform_1, window_bounds = array<i64: 4, 1>}, {pipeline_mode = #tpu.pipeline_mode<synchronous>, transform_indices = @transform_2, window_bounds = array<i64: 2, 16, 96>}, {pipeline_mode = #tpu.pipeline_mode<synchronous>, transform_indices = @transform_3, window_bounds = array<i64: 2, 1, 96>}, {pipeline_mode = #tpu.pipeline_mode<synchronous>, transform_indices = @transform_4, window_bounds = array<i64: 2, 32, 96>}, {pipeline_mode = #tpu.pipeline_mode<synchronous>, transform_indices = @transform_5, window_bounds = array<i64: 2, 1, 32>}, {pipeline_mode = #tpu.pipeline_mode<synchronous>, transform_indices = @transform_6, window_bounds = array<i64: 2, 2, 32, 96>}, {pipeline_mode = #tpu.pipeline_mode<synchronous>, transform_indices = @transform_7, window_bounds = array<i64: 2, 1, 96>}, {pipeline_mode = #tpu.pipeline_mode<synchronous>, transform_indices = @transform_8, window_bounds = array<i64: 2, 32, 96>}, {pipeline_mode = #tpu.pipeline_mode<synchronous>, transform_indices = @transform_9, window_bounds = array<i64: 2, 1, 32>}, {pipeline_mode = #tpu.pipeline_mode<synchronous>, transform_indices = @transform_10, window_bounds = array<i64: 8, 4, 32>}, {pipeline_mode = #tpu.pipeline_mode<synchronous>, transform_indices = @transform_11, window_bounds = array<i64: 8, 4, 32>}, {pipeline_mode = #tpu.pipeline_mode<synchronous>, transform_indices = @transform_12, window_bounds = array<i64: 2, 2, 4, 32>}]} {
    %0 = tpu.iota {dimensions = array<i32: 0>} : vector<8x4x32xi32>
    %c0 = arith.constant 0 : index
    %c0_0 = arith.constant 0 : index
    %1 = vector.load %arg2[%c0, %c0_0] : memref<4x1xi32, #tpu.memory_space<vmem>>, vector<4x1xi32>
    %2 = vector.shape_cast %1 : vector<4x1xi32> to vector<1x4x1xi32>
    %3 = vector.broadcast %2 : vector<1x4x1xi32> to vector<8x4x32xi32>
    %4 = arith.cmpi slt, %0, %3 : vector<8x4x32xi32>
    %5 = arith.extui %4 : vector<8x4x32xi1> to vector<8x4x32xi32>
    %6 = arith.sitofp %5 : vector<8x4x32xi32> to vector<8x4x32xf32>
    %c0_1 = arith.constant 0 : index
    %c0_2 = arith.constant 0 : index
    %c0_3 = arith.constant 0 : index
    %7 = vector.load %arg18[%c0_1, %c0_2, %c0_3] : memref<8x4x32xf32, #tpu.memory_space<vmem>>, vector<8x4x32xf32>
    tpu.vector_store %arg18[%c0_1, %c0_2, %c0_3], %6 {strides = array<i32>} : memref<8x4x32xf32, #tpu.memory_space<vmem>>, vector<8x4x32xf32>,
    %c0_4 = arith.constant 0 : index
    %c0_5 = arith.constant 0 : index
    %c0_6 = arith.constant 0 : index
    %8 = vector.load %arg1[%c0_4, %c0_5, %c0_6] : memref<8x4x16xf32, #tpu.memory_space<vmem>>, vector<8x4x16xf32>
    %9 = vector.shape_cast %8 : vector<8x4x16xf32> to vector<32x16xf32>
    %c0_7 = arith.constant 0 : index
    %c0_8 = arith.constant 0 : index
    %c0_9 = arith.constant 0 : index
    %10 = vector.load %arg3[%c0_7, %c0_8, %c0_9] : memref<2x16x96xf32, #tpu.memory_space<vmem>>, vector<1x16x96xf32>
    %11 = vector.shape_cast %10 : vector<1x16x96xf32> to vector<16x96xf32>
    %cst = arith.constant dense<0.000000e+00> : vector<32x96xf32>
    %12 = tpu.matmul %9, %11, %cst {dimension_numbers = #tpu.dot_dimension_numbers<[1], [0], [0], [1], [0, 0, 1, 1], [], []>} : vector<32x16xf32>, vector<16x96xf32>, vector<32x96xf32> -> vector<32x96xf32>
    %c0_10 = arith.constant 0 : index
    %c0_11 = arith.constant 0 : index
    %c0_12 = arith.constant 0 : index
    %13 = vector.load %arg4[%c0_10, %c0_11, %c0_12] : memref<2x1x96xf32, #tpu.memory_space<vmem>>, vector<1x1x96xf32>
    %14 = vector.shape_cast %13 : vector<1x1x96xf32> to vector<1x96xf32>
    %15 = vector.broadcast %14 : vector<1x96xf32> to vector<32x96xf32>
    %16 = arith.addf %12, %15 : vector<32x96xf32>
    %17 = vector.shape_cast %16 : vector<32x96xf32> to vector<8x4x96xf32>
    %c0_13 = arith.constant 0 : index
    %c0_14 = arith.constant 0 : index
    %c0_15 = arith.constant 0 : index
    %18 = vector.load %arg14[%c0_13, %c0_14, %c0_15] : memref<8x4x96xf32, #tpu.memory_space<vmem>>, vector<8x4x96xf32>
    tpu.vector_store %arg14[%c0_13, %c0_14, %c0_15], %17 {strides = array<i32>} : memref<8x4x96xf32, #tpu.memory_space<vmem>>, vector<8x4x96xf32>,
    %c1 = arith.constant 1 : index
    %c0_16 = arith.constant 0 : index
    %c0_17 = arith.constant 0 : index
    %19 = vector.load %arg3[%c1, %c0_16, %c0_17] : memref<2x16x96xf32, #tpu.memory_space<vmem>>, vector<1x16x96xf32>
    %20 = vector.shape_cast %19 : vector<1x16x96xf32> to vector<16x96xf32>
    %cst_18 = arith.constant dense<0.000000e+00> : vector<32x96xf32>
    %21 = tpu.matmul %9, %20, %cst_18 {dimension_numbers = #tpu.dot_dimension_numbers<[1], [0], [0], [1], [0, 0, 1, 1], [], []>} : vector<32x16xf32>, vector<16x96xf32>, vector<32x96xf32> -> vector<32x96xf32>
    %c1_19 = arith.constant 1 : index
    %c0_20 = arith.constant 0 : index
    %c0_21 = arith.constant 0 : index
    %22 = vector.load %arg4[%c1_19, %c0_20, %c0_21] : memref<2x1x96xf32, #tpu.memory_space<vmem>>, vector<1x1x96xf32>
    %23 = vector.shape_cast %22 : vector<1x1x96xf32> to vector<1x96xf32>
    %24 = vector.broadcast %23 : vector<1x96xf32> to vector<32x96xf32>
    %25 = arith.addf %21, %24 : vector<32x96xf32>
    %26 = vector.shape_cast %25 : vector<32x96xf32> to vector<8x4x96xf32>
    %c0_22 = arith.constant 0 : index
    %c0_23 = arith.constant 0 : index
    %c0_24 = arith.constant 0 : index
    %27 = vector.load %arg15[%c0_22, %c0_23, %c0_24] : memref<8x4x96xf32, #tpu.memory_space<vmem>>, vector<8x4x96xf32>
    tpu.vector_store %arg15[%c0_22, %c0_23, %c0_24], %26 {strides = array<i32>} : memref<8x4x96xf32, #tpu.memory_space<vmem>>, vector<8x4x96xf32>,
    %c0_25 = arith.constant 0 : index
    %c0_26 = arith.constant 0 : index
    %c0_27 = arith.constant 0 : index
    %28 = vector.load %arg5[%c0_25, %c0_26, %c0_27] : memref<2x32x96xf32, #tpu.memory_space<vmem>>, vector<1x32x96xf32>
    %29 = vector.shape_cast %28 : vector<1x32x96xf32> to vector<32x96xf32>
    %c1_28 = arith.constant 1 : index
    %c0_29 = arith.constant 0 : index
    %c0_30 = arith.constant 0 : index
    %30 = vector.load %arg5[%c1_28, %c0_29, %c0_30] : memref<2x32x96xf32, #tpu.memory_space<vmem>>, vector<1x32x96xf32>
    %31 = vector.shape_cast %30 : vector<1x32x96xf32> to vector<32x96xf32>
    %c0_31 = arith.constant 0 : index
    %c0_32 = arith.constant 0 : index
    %c0_33 = arith.constant 0 : index
    %32 = vector.load %arg6[%c0_31, %c0_32, %c0_33] : memref<2x1x32xf32, #tpu.memory_space<vmem>>, vector<1x1x32xf32>
    %33 = vector.shape_cast %32 : vector<1x1x32xf32> to vector<1x32xf32>
    %c1_34 = arith.constant 1 : index
    %c0_35 = arith.constant 0 : index
    %c0_36 = arith.constant 0 : index
    %34 = vector.load %arg6[%c1_34, %c0_35, %c0_36] : memref<2x1x32xf32, #tpu.memory_space<vmem>>, vector<1x1x32xf32>
    %35 = vector.shape_cast %34 : vector<1x1x32xf32> to vector<1x32xf32>
    %cst_37 = arith.constant 0.000000e+00 : f32
    %36 = vector.broadcast %cst_37 : f32 to vector<4x32xf32>
    %c0_i32 = arith.constant 0 : i32
    %c7_i32 = arith.constant 7 : i32
    %37 = arith.subi %c7_i32, %c0_i32 : i32
    %38 = arith.index_cast %c0_i32 : i32 to index
    %c0_38 = arith.constant 0 : index
    %c0_39 = arith.constant 0 : index
    %39 = vector.load %arg18[%38, %c0_38, %c0_39] : memref<8x4x32xf32, #tpu.memory_space<vmem>>, vector<1x4x32xf32>
    %40 = vector.shape_cast %39 : vector<1x4x32xf32> to vector<4x32xf32>
    %41 = arith.index_cast %37 : i32 to index
    %c0_40 = arith.constant 0 : index
    %c0_41 = arith.constant 0 : index
    %42 = vector.load %arg18[%41, %c0_40, %c0_41] : memref<8x4x32xf32, #tpu.memory_space<vmem>>, vector<1x4x32xf32>
    %43 = vector.shape_cast %42 : vector<1x4x32xf32> to vector<4x32xf32>
    %44 = arith.index_cast %c0_i32 : i32 to index
    %c0_42 = arith.constant 0 : index
    %c0_43 = arith.constant 0 : index
    %45 = vector.load %arg14[%44, %c0_42, %c0_43] : memref<8x4x96xf32, #tpu.memory_space<vmem>>, vector<1x4x96xf32>
    %46 = vector.shape_cast %45 : vector<1x4x96xf32> to vector<4x96xf32>
    %47 = arith.index_cast %37 : i32 to index
    %c0_44 = arith.constant 0 : index
    %c0_45 = arith.constant 0 : index
    %48 = vector.load %arg15[%47, %c0_44, %c0_45] : memref<8x4x96xf32, #tpu.memory_space<vmem>>, vector<1x4x96xf32>
    %49 = vector.shape_cast %48 : vector<1x4x96xf32> to vector<4x96xf32>
    %cst_46 = arith.constant dense<0.000000e+00> : vector<4x96xf32>
    %50 = tpu.matmul %36, %29, %cst_46 {dimension_numbers = #tpu.dot_dimension_numbers<[1], [0], [0], [1], [0, 0, 1, 1], [], []>} : vector<4x32xf32>, vector<32x96xf32>, vector<4x96xf32> -> vector<4x96xf32>
    %51 = vector.extract_strided_slice %46 {offsets = [0, 0], sizes = [4, 64], strides = [1, 1]} : vector<4x96xf32> to vector<4x64xf32>
    %52 = vector.extract_strided_slice %50 {offsets = [0, 0], sizes = [4, 64], strides = [1, 1]} : vector<4x96xf32> to vector<4x64xf32>
    %53 = arith.addf %51, %52 : vector<4x64xf32>
    %54 = arith.negf %53 : vector<4x64xf32>
    %55 = math.exp %54 : vector<4x64xf32>
    %cst_47 = arith.constant 1.000000e+00 : f32
    %56 = vector.broadcast %cst_47 : f32 to vector<4x64xf32>
    %57 = arith.addf %56, %55 : vector<4x64xf32>
    %58 = arith.divf %56, %57 : vector<4x64xf32>
    %59 = vector.extract_strided_slice %46 {offsets = [0, 64], sizes = [4, 32], strides = [1, 1]} : vector<4x96xf32> to vector<4x32xf32>
    %60 = vector.extract_strided_slice %58 {offsets = [0, 0], sizes = [4, 32], strides = [1, 1]} : vector<4x64xf32> to vector<4x32xf32>
    %61 = vector.extract_strided_slice %50 {offsets = [0, 64], sizes = [4, 32], strides = [1, 1]} : vector<4x96xf32> to vector<4x32xf32>
    %62 = vector.broadcast %33 : vector<1x32xf32> to vector<4x32xf32>
    %63 = arith.addf %61, %62 : vector<4x32xf32>
    %64 = arith.mulf %60, %63 : vector<4x32xf32>
    %65 = arith.addf %59, %64 : vector<4x32xf32>
    %66 = math.tanh %65 : vector<4x32xf32>
    %67 = vector.extract_strided_slice %58 {offsets = [0, 32], sizes = [4, 32], strides = [1, 1]} : vector<4x64xf32> to vector<4x32xf32>
    %cst_48 = arith.constant 1.000000e+00 : f32
    %68 = vector.broadcast %cst_48 : f32 to vector<4x32xf32>
    %69 = arith.subf %68, %67 : vector<4x32xf32>
    %70 = arith.mulf %40, %69 : vector<4x32xf32>
    %71 = arith.subf %66, %36 : vector<4x32xf32>
    %72 = arith.mulf %70, %71 : vector<4x32xf32>
    %73 = arith.addf %36, %72 : vector<4x32xf32>
    %74 = arith.mulf %40, %73 : vector<4x32xf32>
    %75 = arith.index_cast %c0_i32 : i32 to index
    %c0_49 = arith.constant 0 : index
    %c0_50 = arith.constant 0 : index
    %76 = vector.load %arg16[%75, %c0_49, %c0_50] : memref<8x4x32xf32, #tpu.memory_space<vmem>>, vector<1x4x32xf32>
    %77 = vector.shape_cast %76 : vector<1x4x32xf32> to vector<4x32xf32>
    %78 = vector.shape_cast %74 : vector<4x32xf32> to vector<1x4x32xf32>
    tpu.vector_store %arg16[%75, %c0_49, %c0_50], %78 {strides = array<i32>} : memref<8x4x32xf32, #tpu.memory_space<vmem>>, vector<1x4x32xf32>,
    %cst_51 = arith.constant dense<0.000000e+00> : vector<4x96xf32>
    %79 = tpu.matmul %36, %31, %cst_51 {dimension_numbers = #tpu.dot_dimension_numbers<[1], [0], [0], [1], [0, 0, 1, 1], [], []>} : vector<4x32xf32>, vector<32x96xf32>, vector<4x96xf32> -> vector<4x96xf32>
    %80 = vector.extract_strided_slice %49 {offsets = [0, 0], sizes = [4, 64], strides = [1, 1]} : vector<4x96xf32> to vector<4x64xf32>
    %81 = vector.extract_strided_slice %79 {offsets = [0, 0], sizes = [4, 64], strides = [1, 1]} : vector<4x96xf32> to vector<4x64xf32>
    %82 = arith.addf %80, %81 : vector<4x64xf32>
    %83 = arith.negf %82 : vector<4x64xf32>
    %84 = math.exp %83 : vector<4x64xf32>
    %cst_52 = arith.constant 1.000000e+00 : f32
    %85 = vector.broadcast %cst_52 : f32 to vector<4x64xf32>
    %86 = arith.addf %85, %84 : vector<4x64xf32>
    %87 = arith.divf %85, %86 : vector<4x64xf32>
    %88 = vector.extract_strided_slice %49 {offsets = [0, 64], sizes = [4, 32], strides = [1, 1]} : vector<4x96xf32> to vector<4x32xf32>
    %89 = vector.extract_strided_slice %87 {offsets = [0, 0], sizes = [4, 32], strides = [1, 1]} : vector<4x64xf32> to vector<4x32xf32>
    %90 = vector.extract_strided_slice %79 {offsets = [0, 64], sizes = [4, 32], strides = [1, 1]} : vector<4x96xf32> to vector<4x32xf32>
    %91 = vector.broadcast %35 : vector<1x32xf32> to vector<4x32xf32>
    %92 = arith.addf %90, %91 : vector<4x32xf32>
    %93 = arith.mulf %89, %92 : vector<4x32xf32>
    %94 = arith.addf %88, %93 : vector<4x32xf32>
    %95 = math.tanh %94 : vector<4x32xf32>
    %96 = vector.extract_strided_slice %87 {offsets = [0, 32], sizes = [4, 32], strides = [1, 1]} : vector<4x64xf32> to vector<4x32xf32>
    %cst_53 = arith.constant 1.000000e+00 : f32
    %97 = vector.broadcast %cst_53 : f32 to vector<4x32xf32>
    %98 = arith.subf %97, %96 : vector<4x32xf32>
    %99 = arith.mulf %43, %98 : vector<4x32xf32>
    %100 = arith.subf %95, %36 : vector<4x32xf32>
    %101 = arith.mulf %99, %100 : vector<4x32xf32>
    %102 = arith.addf %36, %101 : vector<4x32xf32>
    %103 = arith.mulf %43, %102 : vector<4x32xf32>
    %104 = arith.index_cast %37 : i32 to index
    %c0_54 = arith.constant 0 : index
    %c0_55 = arith.constant 0 : index
    %105 = vector.load %arg17[%104, %c0_54, %c0_55] : memref<8x4x32xf32, #tpu.memory_space<vmem>>, vector<1x4x32xf32>
    %106 = vector.shape_cast %105 : vector<1x4x32xf32> to vector<4x32xf32>
    %107 = vector.shape_cast %103 : vector<4x32xf32> to vector<1x4x32xf32>
    tpu.vector_store %arg17[%104, %c0_54, %c0_55], %107 {strides = array<i32>} : memref<8x4x32xf32, #tpu.memory_space<vmem>>, vector<1x4x32xf32>,
    %c1_i32 = arith.constant 1 : i32
    %c7_i32_56 = arith.constant 7 : i32
    %108 = arith.subi %c7_i32_56, %c1_i32 : i32
    %109 = arith.index_cast %c1_i32 : i32 to index
    %c0_57 = arith.constant 0 : index
    %c0_58 = arith.constant 0 : index
    %110 = vector.load %arg18[%109, %c0_57, %c0_58] : memref<8x4x32xf32, #tpu.memory_space<vmem>>, vector<1x4x32xf32>
    %111 = vector.shape_cast %110 : vector<1x4x32xf32> to vector<4x32xf32>
    %112 = arith.index_cast %108 : i32 to index
    %c0_59 = arith.constant 0 : index
    %c0_60 = arith.constant 0 : index
    %113 = vector.load %arg18[%112, %c0_59, %c0_60] : memref<8x4x32xf32, #tpu.memory_space<vmem>>, vector<1x4x32xf32>
    %114 = vector.shape_cast %113 : vector<1x4x32xf32> to vector<4x32xf32>
    %115 = arith.index_cast %c1_i32 : i32 to index
    %c0_61 = arith.constant 0 : index
    %c0_62 = arith.constant 0 : index
    %116 = vector.load %arg14[%115, %c0_61, %c0_62] : memref<8x4x96xf32, #tpu.memory_space<vmem>>, vector<1x4x96xf32>
    %117 = vector.shape_cast %116 : vector<1x4x96xf32> to vector<4x96xf32>
    %118 = arith.index_cast %108 : i32 to index
    %c0_63 = arith.constant 0 : index
    %c0_64 = arith.constant 0 : index
    %119 = vector.load %arg15[%118, %c0_63, %c0_64] : memref<8x4x96xf32, #tpu.memory_space<vmem>>, vector<1x4x96xf32>
    %120 = vector.shape_cast %119 : vector<1x4x96xf32> to vector<4x96xf32>
    %cst_65 = arith.constant dense<0.000000e+00> : vector<4x96xf32>
    %121 = tpu.matmul %73, %29, %cst_65 {dimension_numbers = #tpu.dot_dimension_numbers<[1], [0], [0], [1], [0, 0, 1, 1], [], []>} : vector<4x32xf32>, vector<32x96xf32>, vector<4x96xf32> -> vector<4x96xf32>
    %122 = vector.extract_strided_slice %117 {offsets = [0, 0], sizes = [4, 64], strides = [1, 1]} : vector<4x96xf32> to vector<4x64xf32>
    %123 = vector.extract_strided_slice %121 {offsets = [0, 0], sizes = [4, 64], strides = [1, 1]} : vector<4x96xf32> to vector<4x64xf32>
    %124 = arith.addf %122, %123 : vector<4x64xf32>
    %125 = arith.negf %124 : vector<4x64xf32>
    %126 = math.exp %125 : vector<4x64xf32>
    %cst_66 = arith.constant 1.000000e+00 : f32
    %127 = vector.broadcast %cst_66 : f32 to vector<4x64xf32>
    %128 = arith.addf %127, %126 : vector<4x64xf32>
    %129 = arith.divf %127, %128 : vector<4x64xf32>
    %130 = vector.extract_strided_slice %117 {offsets = [0, 64], sizes = [4, 32], strides = [1, 1]} : vector<4x96xf32> to vector<4x32xf32>
    %131 = vector.extract_strided_slice %129 {offsets = [0, 0], sizes = [4, 32], strides = [1, 1]} : vector<4x64xf32> to vector<4x32xf32>
    %132 = vector.extract_strided_slice %121 {offsets = [0, 64], sizes = [4, 32], strides = [1, 1]} : vector<4x96xf32> to vector<4x32xf32>
    %133 = vector.broadcast %33 : vector<1x32xf32> to vector<4x32xf32>
    %134 = arith.addf %132, %133 : vector<4x32xf32>
    %135 = arith.mulf %131, %134 : vector<4x32xf32>
    %136 = arith.addf %130, %135 : vector<4x32xf32>
    %137 = math.tanh %136 : vector<4x32xf32>
    %138 = vector.extract_strided_slice %129 {offsets = [0, 32], sizes = [4, 32], strides = [1, 1]} : vector<4x64xf32> to vector<4x32xf32>
    %cst_67 = arith.constant 1.000000e+00 : f32
    %139 = vector.broadcast %cst_67 : f32 to vector<4x32xf32>
    %140 = arith.subf %139, %138 : vector<4x32xf32>
    %141 = arith.mulf %111, %140 : vector<4x32xf32>
    %142 = arith.subf %137, %73 : vector<4x32xf32>
    %143 = arith.mulf %141, %142 : vector<4x32xf32>
    %144 = arith.addf %73, %143 : vector<4x32xf32>
    %145 = arith.mulf %111, %144 : vector<4x32xf32>
    %146 = arith.index_cast %c1_i32 : i32 to index
    %c0_68 = arith.constant 0 : index
    %c0_69 = arith.constant 0 : index
    %147 = vector.load %arg16[%146, %c0_68, %c0_69] : memref<8x4x32xf32, #tpu.memory_space<vmem>>, vector<1x4x32xf32>
    %148 = vector.shape_cast %147 : vector<1x4x32xf32> to vector<4x32xf32>
    %149 = vector.shape_cast %145 : vector<4x32xf32> to vector<1x4x32xf32>
    tpu.vector_store %arg16[%146, %c0_68, %c0_69], %149 {strides = array<i32>} : memref<8x4x32xf32, #tpu.memory_space<vmem>>, vector<1x4x32xf32>,
    %cst_70 = arith.constant dense<0.000000e+00> : vector<4x96xf32>
    %150 = tpu.matmul %102, %31, %cst_70 {dimension_numbers = #tpu.dot_dimension_numbers<[1], [0], [0], [1], [0, 0, 1, 1], [], []>} : vector<4x32xf32>, vector<32x96xf32>, vector<4x96xf32> -> vector<4x96xf32>
    %151 = vector.extract_strided_slice %120 {offsets = [0, 0], sizes = [4, 64], strides = [1, 1]} : vector<4x96xf32> to vector<4x64xf32>
    %152 = vector.extract_strided_slice %150 {offsets = [0, 0], sizes = [4, 64], strides = [1, 1]} : vector<4x96xf32> to vector<4x64xf32>
    %153 = arith.addf %151, %152 : vector<4x64xf32>
    %154 = arith.negf %153 : vector<4x64xf32>
    %155 = math.exp %154 : vector<4x64xf32>
    %cst_71 = arith.constant 1.000000e+00 : f32
    %156 = vector.broadcast %cst_71 : f32 to vector<4x64xf32>
    %157 = arith.addf %156, %155 : vector<4x64xf32>
    %158 = arith.divf %156, %157 : vector<4x64xf32>
    %159 = vector.extract_strided_slice %120 {offsets = [0, 64], sizes = [4, 32], strides = [1, 1]} : vector<4x96xf32> to vector<4x32xf32>
    %160 = vector.extract_strided_slice %158 {offsets = [0, 0], sizes = [4, 32], strides = [1, 1]} : vector<4x64xf32> to vector<4x32xf32>
    %161 = vector.extract_strided_slice %150 {offsets = [0, 64], sizes = [4, 32], strides = [1, 1]} : vector<4x96xf32> to vector<4x32xf32>
    %162 = vector.broadcast %35 : vector<1x32xf32> to vector<4x32xf32>
    %163 = arith.addf %161, %162 : vector<4x32xf32>
    %164 = arith.mulf %160, %163 : vector<4x32xf32>
    %165 = arith.addf %159, %164 : vector<4x32xf32>
    %166 = math.tanh %165 : vector<4x32xf32>
    %167 = vector.extract_strided_slice %158 {offsets = [0, 32], sizes = [4, 32], strides = [1, 1]} : vector<4x64xf32> to vector<4x32xf32>
    %cst_72 = arith.constant 1.000000e+00 : f32
    %168 = vector.broadcast %cst_72 : f32 to vector<4x32xf32>
    %169 = arith.subf %168, %167 : vector<4x32xf32>
    %170 = arith.mulf %114, %169 : vector<4x32xf32>
    %171 = arith.subf %166, %102 : vector<4x32xf32>
    %172 = arith.mulf %170, %171 : vector<4x32xf32>
    %173 = arith.addf %102, %172 : vector<4x32xf32>
    %174 = arith.mulf %114, %173 : vector<4x32xf32>
    %175 = arith.index_cast %108 : i32 to index
    %c0_73 = arith.constant 0 : index
    %c0_74 = arith.constant 0 : index
    %176 = vector.load %arg17[%175, %c0_73, %c0_74] : memref<8x4x32xf32, #tpu.memory_space<vmem>>, vector<1x4x32xf32>
    %177 = vector.shape_cast %176 : vector<1x4x32xf32> to vector<4x32xf32>
    %178 = vector.shape_cast %174 : vector<4x32xf32> to vector<1x4x32xf32>
    tpu.vector_store %arg17[%175, %c0_73, %c0_74], %178 {strides = array<i32>} : memref<8x4x32xf32, #tpu.memory_space<vmem>>, vector<1x4x32xf32>,
    %c2_i32 = arith.constant 2 : i32
    %c7_i32_75 = arith.constant 7 : i32
    %179 = arith.subi %c7_i32_75, %c2_i32 : i32
    %180 = arith.index_cast %c2_i32 : i32 to index
    %c0_76 = arith.constant 0 : index
    %c0_77 = arith.constant 0 : index
    %181 = vector.load %arg18[%180, %c0_76, %c0_77] : memref<8x4x32xf32, #tpu.memory_space<vmem>>, vector<1x4x32xf32>
    %182 = vector.shape_cast %181 : vector<1x4x32xf32> to vector<4x32xf32>
    %183 = arith.index_cast %179 : i32 to index
    %c0_78 = arith.constant 0 : index
    %c0_79 = arith.constant 0 : index
    %184 = vector.load %arg18[%183, %c0_78, %c0_79] : memref<8x4x32xf32, #tpu.memory_space<vmem>>, vector<1x4x32xf32>
    %185 = vector.shape_cast %184 : vector<1x4x32xf32> to vector<4x32xf32>
    %186 = arith.index_cast %c2_i32 : i32 to index
    %c0_80 = arith.constant 0 : index
    %c0_81 = arith.constant 0 : index
    %187 = vector.load %arg14[%186, %c0_80, %c0_81] : memref<8x4x96xf32, #tpu.memory_space<vmem>>, vector<1x4x96xf32>
    %188 = vector.shape_cast %187 : vector<1x4x96xf32> to vector<4x96xf32>
    %189 = arith.index_cast %179 : i32 to index
    %c0_82 = arith.constant 0 : index
    %c0_83 = arith.constant 0 : index
    %190 = vector.load %arg15[%189, %c0_82, %c0_83] : memref<8x4x96xf32, #tpu.memory_space<vmem>>, vector<1x4x96xf32>
    %191 = vector.shape_cast %190 : vector<1x4x96xf32> to vector<4x96xf32>
    %cst_84 = arith.constant dense<0.000000e+00> : vector<4x96xf32>
    %192 = tpu.matmul %144, %29, %cst_84 {dimension_numbers = #tpu.dot_dimension_numbers<[1], [0], [0], [1], [0, 0, 1, 1], [], []>} : vector<4x32xf32>, vector<32x96xf32>, vector<4x96xf32> -> vector<4x96xf32>
    %193 = vector.extract_strided_slice %188 {offsets = [0, 0], sizes = [4, 64], strides = [1, 1]} : vector<4x96xf32> to vector<4x64xf32>
    %194 = vector.extract_strided_slice %192 {offsets = [0, 0], sizes = [4, 64], strides = [1, 1]} : vector<4x96xf32> to vector<4x64xf32>
    %195 = arith.addf %193, %194 : vector<4x64xf32>
    %196 = arith.negf %195 : vector<4x64xf32>
    %197 = math.exp %196 : vector<4x64xf32>
    %cst_85 = arith.constant 1.000000e+00 : f32
    %198 = vector.broadcast %cst_85 : f32 to vector<4x64xf32>
    %199 = arith.addf %198, %197 : vector<4x64xf32>
    %200 = arith.divf %198, %199 : vector<4x64xf32>
    %201 = vector.extract_strided_slice %188 {offsets = [0, 64], sizes = [4, 32], strides = [1, 1]} : vector<4x96xf32> to vector<4x32xf32>
    %202 = vector.extract_strided_slice %200 {offsets = [0, 0], sizes = [4, 32], strides = [1, 1]} : vector<4x64xf32> to vector<4x32xf32>
    %203 = vector.extract_strided_slice %192 {offsets = [0, 64], sizes = [4, 32], strides = [1, 1]} : vector<4x96xf32> to vector<4x32xf32>
    %204 = vector.broadcast %33 : vector<1x32xf32> to vector<4x32xf32>
    %205 = arith.addf %203, %204 : vector<4x32xf32>
    %206 = arith.mulf %202, %205 : vector<4x32xf32>
    %207 = arith.addf %201, %206 : vector<4x32xf32>
    %208 = math.tanh %207 : vector<4x32xf32>
    %209 = vector.extract_strided_slice %200 {offsets = [0, 32], sizes = [4, 32], strides = [1, 1]} : vector<4x64xf32> to vector<4x32xf32>
    %cst_86 = arith.constant 1.000000e+00 : f32
    %210 = vector.broadcast %cst_86 : f32 to vector<4x32xf32>
    %211 = arith.subf %210, %209 : vector<4x32xf32>
    %212 = arith.mulf %182, %211 : vector<4x32xf32>
    %213 = arith.subf %208, %144 : vector<4x32xf32>
    %214 = arith.mulf %212, %213 : vector<4x32xf32>
    %215 = arith.addf %144, %214 : vector<4x32xf32>
    %216 = arith.mulf %182, %215 : vector<4x32xf32>
    %217 = arith.index_cast %c2_i32 : i32 to index
    %c0_87 = arith.constant 0 : index
    %c0_88 = arith.constant 0 : index
    %218 = vector.load %arg16[%217, %c0_87, %c0_88] : memref<8x4x32xf32, #tpu.memory_space<vmem>>, vector<1x4x32xf32>
    %219 = vector.shape_cast %218 : vector<1x4x32xf32> to vector<4x32xf32>
    %220 = vector.shape_cast %216 : vector<4x32xf32> to vector<1x4x32xf32>
    tpu.vector_store %arg16[%217, %c0_87, %c0_88], %220 {strides = array<i32>} : memref<8x4x32xf32, #tpu.memory_space<vmem>>, vector<1x4x32xf32>,
    %cst_89 = arith.constant dense<0.000000e+00> : vector<4x96xf32>
    %221 = tpu.matmul %173, %31, %cst_89 {dimension_numbers = #tpu.dot_dimension_numbers<[1], [0], [0], [1], [0, 0, 1, 1], [], []>} : vector<4x32xf32>, vector<32x96xf32>, vector<4x96xf32> -> vector<4x96xf32>
    %222 = vector.extract_strided_slice %191 {offsets = [0, 0], sizes = [4, 64], strides = [1, 1]} : vector<4x96xf32> to vector<4x64xf32>
    %223 = vector.extract_strided_slice %221 {offsets = [0, 0], sizes = [4, 64], strides = [1, 1]} : vector<4x96xf32> to vector<4x64xf32>
    %224 = arith.addf %222, %223 : vector<4x64xf32>
    %225 = arith.negf %224 : vector<4x64xf32>
    %226 = math.exp %225 : vector<4x64xf32>
    %cst_90 = arith.constant 1.000000e+00 : f32
    %227 = vector.broadcast %cst_90 : f32 to vector<4x64xf32>
    %228 = arith.addf %227, %226 : vector<4x64xf32>
    %229 = arith.divf %227, %228 : vector<4x64xf32>
    %230 = vector.extract_strided_slice %191 {offsets = [0, 64], sizes = [4, 32], strides = [1, 1]} : vector<4x96xf32> to vector<4x32xf32>
    %231 = vector.extract_strided_slice %229 {offsets = [0, 0], sizes = [4, 32], strides = [1, 1]} : vector<4x64xf32> to vector<4x32xf32>
    %232 = vector.extract_strided_slice %221 {offsets = [0, 64], sizes = [4, 32], strides = [1, 1]} : vector<4x96xf32> to vector<4x32xf32>
    %233 = vector.broadcast %35 : vector<1x32xf32> to vector<4x32xf32>
    %234 = arith.addf %232, %233 : vector<4x32xf32>
    %235 = arith.mulf %231, %234 : vector<4x32xf32>
    %236 = arith.addf %230, %235 : vector<4x32xf32>
    %237 = math.tanh %236 : vector<4x32xf32>
    %238 = vector.extract_strided_slice %229 {offsets = [0, 32], sizes = [4, 32], strides = [1, 1]} : vector<4x64xf32> to vector<4x32xf32>
    %cst_91 = arith.constant 1.000000e+00 : f32
    %239 = vector.broadcast %cst_91 : f32 to vector<4x32xf32>
    %240 = arith.subf %239, %238 : vector<4x32xf32>
    %241 = arith.mulf %185, %240 : vector<4x32xf32>
    %242 = arith.subf %237, %173 : vector<4x32xf32>
    %243 = arith.mulf %241, %242 : vector<4x32xf32>
    %244 = arith.addf %173, %243 : vector<4x32xf32>
    %245 = arith.mulf %185, %244 : vector<4x32xf32>
    %246 = arith.index_cast %179 : i32 to index
    %c0_92 = arith.constant 0 : index
    %c0_93 = arith.constant 0 : index
    %247 = vector.load %arg17[%246, %c0_92, %c0_93] : memref<8x4x32xf32, #tpu.memory_space<vmem>>, vector<1x4x32xf32>
    %248 = vector.shape_cast %247 : vector<1x4x32xf32> to vector<4x32xf32>
    %249 = vector.shape_cast %245 : vector<4x32xf32> to vector<1x4x32xf32>
    tpu.vector_store %arg17[%246, %c0_92, %c0_93], %249 {strides = array<i32>} : memref<8x4x32xf32, #tpu.memory_space<vmem>>, vector<1x4x32xf32>,
    %c3_i32 = arith.constant 3 : i32
    %c7_i32_94 = arith.constant 7 : i32
    %250 = arith.subi %c7_i32_94, %c3_i32 : i32
    %251 = arith.index_cast %c3_i32 : i32 to index
    %c0_95 = arith.constant 0 : index
    %c0_96 = arith.constant 0 : index
    %252 = vector.load %arg18[%251, %c0_95, %c0_96] : memref<8x4x32xf32, #tpu.memory_space<vmem>>, vector<1x4x32xf32>
    %253 = vector.shape_cast %252 : vector<1x4x32xf32> to vector<4x32xf32>
    %254 = arith.index_cast %250 : i32 to index
    %c0_97 = arith.constant 0 : index
    %c0_98 = arith.constant 0 : index
    %255 = vector.load %arg18[%254, %c0_97, %c0_98] : memref<8x4x32xf32, #tpu.memory_space<vmem>>, vector<1x4x32xf32>
    %256 = vector.shape_cast %255 : vector<1x4x32xf32> to vector<4x32xf32>
    %257 = arith.index_cast %c3_i32 : i32 to index
    %c0_99 = arith.constant 0 : index
    %c0_100 = arith.constant 0 : index
    %258 = vector.load %arg14[%257, %c0_99, %c0_100] : memref<8x4x96xf32, #tpu.memory_space<vmem>>, vector<1x4x96xf32>
    %259 = vector.shape_cast %258 : vector<1x4x96xf32> to vector<4x96xf32>
    %260 = arith.index_cast %250 : i32 to index
    %c0_101 = arith.constant 0 : index
    %c0_102 = arith.constant 0 : index
    %261 = vector.load %arg15[%260, %c0_101, %c0_102] : memref<8x4x96xf32, #tpu.memory_space<vmem>>, vector<1x4x96xf32>
    %262 = vector.shape_cast %261 : vector<1x4x96xf32> to vector<4x96xf32>
    %cst_103 = arith.constant dense<0.000000e+00> : vector<4x96xf32>
    %263 = tpu.matmul %215, %29, %cst_103 {dimension_numbers = #tpu.dot_dimension_numbers<[1], [0], [0], [1], [0, 0, 1, 1], [], []>} : vector<4x32xf32>, vector<32x96xf32>, vector<4x96xf32> -> vector<4x96xf32>
    %264 = vector.extract_strided_slice %259 {offsets = [0, 0], sizes = [4, 64], strides = [1, 1]} : vector<4x96xf32> to vector<4x64xf32>
    %265 = vector.extract_strided_slice %263 {offsets = [0, 0], sizes = [4, 64], strides = [1, 1]} : vector<4x96xf32> to vector<4x64xf32>
    %266 = arith.addf %264, %265 : vector<4x64xf32>
    %267 = arith.negf %266 : vector<4x64xf32>
    %268 = math.exp %267 : vector<4x64xf32>
    %cst_104 = arith.constant 1.000000e+00 : f32
    %269 = vector.broadcast %cst_104 : f32 to vector<4x64xf32>
    %270 = arith.addf %269, %268 : vector<4x64xf32>
    %271 = arith.divf %269, %270 : vector<4x64xf32>
    %272 = vector.extract_strided_slice %259 {offsets = [0, 64], sizes = [4, 32], strides = [1, 1]} : vector<4x96xf32> to vector<4x32xf32>
    %273 = vector.extract_strided_slice %271 {offsets = [0, 0], sizes = [4, 32], strides = [1, 1]} : vector<4x64xf32> to vector<4x32xf32>
    %274 = vector.extract_strided_slice %263 {offsets = [0, 64], sizes = [4, 32], strides = [1, 1]} : vector<4x96xf32> to vector<4x32xf32>
    %275 = vector.broadcast %33 : vector<1x32xf32> to vector<4x32xf32>
    %276 = arith.addf %274, %275 : vector<4x32xf32>
    %277 = arith.mulf %273, %276 : vector<4x32xf32>
    %278 = arith.addf %272, %277 : vector<4x32xf32>
    %279 = math.tanh %278 : vector<4x32xf32>
    %280 = vector.extract_strided_slice %271 {offsets = [0, 32], sizes = [4, 32], strides = [1, 1]} : vector<4x64xf32> to vector<4x32xf32>
    %cst_105 = arith.constant 1.000000e+00 : f32
    %281 = vector.broadcast %cst_105 : f32 to vector<4x32xf32>
    %282 = arith.subf %281, %280 : vector<4x32xf32>
    %283 = arith.mulf %253, %282 : vector<4x32xf32>
    %284 = arith.subf %279, %215 : vector<4x32xf32>
    %285 = arith.mulf %283, %284 : vector<4x32xf32>
    %286 = arith.addf %215, %285 : vector<4x32xf32>
    %287 = arith.mulf %253, %286 : vector<4x32xf32>
    %288 = arith.index_cast %c3_i32 : i32 to index
    %c0_106 = arith.constant 0 : index
    %c0_107 = arith.constant 0 : index
    %289 = vector.load %arg16[%288, %c0_106, %c0_107] : memref<8x4x32xf32, #tpu.memory_space<vmem>>, vector<1x4x32xf32>
    %290 = vector.shape_cast %289 : vector<1x4x32xf32> to vector<4x32xf32>
    %291 = vector.shape_cast %287 : vector<4x32xf32> to vector<1x4x32xf32>
    tpu.vector_store %arg16[%288, %c0_106, %c0_107], %291 {strides = array<i32>} : memref<8x4x32xf32, #tpu.memory_space<vmem>>, vector<1x4x32xf32>,
    %cst_108 = arith.constant dense<0.000000e+00> : vector<4x96xf32>
    %292 = tpu.matmul %244, %31, %cst_108 {dimension_numbers = #tpu.dot_dimension_numbers<[1], [0], [0], [1], [0, 0, 1, 1], [], []>} : vector<4x32xf32>, vector<32x96xf32>, vector<4x96xf32> -> vector<4x96xf32>
    %293 = vector.extract_strided_slice %262 {offsets = [0, 0], sizes = [4, 64], strides = [1, 1]} : vector<4x96xf32> to vector<4x64xf32>
    %294 = vector.extract_strided_slice %292 {offsets = [0, 0], sizes = [4, 64], strides = [1, 1]} : vector<4x96xf32> to vector<4x64xf32>
    %295 = arith.addf %293, %294 : vector<4x64xf32>
    %296 = arith.negf %295 : vector<4x64xf32>
    %297 = math.exp %296 : vector<4x64xf32>
    %cst_109 = arith.constant 1.000000e+00 : f32
    %298 = vector.broadcast %cst_109 : f32 to vector<4x64xf32>
    %299 = arith.addf %298, %297 : vector<4x64xf32>
    %300 = arith.divf %298, %299 : vector<4x64xf32>
    %301 = vector.extract_strided_slice %262 {offsets = [0, 64], sizes = [4, 32], strides = [1, 1]} : vector<4x96xf32> to vector<4x32xf32>
    %302 = vector.extract_strided_slice %300 {offsets = [0, 0], sizes = [4, 32], strides = [1, 1]} : vector<4x64xf32> to vector<4x32xf32>
    %303 = vector.extract_strided_slice %292 {offsets = [0, 64], sizes = [4, 32], strides = [1, 1]} : vector<4x96xf32> to vector<4x32xf32>
    %304 = vector.broadcast %35 : vector<1x32xf32> to vector<4x32xf32>
    %305 = arith.addf %303, %304 : vector<4x32xf32>
    %306 = arith.mulf %302, %305 : vector<4x32xf32>
    %307 = arith.addf %301, %306 : vector<4x32xf32>
    %308 = math.tanh %307 : vector<4x32xf32>
    %309 = vector.extract_strided_slice %300 {offsets = [0, 32], sizes = [4, 32], strides = [1, 1]} : vector<4x64xf32> to vector<4x32xf32>
    %cst_110 = arith.constant 1.000000e+00 : f32
    %310 = vector.broadcast %cst_110 : f32 to vector<4x32xf32>
    %311 = arith.subf %310, %309 : vector<4x32xf32>
    %312 = arith.mulf %256, %311 : vector<4x32xf32>
    %313 = arith.subf %308, %244 : vector<4x32xf32>
    %314 = arith.mulf %312, %313 : vector<4x32xf32>
    %315 = arith.addf %244, %314 : vector<4x32xf32>
    %316 = arith.mulf %256, %315 : vector<4x32xf32>
    %317 = arith.index_cast %250 : i32 to index
    %c0_111 = arith.constant 0 : index
    %c0_112 = arith.constant 0 : index
    %318 = vector.load %arg17[%317, %c0_111, %c0_112] : memref<8x4x32xf32, #tpu.memory_space<vmem>>, vector<1x4x32xf32>
    %319 = vector.shape_cast %318 : vector<1x4x32xf32> to vector<4x32xf32>
    %320 = vector.shape_cast %316 : vector<4x32xf32> to vector<1x4x32xf32>
    tpu.vector_store %arg17[%317, %c0_111, %c0_112], %320 {strides = array<i32>} : memref<8x4x32xf32, #tpu.memory_space<vmem>>, vector<1x4x32xf32>,
    %c4_i32 = arith.constant 4 : i32
    %c7_i32_113 = arith.constant 7 : i32
    %321 = arith.subi %c7_i32_113, %c4_i32 : i32
    %322 = arith.index_cast %c4_i32 : i32 to index
    %c0_114 = arith.constant 0 : index
    %c0_115 = arith.constant 0 : index
    %323 = vector.load %arg18[%322, %c0_114, %c0_115] : memref<8x4x32xf32, #tpu.memory_space<vmem>>, vector<1x4x32xf32>
    %324 = vector.shape_cast %323 : vector<1x4x32xf32> to vector<4x32xf32>
    %325 = arith.index_cast %321 : i32 to index
    %c0_116 = arith.constant 0 : index
    %c0_117 = arith.constant 0 : index
    %326 = vector.load %arg18[%325, %c0_116, %c0_117] : memref<8x4x32xf32, #tpu.memory_space<vmem>>, vector<1x4x32xf32>
    %327 = vector.shape_cast %326 : vector<1x4x32xf32> to vector<4x32xf32>
    %328 = arith.index_cast %c4_i32 : i32 to index
    %c0_118 = arith.constant 0 : index
    %c0_119 = arith.constant 0 : index
    %329 = vector.load %arg14[%328, %c0_118, %c0_119] : memref<8x4x96xf32, #tpu.memory_space<vmem>>, vector<1x4x96xf32>
    %330 = vector.shape_cast %329 : vector<1x4x96xf32> to vector<4x96xf32>
    %331 = arith.index_cast %321 : i32 to index
    %c0_120 = arith.constant 0 : index
    %c0_121 = arith.constant 0 : index
    %332 = vector.load %arg15[%331, %c0_120, %c0_121] : memref<8x4x96xf32, #tpu.memory_space<vmem>>, vector<1x4x96xf32>
    %333 = vector.shape_cast %332 : vector<1x4x96xf32> to vector<4x96xf32>
    %cst_122 = arith.constant dense<0.000000e+00> : vector<4x96xf32>
    %334 = tpu.matmul %286, %29, %cst_122 {dimension_numbers = #tpu.dot_dimension_numbers<[1], [0], [0], [1], [0, 0, 1, 1], [], []>} : vector<4x32xf32>, vector<32x96xf32>, vector<4x96xf32> -> vector<4x96xf32>
    %335 = vector.extract_strided_slice %330 {offsets = [0, 0], sizes = [4, 64], strides = [1, 1]} : vector<4x96xf32> to vector<4x64xf32>
    %336 = vector.extract_strided_slice %334 {offsets = [0, 0], sizes = [4, 64], strides = [1, 1]} : vector<4x96xf32> to vector<4x64xf32>
    %337 = arith.addf %335, %336 : vector<4x64xf32>
    %338 = arith.negf %337 : vector<4x64xf32>
    %339 = math.exp %338 : vector<4x64xf32>
    %cst_123 = arith.constant 1.000000e+00 : f32
    %340 = vector.broadcast %cst_123 : f32 to vector<4x64xf32>
    %341 = arith.addf %340, %339 : vector<4x64xf32>
    %342 = arith.divf %340, %341 : vector<4x64xf32>
    %343 = vector.extract_strided_slice %330 {offsets = [0, 64], sizes = [4, 32], strides = [1, 1]} : vector<4x96xf32> to vector<4x32xf32>
    %344 = vector.extract_strided_slice %342 {offsets = [0, 0], sizes = [4, 32], strides = [1, 1]} : vector<4x64xf32> to vector<4x32xf32>
    %345 = vector.extract_strided_slice %334 {offsets = [0, 64], sizes = [4, 32], strides = [1, 1]} : vector<4x96xf32> to vector<4x32xf32>
    %346 = vector.broadcast %33 : vector<1x32xf32> to vector<4x32xf32>
    %347 = arith.addf %345, %346 : vector<4x32xf32>
    %348 = arith.mulf %344, %347 : vector<4x32xf32>
    %349 = arith.addf %343, %348 : vector<4x32xf32>
    %350 = math.tanh %349 : vector<4x32xf32>
    %351 = vector.extract_strided_slice %342 {offsets = [0, 32], sizes = [4, 32], strides = [1, 1]} : vector<4x64xf32> to vector<4x32xf32>
    %cst_124 = arith.constant 1.000000e+00 : f32
    %352 = vector.broadcast %cst_124 : f32 to vector<4x32xf32>
    %353 = arith.subf %352, %351 : vector<4x32xf32>
    %354 = arith.mulf %324, %353 : vector<4x32xf32>
    %355 = arith.subf %350, %286 : vector<4x32xf32>
    %356 = arith.mulf %354, %355 : vector<4x32xf32>
    %357 = arith.addf %286, %356 : vector<4x32xf32>
    %358 = arith.mulf %324, %357 : vector<4x32xf32>
    %359 = arith.index_cast %c4_i32 : i32 to index
    %c0_125 = arith.constant 0 : index
    %c0_126 = arith.constant 0 : index
    %360 = vector.load %arg16[%359, %c0_125, %c0_126] : memref<8x4x32xf32, #tpu.memory_space<vmem>>, vector<1x4x32xf32>
    %361 = vector.shape_cast %360 : vector<1x4x32xf32> to vector<4x32xf32>
    %362 = vector.shape_cast %358 : vector<4x32xf32> to vector<1x4x32xf32>
    tpu.vector_store %arg16[%359, %c0_125, %c0_126], %362 {strides = array<i32>} : memref<8x4x32xf32, #tpu.memory_space<vmem>>, vector<1x4x32xf32>,
    %cst_127 = arith.constant dense<0.000000e+00> : vector<4x96xf32>
    %363 = tpu.matmul %315, %31, %cst_127 {dimension_numbers = #tpu.dot_dimension_numbers<[1], [0], [0], [1], [0, 0, 1, 1], [], []>} : vector<4x32xf32>, vector<32x96xf32>, vector<4x96xf32> -> vector<4x96xf32>
    %364 = vector.extract_strided_slice %333 {offsets = [0, 0], sizes = [4, 64], strides = [1, 1]} : vector<4x96xf32> to vector<4x64xf32>
    %365 = vector.extract_strided_slice %363 {offsets = [0, 0], sizes = [4, 64], strides = [1, 1]} : vector<4x96xf32> to vector<4x64xf32>
    %366 = arith.addf %364, %365 : vector<4x64xf32>
    %367 = arith.negf %366 : vector<4x64xf32>
    %368 = math.exp %367 : vector<4x64xf32>
    %cst_128 = arith.constant 1.000000e+00 : f32
    %369 = vector.broadcast %cst_128 : f32 to vector<4x64xf32>
    %370 = arith.addf %369, %368 : vector<4x64xf32>
    %371 = arith.divf %369, %370 : vector<4x64xf32>
    %372 = vector.extract_strided_slice %333 {offsets = [0, 64], sizes = [4, 32], strides = [1, 1]} : vector<4x96xf32> to vector<4x32xf32>
    %373 = vector.extract_strided_slice %371 {offsets = [0, 0], sizes = [4, 32], strides = [1, 1]} : vector<4x64xf32> to vector<4x32xf32>
    %374 = vector.extract_strided_slice %363 {offsets = [0, 64], sizes = [4, 32], strides = [1, 1]} : vector<4x96xf32> to vector<4x32xf32>
    %375 = vector.broadcast %35 : vector<1x32xf32> to vector<4x32xf32>
    %376 = arith.addf %374, %375 : vector<4x32xf32>
    %377 = arith.mulf %373, %376 : vector<4x32xf32>
    %378 = arith.addf %372, %377 : vector<4x32xf32>
    %379 = math.tanh %378 : vector<4x32xf32>
    %380 = vector.extract_strided_slice %371 {offsets = [0, 32], sizes = [4, 32], strides = [1, 1]} : vector<4x64xf32> to vector<4x32xf32>
    %cst_129 = arith.constant 1.000000e+00 : f32
    %381 = vector.broadcast %cst_129 : f32 to vector<4x32xf32>
    %382 = arith.subf %381, %380 : vector<4x32xf32>
    %383 = arith.mulf %327, %382 : vector<4x32xf32>
    %384 = arith.subf %379, %315 : vector<4x32xf32>
    %385 = arith.mulf %383, %384 : vector<4x32xf32>
    %386 = arith.addf %315, %385 : vector<4x32xf32>
    %387 = arith.mulf %327, %386 : vector<4x32xf32>
    %388 = arith.index_cast %321 : i32 to index
    %c0_130 = arith.constant 0 : index
    %c0_131 = arith.constant 0 : index
    %389 = vector.load %arg17[%388, %c0_130, %c0_131] : memref<8x4x32xf32, #tpu.memory_space<vmem>>, vector<1x4x32xf32>
    %390 = vector.shape_cast %389 : vector<1x4x32xf32> to vector<4x32xf32>
    %391 = vector.shape_cast %387 : vector<4x32xf32> to vector<1x4x32xf32>
    tpu.vector_store %arg17[%388, %c0_130, %c0_131], %391 {strides = array<i32>} : memref<8x4x32xf32, #tpu.memory_space<vmem>>, vector<1x4x32xf32>,
    %c5_i32 = arith.constant 5 : i32
    %c7_i32_132 = arith.constant 7 : i32
    %392 = arith.subi %c7_i32_132, %c5_i32 : i32
    %393 = arith.index_cast %c5_i32 : i32 to index
    %c0_133 = arith.constant 0 : index
    %c0_134 = arith.constant 0 : index
    %394 = vector.load %arg18[%393, %c0_133, %c0_134] : memref<8x4x32xf32, #tpu.memory_space<vmem>>, vector<1x4x32xf32>
    %395 = vector.shape_cast %394 : vector<1x4x32xf32> to vector<4x32xf32>
    %396 = arith.index_cast %392 : i32 to index
    %c0_135 = arith.constant 0 : index
    %c0_136 = arith.constant 0 : index
    %397 = vector.load %arg18[%396, %c0_135, %c0_136] : memref<8x4x32xf32, #tpu.memory_space<vmem>>, vector<1x4x32xf32>
    %398 = vector.shape_cast %397 : vector<1x4x32xf32> to vector<4x32xf32>
    %399 = arith.index_cast %c5_i32 : i32 to index
    %c0_137 = arith.constant 0 : index
    %c0_138 = arith.constant 0 : index
    %400 = vector.load %arg14[%399, %c0_137, %c0_138] : memref<8x4x96xf32, #tpu.memory_space<vmem>>, vector<1x4x96xf32>
    %401 = vector.shape_cast %400 : vector<1x4x96xf32> to vector<4x96xf32>
    %402 = arith.index_cast %392 : i32 to index
    %c0_139 = arith.constant 0 : index
    %c0_140 = arith.constant 0 : index
    %403 = vector.load %arg15[%402, %c0_139, %c0_140] : memref<8x4x96xf32, #tpu.memory_space<vmem>>, vector<1x4x96xf32>
    %404 = vector.shape_cast %403 : vector<1x4x96xf32> to vector<4x96xf32>
    %cst_141 = arith.constant dense<0.000000e+00> : vector<4x96xf32>
    %405 = tpu.matmul %357, %29, %cst_141 {dimension_numbers = #tpu.dot_dimension_numbers<[1], [0], [0], [1], [0, 0, 1, 1], [], []>} : vector<4x32xf32>, vector<32x96xf32>, vector<4x96xf32> -> vector<4x96xf32>
    %406 = vector.extract_strided_slice %401 {offsets = [0, 0], sizes = [4, 64], strides = [1, 1]} : vector<4x96xf32> to vector<4x64xf32>
    %407 = vector.extract_strided_slice %405 {offsets = [0, 0], sizes = [4, 64], strides = [1, 1]} : vector<4x96xf32> to vector<4x64xf32>
    %408 = arith.addf %406, %407 : vector<4x64xf32>
    %409 = arith.negf %408 : vector<4x64xf32>
    %410 = math.exp %409 : vector<4x64xf32>
    %cst_142 = arith.constant 1.000000e+00 : f32
    %411 = vector.broadcast %cst_142 : f32 to vector<4x64xf32>
    %412 = arith.addf %411, %410 : vector<4x64xf32>
    %413 = arith.divf %411, %412 : vector<4x64xf32>
    %414 = vector.extract_strided_slice %401 {offsets = [0, 64], sizes = [4, 32], strides = [1, 1]} : vector<4x96xf32> to vector<4x32xf32>
    %415 = vector.extract_strided_slice %413 {offsets = [0, 0], sizes = [4, 32], strides = [1, 1]} : vector<4x64xf32> to vector<4x32xf32>
    %416 = vector.extract_strided_slice %405 {offsets = [0, 64], sizes = [4, 32], strides = [1, 1]} : vector<4x96xf32> to vector<4x32xf32>
    %417 = vector.broadcast %33 : vector<1x32xf32> to vector<4x32xf32>
    %418 = arith.addf %416, %417 : vector<4x32xf32>
    %419 = arith.mulf %415, %418 : vector<4x32xf32>
    %420 = arith.addf %414, %419 : vector<4x32xf32>
    %421 = math.tanh %420 : vector<4x32xf32>
    %422 = vector.extract_strided_slice %413 {offsets = [0, 32], sizes = [4, 32], strides = [1, 1]} : vector<4x64xf32> to vector<4x32xf32>
    %cst_143 = arith.constant 1.000000e+00 : f32
    %423 = vector.broadcast %cst_143 : f32 to vector<4x32xf32>
    %424 = arith.subf %423, %422 : vector<4x32xf32>
    %425 = arith.mulf %395, %424 : vector<4x32xf32>
    %426 = arith.subf %421, %357 : vector<4x32xf32>
    %427 = arith.mulf %425, %426 : vector<4x32xf32>
    %428 = arith.addf %357, %427 : vector<4x32xf32>
    %429 = arith.mulf %395, %428 : vector<4x32xf32>
    %430 = arith.index_cast %c5_i32 : i32 to index
    %c0_144 = arith.constant 0 : index
    %c0_145 = arith.constant 0 : index
    %431 = vector.load %arg16[%430, %c0_144, %c0_145] : memref<8x4x32xf32, #tpu.memory_space<vmem>>, vector<1x4x32xf32>
    %432 = vector.shape_cast %431 : vector<1x4x32xf32> to vector<4x32xf32>
    %433 = vector.shape_cast %429 : vector<4x32xf32> to vector<1x4x32xf32>
    tpu.vector_store %arg16[%430, %c0_144, %c0_145], %433 {strides = array<i32>} : memref<8x4x32xf32, #tpu.memory_space<vmem>>, vector<1x4x32xf32>,
    %cst_146 = arith.constant dense<0.000000e+00> : vector<4x96xf32>
    %434 = tpu.matmul %386, %31, %cst_146 {dimension_numbers = #tpu.dot_dimension_numbers<[1], [0], [0], [1], [0, 0, 1, 1], [], []>} : vector<4x32xf32>, vector<32x96xf32>, vector<4x96xf32> -> vector<4x96xf32>
    %435 = vector.extract_strided_slice %404 {offsets = [0, 0], sizes = [4, 64], strides = [1, 1]} : vector<4x96xf32> to vector<4x64xf32>
    %436 = vector.extract_strided_slice %434 {offsets = [0, 0], sizes = [4, 64], strides = [1, 1]} : vector<4x96xf32> to vector<4x64xf32>
    %437 = arith.addf %435, %436 : vector<4x64xf32>
    %438 = arith.negf %437 : vector<4x64xf32>
    %439 = math.exp %438 : vector<4x64xf32>
    %cst_147 = arith.constant 1.000000e+00 : f32
    %440 = vector.broadcast %cst_147 : f32 to vector<4x64xf32>
    %441 = arith.addf %440, %439 : vector<4x64xf32>
    %442 = arith.divf %440, %441 : vector<4x64xf32>
    %443 = vector.extract_strided_slice %404 {offsets = [0, 64], sizes = [4, 32], strides = [1, 1]} : vector<4x96xf32> to vector<4x32xf32>
    %444 = vector.extract_strided_slice %442 {offsets = [0, 0], sizes = [4, 32], strides = [1, 1]} : vector<4x64xf32> to vector<4x32xf32>
    %445 = vector.extract_strided_slice %434 {offsets = [0, 64], sizes = [4, 32], strides = [1, 1]} : vector<4x96xf32> to vector<4x32xf32>
    %446 = vector.broadcast %35 : vector<1x32xf32> to vector<4x32xf32>
    %447 = arith.addf %445, %446 : vector<4x32xf32>
    %448 = arith.mulf %444, %447 : vector<4x32xf32>
    %449 = arith.addf %443, %448 : vector<4x32xf32>
    %450 = math.tanh %449 : vector<4x32xf32>
    %451 = vector.extract_strided_slice %442 {offsets = [0, 32], sizes = [4, 32], strides = [1, 1]} : vector<4x64xf32> to vector<4x32xf32>
    %cst_148 = arith.constant 1.000000e+00 : f32
    %452 = vector.broadcast %cst_148 : f32 to vector<4x32xf32>
    %453 = arith.subf %452, %451 : vector<4x32xf32>
    %454 = arith.mulf %398, %453 : vector<4x32xf32>
    %455 = arith.subf %450, %386 : vector<4x32xf32>
    %456 = arith.mulf %454, %455 : vector<4x32xf32>
    %457 = arith.addf %386, %456 : vector<4x32xf32>
    %458 = arith.mulf %398, %457 : vector<4x32xf32>
    %459 = arith.index_cast %392 : i32 to index
    %c0_149 = arith.constant 0 : index
    %c0_150 = arith.constant 0 : index
    %460 = vector.load %arg17[%459, %c0_149, %c0_150] : memref<8x4x32xf32, #tpu.memory_space<vmem>>, vector<1x4x32xf32>
    %461 = vector.shape_cast %460 : vector<1x4x32xf32> to vector<4x32xf32>
    %462 = vector.shape_cast %458 : vector<4x32xf32> to vector<1x4x32xf32>
    tpu.vector_store %arg17[%459, %c0_149, %c0_150], %462 {strides = array<i32>} : memref<8x4x32xf32, #tpu.memory_space<vmem>>, vector<1x4x32xf32>,
    %c6_i32 = arith.constant 6 : i32
    %c7_i32_151 = arith.constant 7 : i32
    %463 = arith.subi %c7_i32_151, %c6_i32 : i32
    %464 = arith.index_cast %c6_i32 : i32 to index
    %c0_152 = arith.constant 0 : index
    %c0_153 = arith.constant 0 : index
    %465 = vector.load %arg18[%464, %c0_152, %c0_153] : memref<8x4x32xf32, #tpu.memory_space<vmem>>, vector<1x4x32xf32>
    %466 = vector.shape_cast %465 : vector<1x4x32xf32> to vector<4x32xf32>
    %467 = arith.index_cast %463 : i32 to index
    %c0_154 = arith.constant 0 : index
    %c0_155 = arith.constant 0 : index
    %468 = vector.load %arg18[%467, %c0_154, %c0_155] : memref<8x4x32xf32, #tpu.memory_space<vmem>>, vector<1x4x32xf32>
    %469 = vector.shape_cast %468 : vector<1x4x32xf32> to vector<4x32xf32>
    %470 = arith.index_cast %c6_i32 : i32 to index
    %c0_156 = arith.constant 0 : index
    %c0_157 = arith.constant 0 : index
    %471 = vector.load %arg14[%470, %c0_156, %c0_157] : memref<8x4x96xf32, #tpu.memory_space<vmem>>, vector<1x4x96xf32>
    %472 = vector.shape_cast %471 : vector<1x4x96xf32> to vector<4x96xf32>
    %473 = arith.index_cast %463 : i32 to index
    %c0_158 = arith.constant 0 : index
    %c0_159 = arith.constant 0 : index
    %474 = vector.load %arg15[%473, %c0_158, %c0_159] : memref<8x4x96xf32, #tpu.memory_space<vmem>>, vector<1x4x96xf32>
    %475 = vector.shape_cast %474 : vector<1x4x96xf32> to vector<4x96xf32>
    %cst_160 = arith.constant dense<0.000000e+00> : vector<4x96xf32>
    %476 = tpu.matmul %428, %29, %cst_160 {dimension_numbers = #tpu.dot_dimension_numbers<[1], [0], [0], [1], [0, 0, 1, 1], [], []>} : vector<4x32xf32>, vector<32x96xf32>, vector<4x96xf32> -> vector<4x96xf32>
    %477 = vector.extract_strided_slice %472 {offsets = [0, 0], sizes = [4, 64], strides = [1, 1]} : vector<4x96xf32> to vector<4x64xf32>
    %478 = vector.extract_strided_slice %476 {offsets = [0, 0], sizes = [4, 64], strides = [1, 1]} : vector<4x96xf32> to vector<4x64xf32>
    %479 = arith.addf %477, %478 : vector<4x64xf32>
    %480 = arith.negf %479 : vector<4x64xf32>
    %481 = math.exp %480 : vector<4x64xf32>
    %cst_161 = arith.constant 1.000000e+00 : f32
    %482 = vector.broadcast %cst_161 : f32 to vector<4x64xf32>
    %483 = arith.addf %482, %481 : vector<4x64xf32>
    %484 = arith.divf %482, %483 : vector<4x64xf32>
    %485 = vector.extract_strided_slice %472 {offsets = [0, 64], sizes = [4, 32], strides = [1, 1]} : vector<4x96xf32> to vector<4x32xf32>
    %486 = vector.extract_strided_slice %484 {offsets = [0, 0], sizes = [4, 32], strides = [1, 1]} : vector<4x64xf32> to vector<4x32xf32>
    %487 = vector.extract_strided_slice %476 {offsets = [0, 64], sizes = [4, 32], strides = [1, 1]} : vector<4x96xf32> to vector<4x32xf32>
    %488 = vector.broadcast %33 : vector<1x32xf32> to vector<4x32xf32>
    %489 = arith.addf %487, %488 : vector<4x32xf32>
    %490 = arith.mulf %486, %489 : vector<4x32xf32>
    %491 = arith.addf %485, %490 : vector<4x32xf32>
    %492 = math.tanh %491 : vector<4x32xf32>
    %493 = vector.extract_strided_slice %484 {offsets = [0, 32], sizes = [4, 32], strides = [1, 1]} : vector<4x64xf32> to vector<4x32xf32>
    %cst_162 = arith.constant 1.000000e+00 : f32
    %494 = vector.broadcast %cst_162 : f32 to vector<4x32xf32>
    %495 = arith.subf %494, %493 : vector<4x32xf32>
    %496 = arith.mulf %466, %495 : vector<4x32xf32>
    %497 = arith.subf %492, %428 : vector<4x32xf32>
    %498 = arith.mulf %496, %497 : vector<4x32xf32>
    %499 = arith.addf %428, %498 : vector<4x32xf32>
    %500 = arith.mulf %466, %499 : vector<4x32xf32>
    %501 = arith.index_cast %c6_i32 : i32 to index
    %c0_163 = arith.constant 0 : index
    %c0_164 = arith.constant 0 : index
    %502 = vector.load %arg16[%501, %c0_163, %c0_164] : memref<8x4x32xf32, #tpu.memory_space<vmem>>, vector<1x4x32xf32>
    %503 = vector.shape_cast %502 : vector<1x4x32xf32> to vector<4x32xf32>
    %504 = vector.shape_cast %500 : vector<4x32xf32> to vector<1x4x32xf32>
    tpu.vector_store %arg16[%501, %c0_163, %c0_164], %504 {strides = array<i32>} : memref<8x4x32xf32, #tpu.memory_space<vmem>>, vector<1x4x32xf32>,
    %cst_165 = arith.constant dense<0.000000e+00> : vector<4x96xf32>
    %505 = tpu.matmul %457, %31, %cst_165 {dimension_numbers = #tpu.dot_dimension_numbers<[1], [0], [0], [1], [0, 0, 1, 1], [], []>} : vector<4x32xf32>, vector<32x96xf32>, vector<4x96xf32> -> vector<4x96xf32>
    %506 = vector.extract_strided_slice %475 {offsets = [0, 0], sizes = [4, 64], strides = [1, 1]} : vector<4x96xf32> to vector<4x64xf32>
    %507 = vector.extract_strided_slice %505 {offsets = [0, 0], sizes = [4, 64], strides = [1, 1]} : vector<4x96xf32> to vector<4x64xf32>
    %508 = arith.addf %506, %507 : vector<4x64xf32>
    %509 = arith.negf %508 : vector<4x64xf32>
    %510 = math.exp %509 : vector<4x64xf32>
    %cst_166 = arith.constant 1.000000e+00 : f32
    %511 = vector.broadcast %cst_166 : f32 to vector<4x64xf32>
    %512 = arith.addf %511, %510 : vector<4x64xf32>
    %513 = arith.divf %511, %512 : vector<4x64xf32>
    %514 = vector.extract_strided_slice %475 {offsets = [0, 64], sizes = [4, 32], strides = [1, 1]} : vector<4x96xf32> to vector<4x32xf32>
    %515 = vector.extract_strided_slice %513 {offsets = [0, 0], sizes = [4, 32], strides = [1, 1]} : vector<4x64xf32> to vector<4x32xf32>
    %516 = vector.extract_strided_slice %505 {offsets = [0, 64], sizes = [4, 32], strides = [1, 1]} : vector<4x96xf32> to vector<4x32xf32>
    %517 = vector.broadcast %35 : vector<1x32xf32> to vector<4x32xf32>
    %518 = arith.addf %516, %517 : vector<4x32xf32>
    %519 = arith.mulf %515, %518 : vector<4x32xf32>
    %520 = arith.addf %514, %519 : vector<4x32xf32>
    %521 = math.tanh %520 : vector<4x32xf32>
    %522 = vector.extract_strided_slice %513 {offsets = [0, 32], sizes = [4, 32], strides = [1, 1]} : vector<4x64xf32> to vector<4x32xf32>
    %cst_167 = arith.constant 1.000000e+00 : f32
    %523 = vector.broadcast %cst_167 : f32 to vector<4x32xf32>
    %524 = arith.subf %523, %522 : vector<4x32xf32>
    %525 = arith.mulf %469, %524 : vector<4x32xf32>
    %526 = arith.subf %521, %457 : vector<4x32xf32>
    %527 = arith.mulf %525, %526 : vector<4x32xf32>
    %528 = arith.addf %457, %527 : vector<4x32xf32>
    %529 = arith.mulf %469, %528 : vector<4x32xf32>
    %530 = arith.index_cast %463 : i32 to index
    %c0_168 = arith.constant 0 : index
    %c0_169 = arith.constant 0 : index
    %531 = vector.load %arg17[%530, %c0_168, %c0_169] : memref<8x4x32xf32, #tpu.memory_space<vmem>>, vector<1x4x32xf32>
    %532 = vector.shape_cast %531 : vector<1x4x32xf32> to vector<4x32xf32>
    %533 = vector.shape_cast %529 : vector<4x32xf32> to vector<1x4x32xf32>
    tpu.vector_store %arg17[%530, %c0_168, %c0_169], %533 {strides = array<i32>} : memref<8x4x32xf32, #tpu.memory_space<vmem>>, vector<1x4x32xf32>,
    %c7_i32_170 = arith.constant 7 : i32
    %c7_i32_171 = arith.constant 7 : i32
    %534 = arith.subi %c7_i32_171, %c7_i32_170 : i32
    %535 = arith.index_cast %c7_i32_170 : i32 to index
    %c0_172 = arith.constant 0 : index
    %c0_173 = arith.constant 0 : index
    %536 = vector.load %arg18[%535, %c0_172, %c0_173] : memref<8x4x32xf32, #tpu.memory_space<vmem>>, vector<1x4x32xf32>
    %537 = vector.shape_cast %536 : vector<1x4x32xf32> to vector<4x32xf32>
    %538 = arith.index_cast %534 : i32 to index
    %c0_174 = arith.constant 0 : index
    %c0_175 = arith.constant 0 : index
    %539 = vector.load %arg18[%538, %c0_174, %c0_175] : memref<8x4x32xf32, #tpu.memory_space<vmem>>, vector<1x4x32xf32>
    %540 = vector.shape_cast %539 : vector<1x4x32xf32> to vector<4x32xf32>
    %541 = arith.index_cast %c7_i32_170 : i32 to index
    %c0_176 = arith.constant 0 : index
    %c0_177 = arith.constant 0 : index
    %542 = vector.load %arg14[%541, %c0_176, %c0_177] : memref<8x4x96xf32, #tpu.memory_space<vmem>>, vector<1x4x96xf32>
    %543 = vector.shape_cast %542 : vector<1x4x96xf32> to vector<4x96xf32>
    %544 = arith.index_cast %534 : i32 to index
    %c0_178 = arith.constant 0 : index
    %c0_179 = arith.constant 0 : index
    %545 = vector.load %arg15[%544, %c0_178, %c0_179] : memref<8x4x96xf32, #tpu.memory_space<vmem>>, vector<1x4x96xf32>
    %546 = vector.shape_cast %545 : vector<1x4x96xf32> to vector<4x96xf32>
    %cst_180 = arith.constant dense<0.000000e+00> : vector<4x96xf32>
    %547 = tpu.matmul %499, %29, %cst_180 {dimension_numbers = #tpu.dot_dimension_numbers<[1], [0], [0], [1], [0, 0, 1, 1], [], []>} : vector<4x32xf32>, vector<32x96xf32>, vector<4x96xf32> -> vector<4x96xf32>
    %548 = vector.extract_strided_slice %543 {offsets = [0, 0], sizes = [4, 64], strides = [1, 1]} : vector<4x96xf32> to vector<4x64xf32>
    %549 = vector.extract_strided_slice %547 {offsets = [0, 0], sizes = [4, 64], strides = [1, 1]} : vector<4x96xf32> to vector<4x64xf32>
    %550 = arith.addf %548, %549 : vector<4x64xf32>
    %551 = arith.negf %550 : vector<4x64xf32>
    %552 = math.exp %551 : vector<4x64xf32>
    %cst_181 = arith.constant 1.000000e+00 : f32
    %553 = vector.broadcast %cst_181 : f32 to vector<4x64xf32>
    %554 = arith.addf %553, %552 : vector<4x64xf32>
    %555 = arith.divf %553, %554 : vector<4x64xf32>
    %556 = vector.extract_strided_slice %543 {offsets = [0, 64], sizes = [4, 32], strides = [1, 1]} : vector<4x96xf32> to vector<4x32xf32>
    %557 = vector.extract_strided_slice %555 {offsets = [0, 0], sizes = [4, 32], strides = [1, 1]} : vector<4x64xf32> to vector<4x32xf32>
    %558 = vector.extract_strided_slice %547 {offsets = [0, 64], sizes = [4, 32], strides = [1, 1]} : vector<4x96xf32> to vector<4x32xf32>
    %559 = vector.broadcast %33 : vector<1x32xf32> to vector<4x32xf32>
    %560 = arith.addf %558, %559 : vector<4x32xf32>
    %561 = arith.mulf %557, %560 : vector<4x32xf32>
    %562 = arith.addf %556, %561 : vector<4x32xf32>
    %563 = math.tanh %562 : vector<4x32xf32>
    %564 = vector.extract_strided_slice %555 {offsets = [0, 32], sizes = [4, 32], strides = [1, 1]} : vector<4x64xf32> to vector<4x32xf32>
    %cst_182 = arith.constant 1.000000e+00 : f32
    %565 = vector.broadcast %cst_182 : f32 to vector<4x32xf32>
    %566 = arith.subf %565, %564 : vector<4x32xf32>
    %567 = arith.mulf %537, %566 : vector<4x32xf32>
    %568 = arith.subf %563, %499 : vector<4x32xf32>
    %569 = arith.mulf %567, %568 : vector<4x32xf32>
    %570 = arith.addf %499, %569 : vector<4x32xf32>
    %571 = arith.mulf %537, %570 : vector<4x32xf32>
    %572 = arith.index_cast %c7_i32_170 : i32 to index
    %c0_183 = arith.constant 0 : index
    %c0_184 = arith.constant 0 : index
    %573 = vector.load %arg16[%572, %c0_183, %c0_184] : memref<8x4x32xf32, #tpu.memory_space<vmem>>, vector<1x4x32xf32>
    %574 = vector.shape_cast %573 : vector<1x4x32xf32> to vector<4x32xf32>
    %575 = vector.shape_cast %571 : vector<4x32xf32> to vector<1x4x32xf32>
    tpu.vector_store %arg16[%572, %c0_183, %c0_184], %575 {strides = array<i32>} : memref<8x4x32xf32, #tpu.memory_space<vmem>>, vector<1x4x32xf32>,
    %cst_185 = arith.constant dense<0.000000e+00> : vector<4x96xf32>
    %576 = tpu.matmul %528, %31, %cst_185 {dimension_numbers = #tpu.dot_dimension_numbers<[1], [0], [0], [1], [0, 0, 1, 1], [], []>} : vector<4x32xf32>, vector<32x96xf32>, vector<4x96xf32> -> vector<4x96xf32>
    %577 = vector.extract_strided_slice %546 {offsets = [0, 0], sizes = [4, 64], strides = [1, 1]} : vector<4x96xf32> to vector<4x64xf32>
    %578 = vector.extract_strided_slice %576 {offsets = [0, 0], sizes = [4, 64], strides = [1, 1]} : vector<4x96xf32> to vector<4x64xf32>
    %579 = arith.addf %577, %578 : vector<4x64xf32>
    %580 = arith.negf %579 : vector<4x64xf32>
    %581 = math.exp %580 : vector<4x64xf32>
    %cst_186 = arith.constant 1.000000e+00 : f32
    %582 = vector.broadcast %cst_186 : f32 to vector<4x64xf32>
    %583 = arith.addf %582, %581 : vector<4x64xf32>
    %584 = arith.divf %582, %583 : vector<4x64xf32>
    %585 = vector.extract_strided_slice %546 {offsets = [0, 64], sizes = [4, 32], strides = [1, 1]} : vector<4x96xf32> to vector<4x32xf32>
    %586 = vector.extract_strided_slice %584 {offsets = [0, 0], sizes = [4, 32], strides = [1, 1]} : vector<4x64xf32> to vector<4x32xf32>
    %587 = vector.extract_strided_slice %576 {offsets = [0, 64], sizes = [4, 32], strides = [1, 1]} : vector<4x96xf32> to vector<4x32xf32>
    %588 = vector.broadcast %35 : vector<1x32xf32> to vector<4x32xf32>
    %589 = arith.addf %587, %588 : vector<4x32xf32>
    %590 = arith.mulf %586, %589 : vector<4x32xf32>
    %591 = arith.addf %585, %590 : vector<4x32xf32>
    %592 = math.tanh %591 : vector<4x32xf32>
    %593 = vector.extract_strided_slice %584 {offsets = [0, 32], sizes = [4, 32], strides = [1, 1]} : vector<4x64xf32> to vector<4x32xf32>
    %cst_187 = arith.constant 1.000000e+00 : f32
    %594 = vector.broadcast %cst_187 : f32 to vector<4x32xf32>
    %595 = arith.subf %594, %593 : vector<4x32xf32>
    %596 = arith.mulf %540, %595 : vector<4x32xf32>
    %597 = arith.subf %592, %528 : vector<4x32xf32>
    %598 = arith.mulf %596, %597 : vector<4x32xf32>
    %599 = arith.addf %528, %598 : vector<4x32xf32>
    %600 = arith.mulf %540, %599 : vector<4x32xf32>
    %601 = arith.index_cast %534 : i32 to index
    %c0_188 = arith.constant 0 : index
    %c0_189 = arith.constant 0 : index
    %602 = vector.load %arg17[%601, %c0_188, %c0_189] : memref<8x4x32xf32, #tpu.memory_space<vmem>>, vector<1x4x32xf32>
    %603 = vector.shape_cast %602 : vector<1x4x32xf32> to vector<4x32xf32>
    %604 = vector.shape_cast %600 : vector<4x32xf32> to vector<1x4x32xf32>
    tpu.vector_store %arg17[%601, %c0_188, %c0_189], %604 {strides = array<i32>} : memref<8x4x32xf32, #tpu.memory_space<vmem>>, vector<1x4x32xf32>,
    %c8_i32 = arith.constant 8 : i32
    %c0_190 = arith.constant 0 : index
    %c0_191 = arith.constant 0 : index
    %c0_192 = arith.constant 0 : index
    %c0_193 = arith.constant 0 : index
    %605 = vector.load %arg13[%c0_190, %c0_191, %c0_192, %c0_193] : memref<2x2x4x32xf32, #tpu.memory_space<vmem>>, vector<1x1x4x32xf32>
    %606 = vector.shape_cast %605 : vector<1x1x4x32xf32> to vector<4x32xf32>
    %607 = vector.shape_cast %570 : vector<4x32xf32> to vector<1x1x4x32xf32>
    tpu.vector_store %arg13[%c0_190, %c0_191, %c0_192, %c0_193], %607 {strides = array<i32>} : memref<2x2x4x32xf32, #tpu.memory_space<vmem>>, vector<1x1x4x32xf32>,
    %c0_194 = arith.constant 0 : index
    %c1_195 = arith.constant 1 : index
    %c0_196 = arith.constant 0 : index
    %c0_197 = arith.constant 0 : index
    %608 = vector.load %arg13[%c0_194, %c1_195, %c0_196, %c0_197] : memref<2x2x4x32xf32, #tpu.memory_space<vmem>>, vector<1x1x4x32xf32>
    %609 = vector.shape_cast %608 : vector<1x1x4x32xf32> to vector<4x32xf32>
    %610 = vector.shape_cast %599 : vector<4x32xf32> to vector<1x1x4x32xf32>
    tpu.vector_store %arg13[%c0_194, %c1_195, %c0_196, %c0_197], %610 {strides = array<i32>} : memref<2x2x4x32xf32, #tpu.memory_space<vmem>>, vector<1x1x4x32xf32>,
    %c0_198 = arith.constant 0 : index
    %c0_199 = arith.constant 0 : index
    %c0_200 = arith.constant 0 : index
    %611 = vector.load %arg16[%c0_198, %c0_199, %c0_200] : memref<8x4x32xf32, #tpu.memory_space<vmem>>, vector<8x4x32xf32>
    %612 = vector.shape_cast %611 : vector<8x4x32xf32> to vector<32x32xf32>
    %c0_201 = arith.constant 0 : index
    %c0_202 = arith.constant 0 : index
    %c0_203 = arith.constant 0 : index
    %613 = vector.load %arg17[%c0_201, %c0_202, %c0_203] : memref<8x4x32xf32, #tpu.memory_space<vmem>>, vector<8x4x32xf32>
    %614 = vector.shape_cast %613 : vector<8x4x32xf32> to vector<32x32xf32>
    %c0_204 = arith.constant 0 : index
    %c0_205 = arith.constant 0 : index
    %c0_206 = arith.constant 0 : index
    %c0_207 = arith.constant 0 : index
    %615 = vector.load %arg7[%c0_204, %c0_205, %c0_206, %c0_207] : memref<2x2x32x96xf32, #tpu.memory_space<vmem>>, vector<1x1x32x96xf32>
    %616 = vector.shape_cast %615 : vector<1x1x32x96xf32> to vector<32x96xf32>
    %cst_208 = arith.constant dense<0.000000e+00> : vector<32x96xf32>
    %617 = tpu.matmul %612, %616, %cst_208 {dimension_numbers = #tpu.dot_dimension_numbers<[1], [0], [0], [1], [0, 0, 1, 1], [], []>} : vector<32x32xf32>, vector<32x96xf32>, vector<32x96xf32> -> vector<32x96xf32>
    %c0_209 = arith.constant 0 : index
    %c1_210 = arith.constant 1 : index
    %c0_211 = arith.constant 0 : index
    %c0_212 = arith.constant 0 : index
    %618 = vector.load %arg7[%c0_209, %c1_210, %c0_211, %c0_212] : memref<2x2x32x96xf32, #tpu.memory_space<vmem>>, vector<1x1x32x96xf32>
    %619 = vector.shape_cast %618 : vector<1x1x32x96xf32> to vector<32x96xf32>
    %cst_213 = arith.constant dense<0.000000e+00> : vector<32x96xf32>
    %620 = tpu.matmul %614, %619, %cst_213 {dimension_numbers = #tpu.dot_dimension_numbers<[1], [0], [0], [1], [0, 0, 1, 1], [], []>} : vector<32x32xf32>, vector<32x96xf32>, vector<32x96xf32> -> vector<32x96xf32>
    %621 = arith.addf %617, %620 : vector<32x96xf32>
    %c0_214 = arith.constant 0 : index
    %c0_215 = arith.constant 0 : index
    %c0_216 = arith.constant 0 : index
    %622 = vector.load %arg8[%c0_214, %c0_215, %c0_216] : memref<2x1x96xf32, #tpu.memory_space<vmem>>, vector<1x1x96xf32>
    %623 = vector.shape_cast %622 : vector<1x1x96xf32> to vector<1x96xf32>
    %624 = vector.broadcast %623 : vector<1x96xf32> to vector<32x96xf32>
    %625 = arith.addf %621, %624 : vector<32x96xf32>
    %626 = vector.shape_cast %625 : vector<32x96xf32> to vector<8x4x96xf32>
    %c0_217 = arith.constant 0 : index
    %c0_218 = arith.constant 0 : index
    %c0_219 = arith.constant 0 : index
    %627 = vector.load %arg14[%c0_217, %c0_218, %c0_219] : memref<8x4x96xf32, #tpu.memory_space<vmem>>, vector<8x4x96xf32>
    tpu.vector_store %arg14[%c0_217, %c0_218, %c0_219], %626 {strides = array<i32>} : memref<8x4x96xf32, #tpu.memory_space<vmem>>, vector<8x4x96xf32>,
    %c1_220 = arith.constant 1 : index
    %c0_221 = arith.constant 0 : index
    %c0_222 = arith.constant 0 : index
    %c0_223 = arith.constant 0 : index
    %628 = vector.load %arg7[%c1_220, %c0_221, %c0_222, %c0_223] : memref<2x2x32x96xf32, #tpu.memory_space<vmem>>, vector<1x1x32x96xf32>
    %629 = vector.shape_cast %628 : vector<1x1x32x96xf32> to vector<32x96xf32>
    %cst_224 = arith.constant dense<0.000000e+00> : vector<32x96xf32>
    %630 = tpu.matmul %612, %629, %cst_224 {dimension_numbers = #tpu.dot_dimension_numbers<[1], [0], [0], [1], [0, 0, 1, 1], [], []>} : vector<32x32xf32>, vector<32x96xf32>, vector<32x96xf32> -> vector<32x96xf32>
    %c1_225 = arith.constant 1 : index
    %c1_226 = arith.constant 1 : index
    %c0_227 = arith.constant 0 : index
    %c0_228 = arith.constant 0 : index
    %631 = vector.load %arg7[%c1_225, %c1_226, %c0_227, %c0_228] : memref<2x2x32x96xf32, #tpu.memory_space<vmem>>, vector<1x1x32x96xf32>
    %632 = vector.shape_cast %631 : vector<1x1x32x96xf32> to vector<32x96xf32>
    %cst_229 = arith.constant dense<0.000000e+00> : vector<32x96xf32>
    %633 = tpu.matmul %614, %632, %cst_229 {dimension_numbers = #tpu.dot_dimension_numbers<[1], [0], [0], [1], [0, 0, 1, 1], [], []>} : vector<32x32xf32>, vector<32x96xf32>, vector<32x96xf32> -> vector<32x96xf32>
    %634 = arith.addf %630, %633 : vector<32x96xf32>
    %c1_230 = arith.constant 1 : index
    %c0_231 = arith.constant 0 : index
    %c0_232 = arith.constant 0 : index
    %635 = vector.load %arg8[%c1_230, %c0_231, %c0_232] : memref<2x1x96xf32, #tpu.memory_space<vmem>>, vector<1x1x96xf32>
    %636 = vector.shape_cast %635 : vector<1x1x96xf32> to vector<1x96xf32>
    %637 = vector.broadcast %636 : vector<1x96xf32> to vector<32x96xf32>
    %638 = arith.addf %634, %637 : vector<32x96xf32>
    %639 = vector.shape_cast %638 : vector<32x96xf32> to vector<8x4x96xf32>
    %c0_233 = arith.constant 0 : index
    %c0_234 = arith.constant 0 : index
    %c0_235 = arith.constant 0 : index
    %640 = vector.load %arg15[%c0_233, %c0_234, %c0_235] : memref<8x4x96xf32, #tpu.memory_space<vmem>>, vector<8x4x96xf32>
    tpu.vector_store %arg15[%c0_233, %c0_234, %c0_235], %639 {strides = array<i32>} : memref<8x4x96xf32, #tpu.memory_space<vmem>>, vector<8x4x96xf32>,
    %c0_236 = arith.constant 0 : index
    %c0_237 = arith.constant 0 : index
    %c0_238 = arith.constant 0 : index
    %641 = vector.load %arg9[%c0_236, %c0_237, %c0_238] : memref<2x32x96xf32, #tpu.memory_space<vmem>>, vector<1x32x96xf32>
    %642 = vector.shape_cast %641 : vector<1x32x96xf32> to vector<32x96xf32>
    %c1_239 = arith.constant 1 : index
    %c0_240 = arith.constant 0 : index
    %c0_241 = arith.constant 0 : index
    %643 = vector.load %arg9[%c1_239, %c0_240, %c0_241] : memref<2x32x96xf32, #tpu.memory_space<vmem>>, vector<1x32x96xf32>
    %644 = vector.shape_cast %643 : vector<1x32x96xf32> to vector<32x96xf32>
    %c0_242 = arith.constant 0 : index
    %c0_243 = arith.constant 0 : index
    %c0_244 = arith.constant 0 : index
    %645 = vector.load %arg10[%c0_242, %c0_243, %c0_244] : memref<2x1x32xf32, #tpu.memory_space<vmem>>, vector<1x1x32xf32>
    %646 = vector.shape_cast %645 : vector<1x1x32xf32> to vector<1x32xf32>
    %c1_245 = arith.constant 1 : index
    %c0_246 = arith.constant 0 : index
    %c0_247 = arith.constant 0 : index
    %647 = vector.load %arg10[%c1_245, %c0_246, %c0_247] : memref<2x1x32xf32, #tpu.memory_space<vmem>>, vector<1x1x32xf32>
    %648 = vector.shape_cast %647 : vector<1x1x32xf32> to vector<1x32xf32>
    %cst_248 = arith.constant 0.000000e+00 : f32
    %649 = vector.broadcast %cst_248 : f32 to vector<4x32xf32>
    %c0_i32_249 = arith.constant 0 : i32
    %c7_i32_250 = arith.constant 7 : i32
    %650 = arith.subi %c7_i32_250, %c0_i32_249 : i32
    %651 = arith.index_cast %c0_i32_249 : i32 to index
    %c0_251 = arith.constant 0 : index
    %c0_252 = arith.constant 0 : index
    %652 = vector.load %arg18[%651, %c0_251, %c0_252] : memref<8x4x32xf32, #tpu.memory_space<vmem>>, vector<1x4x32xf32>
    %653 = vector.shape_cast %652 : vector<1x4x32xf32> to vector<4x32xf32>
    %654 = arith.index_cast %650 : i32 to index
    %c0_253 = arith.constant 0 : index
    %c0_254 = arith.constant 0 : index
    %655 = vector.load %arg18[%654, %c0_253, %c0_254] : memref<8x4x32xf32, #tpu.memory_space<vmem>>, vector<1x4x32xf32>
    %656 = vector.shape_cast %655 : vector<1x4x32xf32> to vector<4x32xf32>
    %657 = arith.index_cast %c0_i32_249 : i32 to index
    %c0_255 = arith.constant 0 : index
    %c0_256 = arith.constant 0 : index
    %658 = vector.load %arg14[%657, %c0_255, %c0_256] : memref<8x4x96xf32, #tpu.memory_space<vmem>>, vector<1x4x96xf32>
    %659 = vector.shape_cast %658 : vector<1x4x96xf32> to vector<4x96xf32>
    %660 = arith.index_cast %650 : i32 to index
    %c0_257 = arith.constant 0 : index
    %c0_258 = arith.constant 0 : index
    %661 = vector.load %arg15[%660, %c0_257, %c0_258] : memref<8x4x96xf32, #tpu.memory_space<vmem>>, vector<1x4x96xf32>
    %662 = vector.shape_cast %661 : vector<1x4x96xf32> to vector<4x96xf32>
    %cst_259 = arith.constant dense<0.000000e+00> : vector<4x96xf32>
    %663 = tpu.matmul %649, %642, %cst_259 {dimension_numbers = #tpu.dot_dimension_numbers<[1], [0], [0], [1], [0, 0, 1, 1], [], []>} : vector<4x32xf32>, vector<32x96xf32>, vector<4x96xf32> -> vector<4x96xf32>
    %664 = vector.extract_strided_slice %659 {offsets = [0, 0], sizes = [4, 64], strides = [1, 1]} : vector<4x96xf32> to vector<4x64xf32>
    %665 = vector.extract_strided_slice %663 {offsets = [0, 0], sizes = [4, 64], strides = [1, 1]} : vector<4x96xf32> to vector<4x64xf32>
    %666 = arith.addf %664, %665 : vector<4x64xf32>
    %667 = arith.negf %666 : vector<4x64xf32>
    %668 = math.exp %667 : vector<4x64xf32>
    %cst_260 = arith.constant 1.000000e+00 : f32
    %669 = vector.broadcast %cst_260 : f32 to vector<4x64xf32>
    %670 = arith.addf %669, %668 : vector<4x64xf32>
    %671 = arith.divf %669, %670 : vector<4x64xf32>
    %672 = vector.extract_strided_slice %659 {offsets = [0, 64], sizes = [4, 32], strides = [1, 1]} : vector<4x96xf32> to vector<4x32xf32>
    %673 = vector.extract_strided_slice %671 {offsets = [0, 0], sizes = [4, 32], strides = [1, 1]} : vector<4x64xf32> to vector<4x32xf32>
    %674 = vector.extract_strided_slice %663 {offsets = [0, 64], sizes = [4, 32], strides = [1, 1]} : vector<4x96xf32> to vector<4x32xf32>
    %675 = vector.broadcast %646 : vector<1x32xf32> to vector<4x32xf32>
    %676 = arith.addf %674, %675 : vector<4x32xf32>
    %677 = arith.mulf %673, %676 : vector<4x32xf32>
    %678 = arith.addf %672, %677 : vector<4x32xf32>
    %679 = math.tanh %678 : vector<4x32xf32>
    %680 = vector.extract_strided_slice %671 {offsets = [0, 32], sizes = [4, 32], strides = [1, 1]} : vector<4x64xf32> to vector<4x32xf32>
    %cst_261 = arith.constant 1.000000e+00 : f32
    %681 = vector.broadcast %cst_261 : f32 to vector<4x32xf32>
    %682 = arith.subf %681, %680 : vector<4x32xf32>
    %683 = arith.mulf %653, %682 : vector<4x32xf32>
    %684 = arith.subf %679, %649 : vector<4x32xf32>
    %685 = arith.mulf %683, %684 : vector<4x32xf32>
    %686 = arith.addf %649, %685 : vector<4x32xf32>
    %687 = arith.mulf %653, %686 : vector<4x32xf32>
    %688 = arith.index_cast %c0_i32_249 : i32 to index
    %c0_262 = arith.constant 0 : index
    %c0_263 = arith.constant 0 : index
    %689 = vector.load %arg11[%688, %c0_262, %c0_263] : memref<8x4x32xf32, #tpu.memory_space<vmem>>, vector<1x4x32xf32>
    %690 = vector.shape_cast %689 : vector<1x4x32xf32> to vector<4x32xf32>
    %691 = vector.shape_cast %687 : vector<4x32xf32> to vector<1x4x32xf32>
    tpu.vector_store %arg11[%688, %c0_262, %c0_263], %691 {strides = array<i32>} : memref<8x4x32xf32, #tpu.memory_space<vmem>>, vector<1x4x32xf32>,
    %cst_264 = arith.constant dense<0.000000e+00> : vector<4x96xf32>
    %692 = tpu.matmul %649, %644, %cst_264 {dimension_numbers = #tpu.dot_dimension_numbers<[1], [0], [0], [1], [0, 0, 1, 1], [], []>} : vector<4x32xf32>, vector<32x96xf32>, vector<4x96xf32> -> vector<4x96xf32>
    %693 = vector.extract_strided_slice %662 {offsets = [0, 0], sizes = [4, 64], strides = [1, 1]} : vector<4x96xf32> to vector<4x64xf32>
    %694 = vector.extract_strided_slice %692 {offsets = [0, 0], sizes = [4, 64], strides = [1, 1]} : vector<4x96xf32> to vector<4x64xf32>
    %695 = arith.addf %693, %694 : vector<4x64xf32>
    %696 = arith.negf %695 : vector<4x64xf32>
    %697 = math.exp %696 : vector<4x64xf32>
    %cst_265 = arith.constant 1.000000e+00 : f32
    %698 = vector.broadcast %cst_265 : f32 to vector<4x64xf32>
    %699 = arith.addf %698, %697 : vector<4x64xf32>
    %700 = arith.divf %698, %699 : vector<4x64xf32>
    %701 = vector.extract_strided_slice %662 {offsets = [0, 64], sizes = [4, 32], strides = [1, 1]} : vector<4x96xf32> to vector<4x32xf32>
    %702 = vector.extract_strided_slice %700 {offsets = [0, 0], sizes = [4, 32], strides = [1, 1]} : vector<4x64xf32> to vector<4x32xf32>
    %703 = vector.extract_strided_slice %692 {offsets = [0, 64], sizes = [4, 32], strides = [1, 1]} : vector<4x96xf32> to vector<4x32xf32>
    %704 = vector.broadcast %648 : vector<1x32xf32> to vector<4x32xf32>
    %705 = arith.addf %703, %704 : vector<4x32xf32>
    %706 = arith.mulf %702, %705 : vector<4x32xf32>
    %707 = arith.addf %701, %706 : vector<4x32xf32>
    %708 = math.tanh %707 : vector<4x32xf32>
    %709 = vector.extract_strided_slice %700 {offsets = [0, 32], sizes = [4, 32], strides = [1, 1]} : vector<4x64xf32> to vector<4x32xf32>
    %cst_266 = arith.constant 1.000000e+00 : f32
    %710 = vector.broadcast %cst_266 : f32 to vector<4x32xf32>
    %711 = arith.subf %710, %709 : vector<4x32xf32>
    %712 = arith.mulf %656, %711 : vector<4x32xf32>
    %713 = arith.subf %708, %649 : vector<4x32xf32>
    %714 = arith.mulf %712, %713 : vector<4x32xf32>
    %715 = arith.addf %649, %714 : vector<4x32xf32>
    %716 = arith.mulf %656, %715 : vector<4x32xf32>
    %717 = arith.index_cast %650 : i32 to index
    %c0_267 = arith.constant 0 : index
    %c0_268 = arith.constant 0 : index
    %718 = vector.load %arg12[%717, %c0_267, %c0_268] : memref<8x4x32xf32, #tpu.memory_space<vmem>>, vector<1x4x32xf32>
    %719 = vector.shape_cast %718 : vector<1x4x32xf32> to vector<4x32xf32>
    %720 = vector.shape_cast %716 : vector<4x32xf32> to vector<1x4x32xf32>
    tpu.vector_store %arg12[%717, %c0_267, %c0_268], %720 {strides = array<i32>} : memref<8x4x32xf32, #tpu.memory_space<vmem>>, vector<1x4x32xf32>,
    %c1_i32_269 = arith.constant 1 : i32
    %c7_i32_270 = arith.constant 7 : i32
    %721 = arith.subi %c7_i32_270, %c1_i32_269 : i32
    %722 = arith.index_cast %c1_i32_269 : i32 to index
    %c0_271 = arith.constant 0 : index
    %c0_272 = arith.constant 0 : index
    %723 = vector.load %arg18[%722, %c0_271, %c0_272] : memref<8x4x32xf32, #tpu.memory_space<vmem>>, vector<1x4x32xf32>
    %724 = vector.shape_cast %723 : vector<1x4x32xf32> to vector<4x32xf32>
    %725 = arith.index_cast %721 : i32 to index
    %c0_273 = arith.constant 0 : index
    %c0_274 = arith.constant 0 : index
    %726 = vector.load %arg18[%725, %c0_273, %c0_274] : memref<8x4x32xf32, #tpu.memory_space<vmem>>, vector<1x4x32xf32>
    %727 = vector.shape_cast %726 : vector<1x4x32xf32> to vector<4x32xf32>
    %728 = arith.index_cast %c1_i32_269 : i32 to index
    %c0_275 = arith.constant 0 : index
    %c0_276 = arith.constant 0 : index
    %729 = vector.load %arg14[%728, %c0_275, %c0_276] : memref<8x4x96xf32, #tpu.memory_space<vmem>>, vector<1x4x96xf32>
    %730 = vector.shape_cast %729 : vector<1x4x96xf32> to vector<4x96xf32>
    %731 = arith.index_cast %721 : i32 to index
    %c0_277 = arith.constant 0 : index
    %c0_278 = arith.constant 0 : index
    %732 = vector.load %arg15[%731, %c0_277, %c0_278] : memref<8x4x96xf32, #tpu.memory_space<vmem>>, vector<1x4x96xf32>
    %733 = vector.shape_cast %732 : vector<1x4x96xf32> to vector<4x96xf32>
    %cst_279 = arith.constant dense<0.000000e+00> : vector<4x96xf32>
    %734 = tpu.matmul %686, %642, %cst_279 {dimension_numbers = #tpu.dot_dimension_numbers<[1], [0], [0], [1], [0, 0, 1, 1], [], []>} : vector<4x32xf32>, vector<32x96xf32>, vector<4x96xf32> -> vector<4x96xf32>
    %735 = vector.extract_strided_slice %730 {offsets = [0, 0], sizes = [4, 64], strides = [1, 1]} : vector<4x96xf32> to vector<4x64xf32>
    %736 = vector.extract_strided_slice %734 {offsets = [0, 0], sizes = [4, 64], strides = [1, 1]} : vector<4x96xf32> to vector<4x64xf32>
    %737 = arith.addf %735, %736 : vector<4x64xf32>
    %738 = arith.negf %737 : vector<4x64xf32>
    %739 = math.exp %738 : vector<4x64xf32>
    %cst_280 = arith.constant 1.000000e+00 : f32
    %740 = vector.broadcast %cst_280 : f32 to vector<4x64xf32>
    %741 = arith.addf %740, %739 : vector<4x64xf32>
    %742 = arith.divf %740, %741 : vector<4x64xf32>
    %743 = vector.extract_strided_slice %730 {offsets = [0, 64], sizes = [4, 32], strides = [1, 1]} : vector<4x96xf32> to vector<4x32xf32>
    %744 = vector.extract_strided_slice %742 {offsets = [0, 0], sizes = [4, 32], strides = [1, 1]} : vector<4x64xf32> to vector<4x32xf32>
    %745 = vector.extract_strided_slice %734 {offsets = [0, 64], sizes = [4, 32], strides = [1, 1]} : vector<4x96xf32> to vector<4x32xf32>
    %746 = vector.broadcast %646 : vector<1x32xf32> to vector<4x32xf32>
    %747 = arith.addf %745, %746 : vector<4x32xf32>
    %748 = arith.mulf %744, %747 : vector<4x32xf32>
    %749 = arith.addf %743, %748 : vector<4x32xf32>
    %750 = math.tanh %749 : vector<4x32xf32>
    %751 = vector.extract_strided_slice %742 {offsets = [0, 32], sizes = [4, 32], strides = [1, 1]} : vector<4x64xf32> to vector<4x32xf32>
    %cst_281 = arith.constant 1.000000e+00 : f32
    %752 = vector.broadcast %cst_281 : f32 to vector<4x32xf32>
    %753 = arith.subf %752, %751 : vector<4x32xf32>
    %754 = arith.mulf %724, %753 : vector<4x32xf32>
    %755 = arith.subf %750, %686 : vector<4x32xf32>
    %756 = arith.mulf %754, %755 : vector<4x32xf32>
    %757 = arith.addf %686, %756 : vector<4x32xf32>
    %758 = arith.mulf %724, %757 : vector<4x32xf32>
    %759 = arith.index_cast %c1_i32_269 : i32 to index
    %c0_282 = arith.constant 0 : index
    %c0_283 = arith.constant 0 : index
    %760 = vector.load %arg11[%759, %c0_282, %c0_283] : memref<8x4x32xf32, #tpu.memory_space<vmem>>, vector<1x4x32xf32>
    %761 = vector.shape_cast %760 : vector<1x4x32xf32> to vector<4x32xf32>
    %762 = vector.shape_cast %758 : vector<4x32xf32> to vector<1x4x32xf32>
    tpu.vector_store %arg11[%759, %c0_282, %c0_283], %762 {strides = array<i32>} : memref<8x4x32xf32, #tpu.memory_space<vmem>>, vector<1x4x32xf32>,
    %cst_284 = arith.constant dense<0.000000e+00> : vector<4x96xf32>
    %763 = tpu.matmul %715, %644, %cst_284 {dimension_numbers = #tpu.dot_dimension_numbers<[1], [0], [0], [1], [0, 0, 1, 1], [], []>} : vector<4x32xf32>, vector<32x96xf32>, vector<4x96xf32> -> vector<4x96xf32>
    %764 = vector.extract_strided_slice %733 {offsets = [0, 0], sizes = [4, 64], strides = [1, 1]} : vector<4x96xf32> to vector<4x64xf32>
    %765 = vector.extract_strided_slice %763 {offsets = [0, 0], sizes = [4, 64], strides = [1, 1]} : vector<4x96xf32> to vector<4x64xf32>
    %766 = arith.addf %764, %765 : vector<4x64xf32>
    %767 = arith.negf %766 : vector<4x64xf32>
    %768 = math.exp %767 : vector<4x64xf32>
    %cst_285 = arith.constant 1.000000e+00 : f32
    %769 = vector.broadcast %cst_285 : f32 to vector<4x64xf32>
    %770 = arith.addf %769, %768 : vector<4x64xf32>
    %771 = arith.divf %769, %770 : vector<4x64xf32>
    %772 = vector.extract_strided_slice %733 {offsets = [0, 64], sizes = [4, 32], strides = [1, 1]} : vector<4x96xf32> to vector<4x32xf32>
    %773 = vector.extract_strided_slice %771 {offsets = [0, 0], sizes = [4, 32], strides = [1, 1]} : vector<4x64xf32> to vector<4x32xf32>
    %774 = vector.extract_strided_slice %763 {offsets = [0, 64], sizes = [4, 32], strides = [1, 1]} : vector<4x96xf32> to vector<4x32xf32>
    %775 = vector.broadcast %648 : vector<1x32xf32> to vector<4x32xf32>
    %776 = arith.addf %774, %775 : vector<4x32xf32>
    %777 = arith.mulf %773, %776 : vector<4x32xf32>
    %778 = arith.addf %772, %777 : vector<4x32xf32>
    %779 = math.tanh %778 : vector<4x32xf32>
    %780 = vector.extract_strided_slice %771 {offsets = [0, 32], sizes = [4, 32], strides = [1, 1]} : vector<4x64xf32> to vector<4x32xf32>
    %cst_286 = arith.constant 1.000000e+00 : f32
    %781 = vector.broadcast %cst_286 : f32 to vector<4x32xf32>
    %782 = arith.subf %781, %780 : vector<4x32xf32>
    %783 = arith.mulf %727, %782 : vector<4x32xf32>
    %784 = arith.subf %779, %715 : vector<4x32xf32>
    %785 = arith.mulf %783, %784 : vector<4x32xf32>
    %786 = arith.addf %715, %785 : vector<4x32xf32>
    %787 = arith.mulf %727, %786 : vector<4x32xf32>
    %788 = arith.index_cast %721 : i32 to index
    %c0_287 = arith.constant 0 : index
    %c0_288 = arith.constant 0 : index
    %789 = vector.load %arg12[%788, %c0_287, %c0_288] : memref<8x4x32xf32, #tpu.memory_space<vmem>>, vector<1x4x32xf32>
    %790 = vector.shape_cast %789 : vector<1x4x32xf32> to vector<4x32xf32>
    %791 = vector.shape_cast %787 : vector<4x32xf32> to vector<1x4x32xf32>
    tpu.vector_store %arg12[%788, %c0_287, %c0_288], %791 {strides = array<i32>} : memref<8x4x32xf32, #tpu.memory_space<vmem>>, vector<1x4x32xf32>,
    %c2_i32_289 = arith.constant 2 : i32
    %c7_i32_290 = arith.constant 7 : i32
    %792 = arith.subi %c7_i32_290, %c2_i32_289 : i32
    %793 = arith.index_cast %c2_i32_289 : i32 to index
    %c0_291 = arith.constant 0 : index
    %c0_292 = arith.constant 0 : index
    %794 = vector.load %arg18[%793, %c0_291, %c0_292] : memref<8x4x32xf32, #tpu.memory_space<vmem>>, vector<1x4x32xf32>
    %795 = vector.shape_cast %794 : vector<1x4x32xf32> to vector<4x32xf32>
    %796 = arith.index_cast %792 : i32 to index
    %c0_293 = arith.constant 0 : index
    %c0_294 = arith.constant 0 : index
    %797 = vector.load %arg18[%796, %c0_293, %c0_294] : memref<8x4x32xf32, #tpu.memory_space<vmem>>, vector<1x4x32xf32>
    %798 = vector.shape_cast %797 : vector<1x4x32xf32> to vector<4x32xf32>
    %799 = arith.index_cast %c2_i32_289 : i32 to index
    %c0_295 = arith.constant 0 : index
    %c0_296 = arith.constant 0 : index
    %800 = vector.load %arg14[%799, %c0_295, %c0_296] : memref<8x4x96xf32, #tpu.memory_space<vmem>>, vector<1x4x96xf32>
    %801 = vector.shape_cast %800 : vector<1x4x96xf32> to vector<4x96xf32>
    %802 = arith.index_cast %792 : i32 to index
    %c0_297 = arith.constant 0 : index
    %c0_298 = arith.constant 0 : index
    %803 = vector.load %arg15[%802, %c0_297, %c0_298] : memref<8x4x96xf32, #tpu.memory_space<vmem>>, vector<1x4x96xf32>
    %804 = vector.shape_cast %803 : vector<1x4x96xf32> to vector<4x96xf32>
    %cst_299 = arith.constant dense<0.000000e+00> : vector<4x96xf32>
    %805 = tpu.matmul %757, %642, %cst_299 {dimension_numbers = #tpu.dot_dimension_numbers<[1], [0], [0], [1], [0, 0, 1, 1], [], []>} : vector<4x32xf32>, vector<32x96xf32>, vector<4x96xf32> -> vector<4x96xf32>
    %806 = vector.extract_strided_slice %801 {offsets = [0, 0], sizes = [4, 64], strides = [1, 1]} : vector<4x96xf32> to vector<4x64xf32>
    %807 = vector.extract_strided_slice %805 {offsets = [0, 0], sizes = [4, 64], strides = [1, 1]} : vector<4x96xf32> to vector<4x64xf32>
    %808 = arith.addf %806, %807 : vector<4x64xf32>
    %809 = arith.negf %808 : vector<4x64xf32>
    %810 = math.exp %809 : vector<4x64xf32>
    %cst_300 = arith.constant 1.000000e+00 : f32
    %811 = vector.broadcast %cst_300 : f32 to vector<4x64xf32>
    %812 = arith.addf %811, %810 : vector<4x64xf32>
    %813 = arith.divf %811, %812 : vector<4x64xf32>
    %814 = vector.extract_strided_slice %801 {offsets = [0, 64], sizes = [4, 32], strides = [1, 1]} : vector<4x96xf32> to vector<4x32xf32>
    %815 = vector.extract_strided_slice %813 {offsets = [0, 0], sizes = [4, 32], strides = [1, 1]} : vector<4x64xf32> to vector<4x32xf32>
    %816 = vector.extract_strided_slice %805 {offsets = [0, 64], sizes = [4, 32], strides = [1, 1]} : vector<4x96xf32> to vector<4x32xf32>
    %817 = vector.broadcast %646 : vector<1x32xf32> to vector<4x32xf32>
    %818 = arith.addf %816, %817 : vector<4x32xf32>
    %819 = arith.mulf %815, %818 : vector<4x32xf32>
    %820 = arith.addf %814, %819 : vector<4x32xf32>
    %821 = math.tanh %820 : vector<4x32xf32>
    %822 = vector.extract_strided_slice %813 {offsets = [0, 32], sizes = [4, 32], strides = [1, 1]} : vector<4x64xf32> to vector<4x32xf32>
    %cst_301 = arith.constant 1.000000e+00 : f32
    %823 = vector.broadcast %cst_301 : f32 to vector<4x32xf32>
    %824 = arith.subf %823, %822 : vector<4x32xf32>
    %825 = arith.mulf %795, %824 : vector<4x32xf32>
    %826 = arith.subf %821, %757 : vector<4x32xf32>
    %827 = arith.mulf %825, %826 : vector<4x32xf32>
    %828 = arith.addf %757, %827 : vector<4x32xf32>
    %829 = arith.mulf %795, %828 : vector<4x32xf32>
    %830 = arith.index_cast %c2_i32_289 : i32 to index
    %c0_302 = arith.constant 0 : index
    %c0_303 = arith.constant 0 : index
    %831 = vector.load %arg11[%830, %c0_302, %c0_303] : memref<8x4x32xf32, #tpu.memory_space<vmem>>, vector<1x4x32xf32>
    %832 = vector.shape_cast %831 : vector<1x4x32xf32> to vector<4x32xf32>
    %833 = vector.shape_cast %829 : vector<4x32xf32> to vector<1x4x32xf32>
    tpu.vector_store %arg11[%830, %c0_302, %c0_303], %833 {strides = array<i32>} : memref<8x4x32xf32, #tpu.memory_space<vmem>>, vector<1x4x32xf32>,
    %cst_304 = arith.constant dense<0.000000e+00> : vector<4x96xf32>
    %834 = tpu.matmul %786, %644, %cst_304 {dimension_numbers = #tpu.dot_dimension_numbers<[1], [0], [0], [1], [0, 0, 1, 1], [], []>} : vector<4x32xf32>, vector<32x96xf32>, vector<4x96xf32> -> vector<4x96xf32>
    %835 = vector.extract_strided_slice %804 {offsets = [0, 0], sizes = [4, 64], strides = [1, 1]} : vector<4x96xf32> to vector<4x64xf32>
    %836 = vector.extract_strided_slice %834 {offsets = [0, 0], sizes = [4, 64], strides = [1, 1]} : vector<4x96xf32> to vector<4x64xf32>
    %837 = arith.addf %835, %836 : vector<4x64xf32>
    %838 = arith.negf %837 : vector<4x64xf32>
    %839 = math.exp %838 : vector<4x64xf32>
    %cst_305 = arith.constant 1.000000e+00 : f32
    %840 = vector.broadcast %cst_305 : f32 to vector<4x64xf32>
    %841 = arith.addf %840, %839 : vector<4x64xf32>
    %842 = arith.divf %840, %841 : vector<4x64xf32>
    %843 = vector.extract_strided_slice %804 {offsets = [0, 64], sizes = [4, 32], strides = [1, 1]} : vector<4x96xf32> to vector<4x32xf32>
    %844 = vector.extract_strided_slice %842 {offsets = [0, 0], sizes = [4, 32], strides = [1, 1]} : vector<4x64xf32> to vector<4x32xf32>
    %845 = vector.extract_strided_slice %834 {offsets = [0, 64], sizes = [4, 32], strides = [1, 1]} : vector<4x96xf32> to vector<4x32xf32>
    %846 = vector.broadcast %648 : vector<1x32xf32> to vector<4x32xf32>
    %847 = arith.addf %845, %846 : vector<4x32xf32>
    %848 = arith.mulf %844, %847 : vector<4x32xf32>
    %849 = arith.addf %843, %848 : vector<4x32xf32>
    %850 = math.tanh %849 : vector<4x32xf32>
    %851 = vector.extract_strided_slice %842 {offsets = [0, 32], sizes = [4, 32], strides = [1, 1]} : vector<4x64xf32> to vector<4x32xf32>
    %cst_306 = arith.constant 1.000000e+00 : f32
    %852 = vector.broadcast %cst_306 : f32 to vector<4x32xf32>
    %853 = arith.subf %852, %851 : vector<4x32xf32>
    %854 = arith.mulf %798, %853 : vector<4x32xf32>
    %855 = arith.subf %850, %786 : vector<4x32xf32>
    %856 = arith.mulf %854, %855 : vector<4x32xf32>
    %857 = arith.addf %786, %856 : vector<4x32xf32>
    %858 = arith.mulf %798, %857 : vector<4x32xf32>
    %859 = arith.index_cast %792 : i32 to index
    %c0_307 = arith.constant 0 : index
    %c0_308 = arith.constant 0 : index
    %860 = vector.load %arg12[%859, %c0_307, %c0_308] : memref<8x4x32xf32, #tpu.memory_space<vmem>>, vector<1x4x32xf32>
    %861 = vector.shape_cast %860 : vector<1x4x32xf32> to vector<4x32xf32>
    %862 = vector.shape_cast %858 : vector<4x32xf32> to vector<1x4x32xf32>
    tpu.vector_store %arg12[%859, %c0_307, %c0_308], %862 {strides = array<i32>} : memref<8x4x32xf32, #tpu.memory_space<vmem>>, vector<1x4x32xf32>,
    %c3_i32_309 = arith.constant 3 : i32
    %c7_i32_310 = arith.constant 7 : i32
    %863 = arith.subi %c7_i32_310, %c3_i32_309 : i32
    %864 = arith.index_cast %c3_i32_309 : i32 to index
    %c0_311 = arith.constant 0 : index
    %c0_312 = arith.constant 0 : index
    %865 = vector.load %arg18[%864, %c0_311, %c0_312] : memref<8x4x32xf32, #tpu.memory_space<vmem>>, vector<1x4x32xf32>
    %866 = vector.shape_cast %865 : vector<1x4x32xf32> to vector<4x32xf32>
    %867 = arith.index_cast %863 : i32 to index
    %c0_313 = arith.constant 0 : index
    %c0_314 = arith.constant 0 : index
    %868 = vector.load %arg18[%867, %c0_313, %c0_314] : memref<8x4x32xf32, #tpu.memory_space<vmem>>, vector<1x4x32xf32>
    %869 = vector.shape_cast %868 : vector<1x4x32xf32> to vector<4x32xf32>
    %870 = arith.index_cast %c3_i32_309 : i32 to index
    %c0_315 = arith.constant 0 : index
    %c0_316 = arith.constant 0 : index
    %871 = vector.load %arg14[%870, %c0_315, %c0_316] : memref<8x4x96xf32, #tpu.memory_space<vmem>>, vector<1x4x96xf32>
    %872 = vector.shape_cast %871 : vector<1x4x96xf32> to vector<4x96xf32>
    %873 = arith.index_cast %863 : i32 to index
    %c0_317 = arith.constant 0 : index
    %c0_318 = arith.constant 0 : index
    %874 = vector.load %arg15[%873, %c0_317, %c0_318] : memref<8x4x96xf32, #tpu.memory_space<vmem>>, vector<1x4x96xf32>
    %875 = vector.shape_cast %874 : vector<1x4x96xf32> to vector<4x96xf32>
    %cst_319 = arith.constant dense<0.000000e+00> : vector<4x96xf32>
    %876 = tpu.matmul %828, %642, %cst_319 {dimension_numbers = #tpu.dot_dimension_numbers<[1], [0], [0], [1], [0, 0, 1, 1], [], []>} : vector<4x32xf32>, vector<32x96xf32>, vector<4x96xf32> -> vector<4x96xf32>
    %877 = vector.extract_strided_slice %872 {offsets = [0, 0], sizes = [4, 64], strides = [1, 1]} : vector<4x96xf32> to vector<4x64xf32>
    %878 = vector.extract_strided_slice %876 {offsets = [0, 0], sizes = [4, 64], strides = [1, 1]} : vector<4x96xf32> to vector<4x64xf32>
    %879 = arith.addf %877, %878 : vector<4x64xf32>
    %880 = arith.negf %879 : vector<4x64xf32>
    %881 = math.exp %880 : vector<4x64xf32>
    %cst_320 = arith.constant 1.000000e+00 : f32
    %882 = vector.broadcast %cst_320 : f32 to vector<4x64xf32>
    %883 = arith.addf %882, %881 : vector<4x64xf32>
    %884 = arith.divf %882, %883 : vector<4x64xf32>
    %885 = vector.extract_strided_slice %872 {offsets = [0, 64], sizes = [4, 32], strides = [1, 1]} : vector<4x96xf32> to vector<4x32xf32>
    %886 = vector.extract_strided_slice %884 {offsets = [0, 0], sizes = [4, 32], strides = [1, 1]} : vector<4x64xf32> to vector<4x32xf32>
    %887 = vector.extract_strided_slice %876 {offsets = [0, 64], sizes = [4, 32], strides = [1, 1]} : vector<4x96xf32> to vector<4x32xf32>
    %888 = vector.broadcast %646 : vector<1x32xf32> to vector<4x32xf32>
    %889 = arith.addf %887, %888 : vector<4x32xf32>
    %890 = arith.mulf %886, %889 : vector<4x32xf32>
    %891 = arith.addf %885, %890 : vector<4x32xf32>
    %892 = math.tanh %891 : vector<4x32xf32>
    %893 = vector.extract_strided_slice %884 {offsets = [0, 32], sizes = [4, 32], strides = [1, 1]} : vector<4x64xf32> to vector<4x32xf32>
    %cst_321 = arith.constant 1.000000e+00 : f32
    %894 = vector.broadcast %cst_321 : f32 to vector<4x32xf32>
    %895 = arith.subf %894, %893 : vector<4x32xf32>
    %896 = arith.mulf %866, %895 : vector<4x32xf32>
    %897 = arith.subf %892, %828 : vector<4x32xf32>
    %898 = arith.mulf %896, %897 : vector<4x32xf32>
    %899 = arith.addf %828, %898 : vector<4x32xf32>
    %900 = arith.mulf %866, %899 : vector<4x32xf32>
    %901 = arith.index_cast %c3_i32_309 : i32 to index
    %c0_322 = arith.constant 0 : index
    %c0_323 = arith.constant 0 : index
    %902 = vector.load %arg11[%901, %c0_322, %c0_323] : memref<8x4x32xf32, #tpu.memory_space<vmem>>, vector<1x4x32xf32>
    %903 = vector.shape_cast %902 : vector<1x4x32xf32> to vector<4x32xf32>
    %904 = vector.shape_cast %900 : vector<4x32xf32> to vector<1x4x32xf32>
    tpu.vector_store %arg11[%901, %c0_322, %c0_323], %904 {strides = array<i32>} : memref<8x4x32xf32, #tpu.memory_space<vmem>>, vector<1x4x32xf32>,
    %cst_324 = arith.constant dense<0.000000e+00> : vector<4x96xf32>
    %905 = tpu.matmul %857, %644, %cst_324 {dimension_numbers = #tpu.dot_dimension_numbers<[1], [0], [0], [1], [0, 0, 1, 1], [], []>} : vector<4x32xf32>, vector<32x96xf32>, vector<4x96xf32> -> vector<4x96xf32>
    %906 = vector.extract_strided_slice %875 {offsets = [0, 0], sizes = [4, 64], strides = [1, 1]} : vector<4x96xf32> to vector<4x64xf32>
    %907 = vector.extract_strided_slice %905 {offsets = [0, 0], sizes = [4, 64], strides = [1, 1]} : vector<4x96xf32> to vector<4x64xf32>
    %908 = arith.addf %906, %907 : vector<4x64xf32>
    %909 = arith.negf %908 : vector<4x64xf32>
    %910 = math.exp %909 : vector<4x64xf32>
    %cst_325 = arith.constant 1.000000e+00 : f32
    %911 = vector.broadcast %cst_325 : f32 to vector<4x64xf32>
    %912 = arith.addf %911, %910 : vector<4x64xf32>
    %913 = arith.divf %911, %912 : vector<4x64xf32>
    %914 = vector.extract_strided_slice %875 {offsets = [0, 64], sizes = [4, 32], strides = [1, 1]} : vector<4x96xf32> to vector<4x32xf32>
    %915 = vector.extract_strided_slice %913 {offsets = [0, 0], sizes = [4, 32], strides = [1, 1]} : vector<4x64xf32> to vector<4x32xf32>
    %916 = vector.extract_strided_slice %905 {offsets = [0, 64], sizes = [4, 32], strides = [1, 1]} : vector<4x96xf32> to vector<4x32xf32>
    %917 = vector.broadcast %648 : vector<1x32xf32> to vector<4x32xf32>
    %918 = arith.addf %916, %917 : vector<4x32xf32>
    %919 = arith.mulf %915, %918 : vector<4x32xf32>
    %920 = arith.addf %914, %919 : vector<4x32xf32>
    %921 = math.tanh %920 : vector<4x32xf32>
    %922 = vector.extract_strided_slice %913 {offsets = [0, 32], sizes = [4, 32], strides = [1, 1]} : vector<4x64xf32> to vector<4x32xf32>
    %cst_326 = arith.constant 1.000000e+00 : f32
    %923 = vector.broadcast %cst_326 : f32 to vector<4x32xf32>
    %924 = arith.subf %923, %922 : vector<4x32xf32>
    %925 = arith.mulf %869, %924 : vector<4x32xf32>
    %926 = arith.subf %921, %857 : vector<4x32xf32>
    %927 = arith.mulf %925, %926 : vector<4x32xf32>
    %928 = arith.addf %857, %927 : vector<4x32xf32>
    %929 = arith.mulf %869, %928 : vector<4x32xf32>
    %930 = arith.index_cast %863 : i32 to index
    %c0_327 = arith.constant 0 : index
    %c0_328 = arith.constant 0 : index
    %931 = vector.load %arg12[%930, %c0_327, %c0_328] : memref<8x4x32xf32, #tpu.memory_space<vmem>>, vector<1x4x32xf32>
    %932 = vector.shape_cast %931 : vector<1x4x32xf32> to vector<4x32xf32>
    %933 = vector.shape_cast %929 : vector<4x32xf32> to vector<1x4x32xf32>
    tpu.vector_store %arg12[%930, %c0_327, %c0_328], %933 {strides = array<i32>} : memref<8x4x32xf32, #tpu.memory_space<vmem>>, vector<1x4x32xf32>,
    %c4_i32_329 = arith.constant 4 : i32
    %c7_i32_330 = arith.constant 7 : i32
    %934 = arith.subi %c7_i32_330, %c4_i32_329 : i32
    %935 = arith.index_cast %c4_i32_329 : i32 to index
    %c0_331 = arith.constant 0 : index
    %c0_332 = arith.constant 0 : index
    %936 = vector.load %arg18[%935, %c0_331, %c0_332] : memref<8x4x32xf32, #tpu.memory_space<vmem>>, vector<1x4x32xf32>
    %937 = vector.shape_cast %936 : vector<1x4x32xf32> to vector<4x32xf32>
    %938 = arith.index_cast %934 : i32 to index
    %c0_333 = arith.constant 0 : index
    %c0_334 = arith.constant 0 : index
    %939 = vector.load %arg18[%938, %c0_333, %c0_334] : memref<8x4x32xf32, #tpu.memory_space<vmem>>, vector<1x4x32xf32>
    %940 = vector.shape_cast %939 : vector<1x4x32xf32> to vector<4x32xf32>
    %941 = arith.index_cast %c4_i32_329 : i32 to index
    %c0_335 = arith.constant 0 : index
    %c0_336 = arith.constant 0 : index
    %942 = vector.load %arg14[%941, %c0_335, %c0_336] : memref<8x4x96xf32, #tpu.memory_space<vmem>>, vector<1x4x96xf32>
    %943 = vector.shape_cast %942 : vector<1x4x96xf32> to vector<4x96xf32>
    %944 = arith.index_cast %934 : i32 to index
    %c0_337 = arith.constant 0 : index
    %c0_338 = arith.constant 0 : index
    %945 = vector.load %arg15[%944, %c0_337, %c0_338] : memref<8x4x96xf32, #tpu.memory_space<vmem>>, vector<1x4x96xf32>
    %946 = vector.shape_cast %945 : vector<1x4x96xf32> to vector<4x96xf32>
    %cst_339 = arith.constant dense<0.000000e+00> : vector<4x96xf32>
    %947 = tpu.matmul %899, %642, %cst_339 {dimension_numbers = #tpu.dot_dimension_numbers<[1], [0], [0], [1], [0, 0, 1, 1], [], []>} : vector<4x32xf32>, vector<32x96xf32>, vector<4x96xf32> -> vector<4x96xf32>
    %948 = vector.extract_strided_slice %943 {offsets = [0, 0], sizes = [4, 64], strides = [1, 1]} : vector<4x96xf32> to vector<4x64xf32>
    %949 = vector.extract_strided_slice %947 {offsets = [0, 0], sizes = [4, 64], strides = [1, 1]} : vector<4x96xf32> to vector<4x64xf32>
    %950 = arith.addf %948, %949 : vector<4x64xf32>
    %951 = arith.negf %950 : vector<4x64xf32>
    %952 = math.exp %951 : vector<4x64xf32>
    %cst_340 = arith.constant 1.000000e+00 : f32
    %953 = vector.broadcast %cst_340 : f32 to vector<4x64xf32>
    %954 = arith.addf %953, %952 : vector<4x64xf32>
    %955 = arith.divf %953, %954 : vector<4x64xf32>
    %956 = vector.extract_strided_slice %943 {offsets = [0, 64], sizes = [4, 32], strides = [1, 1]} : vector<4x96xf32> to vector<4x32xf32>
    %957 = vector.extract_strided_slice %955 {offsets = [0, 0], sizes = [4, 32], strides = [1, 1]} : vector<4x64xf32> to vector<4x32xf32>
    %958 = vector.extract_strided_slice %947 {offsets = [0, 64], sizes = [4, 32], strides = [1, 1]} : vector<4x96xf32> to vector<4x32xf32>
    %959 = vector.broadcast %646 : vector<1x32xf32> to vector<4x32xf32>
    %960 = arith.addf %958, %959 : vector<4x32xf32>
    %961 = arith.mulf %957, %960 : vector<4x32xf32>
    %962 = arith.addf %956, %961 : vector<4x32xf32>
    %963 = math.tanh %962 : vector<4x32xf32>
    %964 = vector.extract_strided_slice %955 {offsets = [0, 32], sizes = [4, 32], strides = [1, 1]} : vector<4x64xf32> to vector<4x32xf32>
    %cst_341 = arith.constant 1.000000e+00 : f32
    %965 = vector.broadcast %cst_341 : f32 to vector<4x32xf32>
    %966 = arith.subf %965, %964 : vector<4x32xf32>
    %967 = arith.mulf %937, %966 : vector<4x32xf32>
    %968 = arith.subf %963, %899 : vector<4x32xf32>
    %969 = arith.mulf %967, %968 : vector<4x32xf32>
    %970 = arith.addf %899, %969 : vector<4x32xf32>
    %971 = arith.mulf %937, %970 : vector<4x32xf32>
    %972 = arith.index_cast %c4_i32_329 : i32 to index
    %c0_342 = arith.constant 0 : index
    %c0_343 = arith.constant 0 : index
    %973 = vector.load %arg11[%972, %c0_342, %c0_343] : memref<8x4x32xf32, #tpu.memory_space<vmem>>, vector<1x4x32xf32>
    %974 = vector.shape_cast %973 : vector<1x4x32xf32> to vector<4x32xf32>
    %975 = vector.shape_cast %971 : vector<4x32xf32> to vector<1x4x32xf32>
    tpu.vector_store %arg11[%972, %c0_342, %c0_343], %975 {strides = array<i32>} : memref<8x4x32xf32, #tpu.memory_space<vmem>>, vector<1x4x32xf32>,
    %cst_344 = arith.constant dense<0.000000e+00> : vector<4x96xf32>
    %976 = tpu.matmul %928, %644, %cst_344 {dimension_numbers = #tpu.dot_dimension_numbers<[1], [0], [0], [1], [0, 0, 1, 1], [], []>} : vector<4x32xf32>, vector<32x96xf32>, vector<4x96xf32> -> vector<4x96xf32>
    %977 = vector.extract_strided_slice %946 {offsets = [0, 0], sizes = [4, 64], strides = [1, 1]} : vector<4x96xf32> to vector<4x64xf32>
    %978 = vector.extract_strided_slice %976 {offsets = [0, 0], sizes = [4, 64], strides = [1, 1]} : vector<4x96xf32> to vector<4x64xf32>
    %979 = arith.addf %977, %978 : vector<4x64xf32>
    %980 = arith.negf %979 : vector<4x64xf32>
    %981 = math.exp %980 : vector<4x64xf32>
    %cst_345 = arith.constant 1.000000e+00 : f32
    %982 = vector.broadcast %cst_345 : f32 to vector<4x64xf32>
    %983 = arith.addf %982, %981 : vector<4x64xf32>
    %984 = arith.divf %982, %983 : vector<4x64xf32>
    %985 = vector.extract_strided_slice %946 {offsets = [0, 64], sizes = [4, 32], strides = [1, 1]} : vector<4x96xf32> to vector<4x32xf32>
    %986 = vector.extract_strided_slice %984 {offsets = [0, 0], sizes = [4, 32], strides = [1, 1]} : vector<4x64xf32> to vector<4x32xf32>
    %987 = vector.extract_strided_slice %976 {offsets = [0, 64], sizes = [4, 32], strides = [1, 1]} : vector<4x96xf32> to vector<4x32xf32>
    %988 = vector.broadcast %648 : vector<1x32xf32> to vector<4x32xf32>
    %989 = arith.addf %987, %988 : vector<4x32xf32>
    %990 = arith.mulf %986, %989 : vector<4x32xf32>
    %991 = arith.addf %985, %990 : vector<4x32xf32>
    %992 = math.tanh %991 : vector<4x32xf32>
    %993 = vector.extract_strided_slice %984 {offsets = [0, 32], sizes = [4, 32], strides = [1, 1]} : vector<4x64xf32> to vector<4x32xf32>
    %cst_346 = arith.constant 1.000000e+00 : f32
    %994 = vector.broadcast %cst_346 : f32 to vector<4x32xf32>
    %995 = arith.subf %994, %993 : vector<4x32xf32>
    %996 = arith.mulf %940, %995 : vector<4x32xf32>
    %997 = arith.subf %992, %928 : vector<4x32xf32>
    %998 = arith.mulf %996, %997 : vector<4x32xf32>
    %999 = arith.addf %928, %998 : vector<4x32xf32>
    %1000 = arith.mulf %940, %999 : vector<4x32xf32>
    %1001 = arith.index_cast %934 : i32 to index
    %c0_347 = arith.constant 0 : index
    %c0_348 = arith.constant 0 : index
    %1002 = vector.load %arg12[%1001, %c0_347, %c0_348] : memref<8x4x32xf32, #tpu.memory_space<vmem>>, vector<1x4x32xf32>
    %1003 = vector.shape_cast %1002 : vector<1x4x32xf32> to vector<4x32xf32>
    %1004 = vector.shape_cast %1000 : vector<4x32xf32> to vector<1x4x32xf32>
    tpu.vector_store %arg12[%1001, %c0_347, %c0_348], %1004 {strides = array<i32>} : memref<8x4x32xf32, #tpu.memory_space<vmem>>, vector<1x4x32xf32>,
    %c5_i32_349 = arith.constant 5 : i32
    %c7_i32_350 = arith.constant 7 : i32
    %1005 = arith.subi %c7_i32_350, %c5_i32_349 : i32
    %1006 = arith.index_cast %c5_i32_349 : i32 to index
    %c0_351 = arith.constant 0 : index
    %c0_352 = arith.constant 0 : index
    %1007 = vector.load %arg18[%1006, %c0_351, %c0_352] : memref<8x4x32xf32, #tpu.memory_space<vmem>>, vector<1x4x32xf32>
    %1008 = vector.shape_cast %1007 : vector<1x4x32xf32> to vector<4x32xf32>
    %1009 = arith.index_cast %1005 : i32 to index
    %c0_353 = arith.constant 0 : index
    %c0_354 = arith.constant 0 : index
    %1010 = vector.load %arg18[%1009, %c0_353, %c0_354] : memref<8x4x32xf32, #tpu.memory_space<vmem>>, vector<1x4x32xf32>
    %1011 = vector.shape_cast %1010 : vector<1x4x32xf32> to vector<4x32xf32>
    %1012 = arith.index_cast %c5_i32_349 : i32 to index
    %c0_355 = arith.constant 0 : index
    %c0_356 = arith.constant 0 : index
    %1013 = vector.load %arg14[%1012, %c0_355, %c0_356] : memref<8x4x96xf32, #tpu.memory_space<vmem>>, vector<1x4x96xf32>
    %1014 = vector.shape_cast %1013 : vector<1x4x96xf32> to vector<4x96xf32>
    %1015 = arith.index_cast %1005 : i32 to index
    %c0_357 = arith.constant 0 : index
    %c0_358 = arith.constant 0 : index
    %1016 = vector.load %arg15[%1015, %c0_357, %c0_358] : memref<8x4x96xf32, #tpu.memory_space<vmem>>, vector<1x4x96xf32>
    %1017 = vector.shape_cast %1016 : vector<1x4x96xf32> to vector<4x96xf32>
    %cst_359 = arith.constant dense<0.000000e+00> : vector<4x96xf32>
    %1018 = tpu.matmul %970, %642, %cst_359 {dimension_numbers = #tpu.dot_dimension_numbers<[1], [0], [0], [1], [0, 0, 1, 1], [], []>} : vector<4x32xf32>, vector<32x96xf32>, vector<4x96xf32> -> vector<4x96xf32>
    %1019 = vector.extract_strided_slice %1014 {offsets = [0, 0], sizes = [4, 64], strides = [1, 1]} : vector<4x96xf32> to vector<4x64xf32>
    %1020 = vector.extract_strided_slice %1018 {offsets = [0, 0], sizes = [4, 64], strides = [1, 1]} : vector<4x96xf32> to vector<4x64xf32>
    %1021 = arith.addf %1019, %1020 : vector<4x64xf32>
    %1022 = arith.negf %1021 : vector<4x64xf32>
    %1023 = math.exp %1022 : vector<4x64xf32>
    %cst_360 = arith.constant 1.000000e+00 : f32
    %1024 = vector.broadcast %cst_360 : f32 to vector<4x64xf32>
    %1025 = arith.addf %1024, %1023 : vector<4x64xf32>
    %1026 = arith.divf %1024, %1025 : vector<4x64xf32>
    %1027 = vector.extract_strided_slice %1014 {offsets = [0, 64], sizes = [4, 32], strides = [1, 1]} : vector<4x96xf32> to vector<4x32xf32>
    %1028 = vector.extract_strided_slice %1026 {offsets = [0, 0], sizes = [4, 32], strides = [1, 1]} : vector<4x64xf32> to vector<4x32xf32>
    %1029 = vector.extract_strided_slice %1018 {offsets = [0, 64], sizes = [4, 32], strides = [1, 1]} : vector<4x96xf32> to vector<4x32xf32>
    %1030 = vector.broadcast %646 : vector<1x32xf32> to vector<4x32xf32>
    %1031 = arith.addf %1029, %1030 : vector<4x32xf32>
    %1032 = arith.mulf %1028, %1031 : vector<4x32xf32>
    %1033 = arith.addf %1027, %1032 : vector<4x32xf32>
    %1034 = math.tanh %1033 : vector<4x32xf32>
    %1035 = vector.extract_strided_slice %1026 {offsets = [0, 32], sizes = [4, 32], strides = [1, 1]} : vector<4x64xf32> to vector<4x32xf32>
    %cst_361 = arith.constant 1.000000e+00 : f32
    %1036 = vector.broadcast %cst_361 : f32 to vector<4x32xf32>
    %1037 = arith.subf %1036, %1035 : vector<4x32xf32>
    %1038 = arith.mulf %1008, %1037 : vector<4x32xf32>
    %1039 = arith.subf %1034, %970 : vector<4x32xf32>
    %1040 = arith.mulf %1038, %1039 : vector<4x32xf32>
    %1041 = arith.addf %970, %1040 : vector<4x32xf32>
    %1042 = arith.mulf %1008, %1041 : vector<4x32xf32>
    %1043 = arith.index_cast %c5_i32_349 : i32 to index
    %c0_362 = arith.constant 0 : index
    %c0_363 = arith.constant 0 : index
    %1044 = vector.load %arg11[%1043, %c0_362, %c0_363] : memref<8x4x32xf32, #tpu.memory_space<vmem>>, vector<1x4x32xf32>
    %1045 = vector.shape_cast %1044 : vector<1x4x32xf32> to vector<4x32xf32>
    %1046 = vector.shape_cast %1042 : vector<4x32xf32> to vector<1x4x32xf32>
    tpu.vector_store %arg11[%1043, %c0_362, %c0_363], %1046 {strides = array<i32>} : memref<8x4x32xf32, #tpu.memory_space<vmem>>, vector<1x4x32xf32>,
    %cst_364 = arith.constant dense<0.000000e+00> : vector<4x96xf32>
    %1047 = tpu.matmul %999, %644, %cst_364 {dimension_numbers = #tpu.dot_dimension_numbers<[1], [0], [0], [1], [0, 0, 1, 1], [], []>} : vector<4x32xf32>, vector<32x96xf32>, vector<4x96xf32> -> vector<4x96xf32>
    %1048 = vector.extract_strided_slice %1017 {offsets = [0, 0], sizes = [4, 64], strides = [1, 1]} : vector<4x96xf32> to vector<4x64xf32>
    %1049 = vector.extract_strided_slice %1047 {offsets = [0, 0], sizes = [4, 64], strides = [1, 1]} : vector<4x96xf32> to vector<4x64xf32>
    %1050 = arith.addf %1048, %1049 : vector<4x64xf32>
    %1051 = arith.negf %1050 : vector<4x64xf32>
    %1052 = math.exp %1051 : vector<4x64xf32>
    %cst_365 = arith.constant 1.000000e+00 : f32
    %1053 = vector.broadcast %cst_365 : f32 to vector<4x64xf32>
    %1054 = arith.addf %1053, %1052 : vector<4x64xf32>
    %1055 = arith.divf %1053, %1054 : vector<4x64xf32>
    %1056 = vector.extract_strided_slice %1017 {offsets = [0, 64], sizes = [4, 32], strides = [1, 1]} : vector<4x96xf32> to vector<4x32xf32>
    %1057 = vector.extract_strided_slice %1055 {offsets = [0, 0], sizes = [4, 32], strides = [1, 1]} : vector<4x64xf32> to vector<4x32xf32>
    %1058 = vector.extract_strided_slice %1047 {offsets = [0, 64], sizes = [4, 32], strides = [1, 1]} : vector<4x96xf32> to vector<4x32xf32>
    %1059 = vector.broadcast %648 : vector<1x32xf32> to vector<4x32xf32>
    %1060 = arith.addf %1058, %1059 : vector<4x32xf32>
    %1061 = arith.mulf %1057, %1060 : vector<4x32xf32>
    %1062 = arith.addf %1056, %1061 : vector<4x32xf32>
    %1063 = math.tanh %1062 : vector<4x32xf32>
    %1064 = vector.extract_strided_slice %1055 {offsets = [0, 32], sizes = [4, 32], strides = [1, 1]} : vector<4x64xf32> to vector<4x32xf32>
    %cst_366 = arith.constant 1.000000e+00 : f32
    %1065 = vector.broadcast %cst_366 : f32 to vector<4x32xf32>
    %1066 = arith.subf %1065, %1064 : vector<4x32xf32>
    %1067 = arith.mulf %1011, %1066 : vector<4x32xf32>
    %1068 = arith.subf %1063, %999 : vector<4x32xf32>
    %1069 = arith.mulf %1067, %1068 : vector<4x32xf32>
    %1070 = arith.addf %999, %1069 : vector<4x32xf32>
    %1071 = arith.mulf %1011, %1070 : vector<4x32xf32>
    %1072 = arith.index_cast %1005 : i32 to index
    %c0_367 = arith.constant 0 : index
    %c0_368 = arith.constant 0 : index
    %1073 = vector.load %arg12[%1072, %c0_367, %c0_368] : memref<8x4x32xf32, #tpu.memory_space<vmem>>, vector<1x4x32xf32>
    %1074 = vector.shape_cast %1073 : vector<1x4x32xf32> to vector<4x32xf32>
    %1075 = vector.shape_cast %1071 : vector<4x32xf32> to vector<1x4x32xf32>
    tpu.vector_store %arg12[%1072, %c0_367, %c0_368], %1075 {strides = array<i32>} : memref<8x4x32xf32, #tpu.memory_space<vmem>>, vector<1x4x32xf32>,
    %c6_i32_369 = arith.constant 6 : i32
    %c7_i32_370 = arith.constant 7 : i32
    %1076 = arith.subi %c7_i32_370, %c6_i32_369 : i32
    %1077 = arith.index_cast %c6_i32_369 : i32 to index
    %c0_371 = arith.constant 0 : index
    %c0_372 = arith.constant 0 : index
    %1078 = vector.load %arg18[%1077, %c0_371, %c0_372] : memref<8x4x32xf32, #tpu.memory_space<vmem>>, vector<1x4x32xf32>
    %1079 = vector.shape_cast %1078 : vector<1x4x32xf32> to vector<4x32xf32>
    %1080 = arith.index_cast %1076 : i32 to index
    %c0_373 = arith.constant 0 : index
    %c0_374 = arith.constant 0 : index
    %1081 = vector.load %arg18[%1080, %c0_373, %c0_374] : memref<8x4x32xf32, #tpu.memory_space<vmem>>, vector<1x4x32xf32>
    %1082 = vector.shape_cast %1081 : vector<1x4x32xf32> to vector<4x32xf32>
    %1083 = arith.index_cast %c6_i32_369 : i32 to index
    %c0_375 = arith.constant 0 : index
    %c0_376 = arith.constant 0 : index
    %1084 = vector.load %arg14[%1083, %c0_375, %c0_376] : memref<8x4x96xf32, #tpu.memory_space<vmem>>, vector<1x4x96xf32>
    %1085 = vector.shape_cast %1084 : vector<1x4x96xf32> to vector<4x96xf32>
    %1086 = arith.index_cast %1076 : i32 to index
    %c0_377 = arith.constant 0 : index
    %c0_378 = arith.constant 0 : index
    %1087 = vector.load %arg15[%1086, %c0_377, %c0_378] : memref<8x4x96xf32, #tpu.memory_space<vmem>>, vector<1x4x96xf32>
    %1088 = vector.shape_cast %1087 : vector<1x4x96xf32> to vector<4x96xf32>
    %cst_379 = arith.constant dense<0.000000e+00> : vector<4x96xf32>
    %1089 = tpu.matmul %1041, %642, %cst_379 {dimension_numbers = #tpu.dot_dimension_numbers<[1], [0], [0], [1], [0, 0, 1, 1], [], []>} : vector<4x32xf32>, vector<32x96xf32>, vector<4x96xf32> -> vector<4x96xf32>
    %1090 = vector.extract_strided_slice %1085 {offsets = [0, 0], sizes = [4, 64], strides = [1, 1]} : vector<4x96xf32> to vector<4x64xf32>
    %1091 = vector.extract_strided_slice %1089 {offsets = [0, 0], sizes = [4, 64], strides = [1, 1]} : vector<4x96xf32> to vector<4x64xf32>
    %1092 = arith.addf %1090, %1091 : vector<4x64xf32>
    %1093 = arith.negf %1092 : vector<4x64xf32>
    %1094 = math.exp %1093 : vector<4x64xf32>
    %cst_380 = arith.constant 1.000000e+00 : f32
    %1095 = vector.broadcast %cst_380 : f32 to vector<4x64xf32>
    %1096 = arith.addf %1095, %1094 : vector<4x64xf32>
    %1097 = arith.divf %1095, %1096 : vector<4x64xf32>
    %1098 = vector.extract_strided_slice %1085 {offsets = [0, 64], sizes = [4, 32], strides = [1, 1]} : vector<4x96xf32> to vector<4x32xf32>
    %1099 = vector.extract_strided_slice %1097 {offsets = [0, 0], sizes = [4, 32], strides = [1, 1]} : vector<4x64xf32> to vector<4x32xf32>
    %1100 = vector.extract_strided_slice %1089 {offsets = [0, 64], sizes = [4, 32], strides = [1, 1]} : vector<4x96xf32> to vector<4x32xf32>
    %1101 = vector.broadcast %646 : vector<1x32xf32> to vector<4x32xf32>
    %1102 = arith.addf %1100, %1101 : vector<4x32xf32>
    %1103 = arith.mulf %1099, %1102 : vector<4x32xf32>
    %1104 = arith.addf %1098, %1103 : vector<4x32xf32>
    %1105 = math.tanh %1104 : vector<4x32xf32>
    %1106 = vector.extract_strided_slice %1097 {offsets = [0, 32], sizes = [4, 32], strides = [1, 1]} : vector<4x64xf32> to vector<4x32xf32>
    %cst_381 = arith.constant 1.000000e+00 : f32
    %1107 = vector.broadcast %cst_381 : f32 to vector<4x32xf32>
    %1108 = arith.subf %1107, %1106 : vector<4x32xf32>
    %1109 = arith.mulf %1079, %1108 : vector<4x32xf32>
    %1110 = arith.subf %1105, %1041 : vector<4x32xf32>
    %1111 = arith.mulf %1109, %1110 : vector<4x32xf32>
    %1112 = arith.addf %1041, %1111 : vector<4x32xf32>
    %1113 = arith.mulf %1079, %1112 : vector<4x32xf32>
    %1114 = arith.index_cast %c6_i32_369 : i32 to index
    %c0_382 = arith.constant 0 : index
    %c0_383 = arith.constant 0 : index
    %1115 = vector.load %arg11[%1114, %c0_382, %c0_383] : memref<8x4x32xf32, #tpu.memory_space<vmem>>, vector<1x4x32xf32>
    %1116 = vector.shape_cast %1115 : vector<1x4x32xf32> to vector<4x32xf32>
    %1117 = vector.shape_cast %1113 : vector<4x32xf32> to vector<1x4x32xf32>
    tpu.vector_store %arg11[%1114, %c0_382, %c0_383], %1117 {strides = array<i32>} : memref<8x4x32xf32, #tpu.memory_space<vmem>>, vector<1x4x32xf32>,
    %cst_384 = arith.constant dense<0.000000e+00> : vector<4x96xf32>
    %1118 = tpu.matmul %1070, %644, %cst_384 {dimension_numbers = #tpu.dot_dimension_numbers<[1], [0], [0], [1], [0, 0, 1, 1], [], []>} : vector<4x32xf32>, vector<32x96xf32>, vector<4x96xf32> -> vector<4x96xf32>
    %1119 = vector.extract_strided_slice %1088 {offsets = [0, 0], sizes = [4, 64], strides = [1, 1]} : vector<4x96xf32> to vector<4x64xf32>
    %1120 = vector.extract_strided_slice %1118 {offsets = [0, 0], sizes = [4, 64], strides = [1, 1]} : vector<4x96xf32> to vector<4x64xf32>
    %1121 = arith.addf %1119, %1120 : vector<4x64xf32>
    %1122 = arith.negf %1121 : vector<4x64xf32>
    %1123 = math.exp %1122 : vector<4x64xf32>
    %cst_385 = arith.constant 1.000000e+00 : f32
    %1124 = vector.broadcast %cst_385 : f32 to vector<4x64xf32>
    %1125 = arith.addf %1124, %1123 : vector<4x64xf32>
    %1126 = arith.divf %1124, %1125 : vector<4x64xf32>
    %1127 = vector.extract_strided_slice %1088 {offsets = [0, 64], sizes = [4, 32], strides = [1, 1]} : vector<4x96xf32> to vector<4x32xf32>
    %1128 = vector.extract_strided_slice %1126 {offsets = [0, 0], sizes = [4, 32], strides = [1, 1]} : vector<4x64xf32> to vector<4x32xf32>
    %1129 = vector.extract_strided_slice %1118 {offsets = [0, 64], sizes = [4, 32], strides = [1, 1]} : vector<4x96xf32> to vector<4x32xf32>
    %1130 = vector.broadcast %648 : vector<1x32xf32> to vector<4x32xf32>
    %1131 = arith.addf %1129, %1130 : vector<4x32xf32>
    %1132 = arith.mulf %1128, %1131 : vector<4x32xf32>
    %1133 = arith.addf %1127, %1132 : vector<4x32xf32>
    %1134 = math.tanh %1133 : vector<4x32xf32>
    %1135 = vector.extract_strided_slice %1126 {offsets = [0, 32], sizes = [4, 32], strides = [1, 1]} : vector<4x64xf32> to vector<4x32xf32>
    %cst_386 = arith.constant 1.000000e+00 : f32
    %1136 = vector.broadcast %cst_386 : f32 to vector<4x32xf32>
    %1137 = arith.subf %1136, %1135 : vector<4x32xf32>
    %1138 = arith.mulf %1082, %1137 : vector<4x32xf32>
    %1139 = arith.subf %1134, %1070 : vector<4x32xf32>
    %1140 = arith.mulf %1138, %1139 : vector<4x32xf32>
    %1141 = arith.addf %1070, %1140 : vector<4x32xf32>
    %1142 = arith.mulf %1082, %1141 : vector<4x32xf32>
    %1143 = arith.index_cast %1076 : i32 to index
    %c0_387 = arith.constant 0 : index
    %c0_388 = arith.constant 0 : index
    %1144 = vector.load %arg12[%1143, %c0_387, %c0_388] : memref<8x4x32xf32, #tpu.memory_space<vmem>>, vector<1x4x32xf32>
    %1145 = vector.shape_cast %1144 : vector<1x4x32xf32> to vector<4x32xf32>
    %1146 = vector.shape_cast %1142 : vector<4x32xf32> to vector<1x4x32xf32>
    tpu.vector_store %arg12[%1143, %c0_387, %c0_388], %1146 {strides = array<i32>} : memref<8x4x32xf32, #tpu.memory_space<vmem>>, vector<1x4x32xf32>,
    %c7_i32_389 = arith.constant 7 : i32
    %c7_i32_390 = arith.constant 7 : i32
    %1147 = arith.subi %c7_i32_390, %c7_i32_389 : i32
    %1148 = arith.index_cast %c7_i32_389 : i32 to index
    %c0_391 = arith.constant 0 : index
    %c0_392 = arith.constant 0 : index
    %1149 = vector.load %arg18[%1148, %c0_391, %c0_392] : memref<8x4x32xf32, #tpu.memory_space<vmem>>, vector<1x4x32xf32>
    %1150 = vector.shape_cast %1149 : vector<1x4x32xf32> to vector<4x32xf32>
    %1151 = arith.index_cast %1147 : i32 to index
    %c0_393 = arith.constant 0 : index
    %c0_394 = arith.constant 0 : index
    %1152 = vector.load %arg18[%1151, %c0_393, %c0_394] : memref<8x4x32xf32, #tpu.memory_space<vmem>>, vector<1x4x32xf32>
    %1153 = vector.shape_cast %1152 : vector<1x4x32xf32> to vector<4x32xf32>
    %1154 = arith.index_cast %c7_i32_389 : i32 to index
    %c0_395 = arith.constant 0 : index
    %c0_396 = arith.constant 0 : index
    %1155 = vector.load %arg14[%1154, %c0_395, %c0_396] : memref<8x4x96xf32, #tpu.memory_space<vmem>>, vector<1x4x96xf32>
    %1156 = vector.shape_cast %1155 : vector<1x4x96xf32> to vector<4x96xf32>
    %1157 = arith.index_cast %1147 : i32 to index
    %c0_397 = arith.constant 0 : index
    %c0_398 = arith.constant 0 : index
    %1158 = vector.load %arg15[%1157, %c0_397, %c0_398] : memref<8x4x96xf32, #tpu.memory_space<vmem>>, vector<1x4x96xf32>
    %1159 = vector.shape_cast %1158 : vector<1x4x96xf32> to vector<4x96xf32>
    %cst_399 = arith.constant dense<0.000000e+00> : vector<4x96xf32>
    %1160 = tpu.matmul %1112, %642, %cst_399 {dimension_numbers = #tpu.dot_dimension_numbers<[1], [0], [0], [1], [0, 0, 1, 1], [], []>} : vector<4x32xf32>, vector<32x96xf32>, vector<4x96xf32> -> vector<4x96xf32>
    %1161 = vector.extract_strided_slice %1156 {offsets = [0, 0], sizes = [4, 64], strides = [1, 1]} : vector<4x96xf32> to vector<4x64xf32>
    %1162 = vector.extract_strided_slice %1160 {offsets = [0, 0], sizes = [4, 64], strides = [1, 1]} : vector<4x96xf32> to vector<4x64xf32>
    %1163 = arith.addf %1161, %1162 : vector<4x64xf32>
    %1164 = arith.negf %1163 : vector<4x64xf32>
    %1165 = math.exp %1164 : vector<4x64xf32>
    %cst_400 = arith.constant 1.000000e+00 : f32
    %1166 = vector.broadcast %cst_400 : f32 to vector<4x64xf32>
    %1167 = arith.addf %1166, %1165 : vector<4x64xf32>
    %1168 = arith.divf %1166, %1167 : vector<4x64xf32>
    %1169 = vector.extract_strided_slice %1156 {offsets = [0, 64], sizes = [4, 32], strides = [1, 1]} : vector<4x96xf32> to vector<4x32xf32>
    %1170 = vector.extract_strided_slice %1168 {offsets = [0, 0], sizes = [4, 32], strides = [1, 1]} : vector<4x64xf32> to vector<4x32xf32>
    %1171 = vector.extract_strided_slice %1160 {offsets = [0, 64], sizes = [4, 32], strides = [1, 1]} : vector<4x96xf32> to vector<4x32xf32>
    %1172 = vector.broadcast %646 : vector<1x32xf32> to vector<4x32xf32>
    %1173 = arith.addf %1171, %1172 : vector<4x32xf32>
    %1174 = arith.mulf %1170, %1173 : vector<4x32xf32>
    %1175 = arith.addf %1169, %1174 : vector<4x32xf32>
    %1176 = math.tanh %1175 : vector<4x32xf32>
    %1177 = vector.extract_strided_slice %1168 {offsets = [0, 32], sizes = [4, 32], strides = [1, 1]} : vector<4x64xf32> to vector<4x32xf32>
    %cst_401 = arith.constant 1.000000e+00 : f32
    %1178 = vector.broadcast %cst_401 : f32 to vector<4x32xf32>
    %1179 = arith.subf %1178, %1177 : vector<4x32xf32>
    %1180 = arith.mulf %1150, %1179 : vector<4x32xf32>
    %1181 = arith.subf %1176, %1112 : vector<4x32xf32>
    %1182 = arith.mulf %1180, %1181 : vector<4x32xf32>
    %1183 = arith.addf %1112, %1182 : vector<4x32xf32>
    %1184 = arith.mulf %1150, %1183 : vector<4x32xf32>
    %1185 = arith.index_cast %c7_i32_389 : i32 to index
    %c0_402 = arith.constant 0 : index
    %c0_403 = arith.constant 0 : index
    %1186 = vector.load %arg11[%1185, %c0_402, %c0_403] : memref<8x4x32xf32, #tpu.memory_space<vmem>>, vector<1x4x32xf32>
    %1187 = vector.shape_cast %1186 : vector<1x4x32xf32> to vector<4x32xf32>
    %1188 = vector.shape_cast %1184 : vector<4x32xf32> to vector<1x4x32xf32>
    tpu.vector_store %arg11[%1185, %c0_402, %c0_403], %1188 {strides = array<i32>} : memref<8x4x32xf32, #tpu.memory_space<vmem>>, vector<1x4x32xf32>,
    %cst_404 = arith.constant dense<0.000000e+00> : vector<4x96xf32>
    %1189 = tpu.matmul %1141, %644, %cst_404 {dimension_numbers = #tpu.dot_dimension_numbers<[1], [0], [0], [1], [0, 0, 1, 1], [], []>} : vector<4x32xf32>, vector<32x96xf32>, vector<4x96xf32> -> vector<4x96xf32>
    %1190 = vector.extract_strided_slice %1159 {offsets = [0, 0], sizes = [4, 64], strides = [1, 1]} : vector<4x96xf32> to vector<4x64xf32>
    %1191 = vector.extract_strided_slice %1189 {offsets = [0, 0], sizes = [4, 64], strides = [1, 1]} : vector<4x96xf32> to vector<4x64xf32>
    %1192 = arith.addf %1190, %1191 : vector<4x64xf32>
    %1193 = arith.negf %1192 : vector<4x64xf32>
    %1194 = math.exp %1193 : vector<4x64xf32>
    %cst_405 = arith.constant 1.000000e+00 : f32
    %1195 = vector.broadcast %cst_405 : f32 to vector<4x64xf32>
    %1196 = arith.addf %1195, %1194 : vector<4x64xf32>
    %1197 = arith.divf %1195, %1196 : vector<4x64xf32>
    %1198 = vector.extract_strided_slice %1159 {offsets = [0, 64], sizes = [4, 32], strides = [1, 1]} : vector<4x96xf32> to vector<4x32xf32>
    %1199 = vector.extract_strided_slice %1197 {offsets = [0, 0], sizes = [4, 32], strides = [1, 1]} : vector<4x64xf32> to vector<4x32xf32>
    %1200 = vector.extract_strided_slice %1189 {offsets = [0, 64], sizes = [4, 32], strides = [1, 1]} : vector<4x96xf32> to vector<4x32xf32>
    %1201 = vector.broadcast %648 : vector<1x32xf32> to vector<4x32xf32>
    %1202 = arith.addf %1200, %1201 : vector<4x32xf32>
    %1203 = arith.mulf %1199, %1202 : vector<4x32xf32>
    %1204 = arith.addf %1198, %1203 : vector<4x32xf32>
    %1205 = math.tanh %1204 : vector<4x32xf32>
    %1206 = vector.extract_strided_slice %1197 {offsets = [0, 32], sizes = [4, 32], strides = [1, 1]} : vector<4x64xf32> to vector<4x32xf32>
    %cst_406 = arith.constant 1.000000e+00 : f32
    %1207 = vector.broadcast %cst_406 : f32 to vector<4x32xf32>
    %1208 = arith.subf %1207, %1206 : vector<4x32xf32>
    %1209 = arith.mulf %1153, %1208 : vector<4x32xf32>
    %1210 = arith.subf %1205, %1141 : vector<4x32xf32>
    %1211 = arith.mulf %1209, %1210 : vector<4x32xf32>
    %1212 = arith.addf %1141, %1211 : vector<4x32xf32>
    %1213 = arith.mulf %1153, %1212 : vector<4x32xf32>
    %1214 = arith.index_cast %1147 : i32 to index
    %c0_407 = arith.constant 0 : index
    %c0_408 = arith.constant 0 : index
    %1215 = vector.load %arg12[%1214, %c0_407, %c0_408] : memref<8x4x32xf32, #tpu.memory_space<vmem>>, vector<1x4x32xf32>
    %1216 = vector.shape_cast %1215 : vector<1x4x32xf32> to vector<4x32xf32>
    %1217 = vector.shape_cast %1213 : vector<4x32xf32> to vector<1x4x32xf32>
    tpu.vector_store %arg12[%1214, %c0_407, %c0_408], %1217 {strides = array<i32>} : memref<8x4x32xf32, #tpu.memory_space<vmem>>, vector<1x4x32xf32>,
    %c8_i32_409 = arith.constant 8 : i32
    %c1_410 = arith.constant 1 : index
    %c0_411 = arith.constant 0 : index
    %c0_412 = arith.constant 0 : index
    %c0_413 = arith.constant 0 : index
    %1218 = vector.load %arg13[%c1_410, %c0_411, %c0_412, %c0_413] : memref<2x2x4x32xf32, #tpu.memory_space<vmem>>, vector<1x1x4x32xf32>
    %1219 = vector.shape_cast %1218 : vector<1x1x4x32xf32> to vector<4x32xf32>
    %1220 = vector.shape_cast %1183 : vector<4x32xf32> to vector<1x1x4x32xf32>
    tpu.vector_store %arg13[%c1_410, %c0_411, %c0_412, %c0_413], %1220 {strides = array<i32>} : memref<2x2x4x32xf32, #tpu.memory_space<vmem>>, vector<1x1x4x32xf32>,
    %c1_414 = arith.constant 1 : index
    %c1_415 = arith.constant 1 : index
    %c0_416 = arith.constant 0 : index
    %c0_417 = arith.constant 0 : index
    %1221 = vector.load %arg13[%c1_414, %c1_415, %c0_416, %c0_417] : memref<2x2x4x32xf32, #tpu.memory_space<vmem>>, vector<1x1x4x32xf32>
    %1222 = vector.shape_cast %1221 : vector<1x1x4x32xf32> to vector<4x32xf32>
    %1223 = vector.shape_cast %1212 : vector<4x32xf32> to vector<1x1x4x32xf32>
    tpu.vector_store %arg13[%c1_414, %c1_415, %c0_416, %c0_417], %1223 {strides = array<i32>} : memref<2x2x4x32xf32, #tpu.memory_space<vmem>>, vector<1x1x4x32xf32>,
    return
  }
  func.func @transform_0(%arg0: i32) -> (i32, i32, i32) {
    %c0_i32 = arith.constant 0 : i32
    %c0_i32_0 = arith.constant 0 : i32
    %c0_i32_1 = arith.constant 0 : i32
    %c0_i32_2 = arith.constant 0 : i32
    return %c0_i32, %c0_i32_0, %c0_i32_1 : i32, i32, i32
  }
  func.func @transform_1(%arg0: i32) -> (i32, i32) {
    %c0_i32 = arith.constant 0 : i32
    %c0_i32_0 = arith.constant 0 : i32
    %c0_i32_1 = arith.constant 0 : i32
    return %c0_i32, %c0_i32_0 : i32, i32
  }
  func.func @transform_2(%arg0: i32) -> (i32, i32, i32) {
    %c0_i32 = arith.constant 0 : i32
    %c0_i32_0 = arith.constant 0 : i32
    %c0_i32_1 = arith.constant 0 : i32
    %c0_i32_2 = arith.constant 0 : i32
    return %c0_i32, %c0_i32_0, %c0_i32_1 : i32, i32, i32
  }
  func.func @transform_3(%arg0: i32) -> (i32, i32, i32) {
    %c0_i32 = arith.constant 0 : i32
    %c0_i32_0 = arith.constant 0 : i32
    %c0_i32_1 = arith.constant 0 : i32
    %c0_i32_2 = arith.constant 0 : i32
    return %c0_i32, %c0_i32_0, %c0_i32_1 : i32, i32, i32
  }
  func.func @transform_4(%arg0: i32) -> (i32, i32, i32) {
    %c0_i32 = arith.constant 0 : i32
    %c0_i32_0 = arith.constant 0 : i32
    %c0_i32_1 = arith.constant 0 : i32
    %c0_i32_2 = arith.constant 0 : i32
    return %c0_i32, %c0_i32_0, %c0_i32_1 : i32, i32, i32
  }
  func.func @transform_5(%arg0: i32) -> (i32, i32, i32) {
    %c0_i32 = arith.constant 0 : i32
    %c0_i32_0 = arith.constant 0 : i32
    %c0_i32_1 = arith.constant 0 : i32
    %c0_i32_2 = arith.constant 0 : i32
    return %c0_i32, %c0_i32_0, %c0_i32_1 : i32, i32, i32
  }
  func.func @transform_6(%arg0: i32) -> (i32, i32, i32, i32) {
    %c0_i32 = arith.constant 0 : i32
    %c0_i32_0 = arith.constant 0 : i32
    %c0_i32_1 = arith.constant 0 : i32
    %c0_i32_2 = arith.constant 0 : i32
    %c0_i32_3 = arith.constant 0 : i32
    return %c0_i32, %c0_i32_0, %c0_i32_1, %c0_i32_2 : i32, i32, i32, i32
  }
  func.func @transform_7(%arg0: i32) -> (i32, i32, i32) {
    %c0_i32 = arith.constant 0 : i32
    %c0_i32_0 = arith.constant 0 : i32
    %c0_i32_1 = arith.constant 0 : i32
    %c0_i32_2 = arith.constant 0 : i32
    return %c0_i32, %c0_i32_0, %c0_i32_1 : i32, i32, i32
  }
  func.func @transform_8(%arg0: i32) -> (i32, i32, i32) {
    %c0_i32 = arith.constant 0 : i32
    %c0_i32_0 = arith.constant 0 : i32
    %c0_i32_1 = arith.constant 0 : i32
    %c0_i32_2 = arith.constant 0 : i32
    return %c0_i32, %c0_i32_0, %c0_i32_1 : i32, i32, i32
  }
  func.func @transform_9(%arg0: i32) -> (i32, i32, i32) {
    %c0_i32 = arith.constant 0 : i32
    %c0_i32_0 = arith.constant 0 : i32
    %c0_i32_1 = arith.constant 0 : i32
    %c0_i32_2 = arith.constant 0 : i32
    return %c0_i32, %c0_i32_0, %c0_i32_1 : i32, i32, i32
  }
  func.func @transform_10(%arg0: i32) -> (i32, i32, i32) {
    %c0_i32 = arith.constant 0 : i32
    %c0_i32_0 = arith.constant 0 : i32
    %c0_i32_1 = arith.constant 0 : i32
    %c0_i32_2 = arith.constant 0 : i32
    return %c0_i32, %c0_i32_0, %c0_i32_1 : i32, i32, i32
  }
  func.func @transform_11(%arg0: i32) -> (i32, i32, i32) {
    %c0_i32 = arith.constant 0 : i32
    %c0_i32_0 = arith.constant 0 : i32
    %c0_i32_1 = arith.constant 0 : i32
    %c0_i32_2 = arith.constant 0 : i32
    return %c0_i32, %c0_i32_0, %c0_i32_1 : i32, i32, i32
  }
  func.func @transform_12(%arg0: i32) -> (i32, i32, i32, i32) {
    %c0_i32 = arith.constant 0 : i32
    %c0_i32_0 = arith.constant 0 : i32
    %c0_i32_1 = arith.constant 0 : i32
    %c0_i32_2 = arith.constant 0 : i32
    %c0_i32_3 = arith.constant 0 : i32
    return %c0_i32, %c0_i32_0, %c0_i32_1, %c0_i32_2 : i32, i32, i32, i32
  }
}

</mosaic_0001>

<bundles_post_ra>
// kernel: tpu_custom_call.1
= control target key start
LH: loop header
LB: loop body
LE: loop exit
PB: predicated region body
PF: predicated region fallthrough
CT: control target
= control target key end

     0   :  { %18 = vsyncpa [#allocation8], 0  ;;  %s6948_s0 = inlined_call_operand.hbm [shape: f32[8,4,16], index: 0, kind: input, shape index: {}]   ;;  %s6949_s1 = inlined_call_operand.vmem [shape: s32[4,1], index: 1, kind: input, shape index: {}]   ;;  %s6950_s2 = inlined_call_operand.hbm [shape: f32[2,16,96], index: 2, kind: input, shape index: {}]   ;;  %s6951_s3 = inlined_call_operand.vmem [shape: f32[2,1,96], index: 3, kind: input, shape index: {}]   ;;  %s6952_s4 = inlined_call_operand.hbm [shape: f32[2,32,96], index: 4, kind: input, shape index: {}]   ;;  %s6953_s5 = inlined_call_operand.vmem [shape: f32[2,1,32], index: 5, kind: input, shape index: {}]   ;;  %s6954_s6 = inlined_call_operand.hbm [shape: f32[2,2,32,96], index: 6, kind: input, shape index: {}]   ;;  %s6955_s7 = inlined_call_operand.vmem [shape: f32[2,1,96], index: 7, kind: input, shape index: {}]   ;;  %s6956_s8 = inlined_call_operand.hbm [shape: f32[2,32,96], index: 8, kind: input, shape index: {}]   ;;  %s6957_s9 = inlined_call_operand.vmem [shape: f32[2,1,32], index: 9, kind: input, shape index: {}]   ;;  %s6958_s10 = inlined_call_operand.hbm [shape: f32[8,4,32], index: 10, kind: output, shape index: {0}]   ;;  %s6959_s11 = inlined_call_operand.hbm [shape: f32[8,4,32], index: 11, kind: output, shape index: {1}]   ;;  %s6960_s12 = inlined_call_operand.hbm [shape: f32[2,2,4,32], index: 12, kind: output, shape index: {2}]  }
   0x1   :  { %19 = vsyncpa [#allocation11], 0 }
   0x2   :  { %20 = vsyncpa [#allocation14], 0 }
   0x3   :  { %21 = vsyncpa [#allocation9], 0 }
   0x4   :  { %22 = vsyncpa [#allocation18], 0  ;;  %s5989_s21 = smov [#allocation10]   ;;  %s5803_s25 = scalar_lea.hbm %s6950_s2, 512 }
   0x5   :  { %s42_s22 = sshll.u32 %s5989_s21, 4  ;;  %p5804_p0 = scmp.ne.s32.totalorder %s6950_s2, %s5803_s25  ;;  %s43_s22 = int_to_ptr.vmem [resolvable:$true] %s42_s22 }
   0x6   :  { %p5807_p1 = scmp.lt.u32.totalorder %s5803_s25, %s6950_s2 }
   0x8   :  { %p5809_p2 = pnand %p5807_p1, %p5804_p0 }
   0xa   :  { %5812 = shalt.err (!%p5809_p2)
}
   0xb   :  { %s5813_s30 = scalar_lea.vmem %s43_s22, 512  ;;  %p5818_p4 = scmp.lt.s32.totalorder %s43_s22, %s43_s22 }
   0xc   :  { %p5814_p3 = scmp.ne.s32.totalorder %s43_s22, %s5813_s30  ;;  %p5819_p5 = scmp.lt.s32.totalorder %s5813_s30, %s5813_s30 }
   0xe   :  { %p5820_p6 = por %p5819_p5, %p5818_p4 }
  0x10   :  { %p5821_p7 = pnand %p5820_p6, %p5814_p3 }
  0x12   :  { %5824 = shalt.err (!%p5821_p7)
}
  0x13   :  { %s5990_s13 = smov 128   ;;  %s5991_s14 = smov 8  }
  0x14   :  { %48 = dma.hbm_to_vmem [thread:$0]  %s6950_s2, 512, %s43_s22, [#allocation11], %s5990_s13, %s5990_s13, %s5991_s14  }
  0x15   :  { %s5992_s17 = smov [#allocation13]   ;;  %s5993_s19 = smov [#allocation7]  }
  0x16   :  { %s70_s18 = sshll.u32 %s5992_s17, 4  ;;  %s28_s20 = sshll.u32 %s5993_s19, 4  ;;  %s71_s18 = int_to_ptr.vmem [resolvable:$true] %s70_s18  ;;  %s29_s20 = int_to_ptr.vmem [resolvable:$true] %s28_s20 }
  0x17   :  { %s5825_s24 = scalar_lea.hbm %s6954_s6, 2048 }
  0x18   :  { %p5826_p8 = scmp.ne.s32.totalorder %s6954_s6, %s5825_s24  ;;  %p5829_p9 = scmp.lt.u32.totalorder %s5825_s24, %s6954_s6 }
  0x1a   :  { %p5831_p10 = pnand %p5829_p9, %p5826_p8 }
  0x1c   :  { %5834 = shalt.err (!%p5831_p10)
}
  0x1d   :  { %s5835_s2 = scalar_lea.vmem %s71_s18, 2048  ;;  %p5840_p12 = scmp.lt.s32.totalorder %s71_s18, %s71_s18 }
  0x1e   :  { %p5836_p11 = scmp.ne.s32.totalorder %s71_s18, %s5835_s2  ;;  %p5841_p13 = scmp.lt.s32.totalorder %s5835_s2, %s5835_s2 }
  0x20   :  { %p5842_p0 = por %p5841_p13, %p5840_p12 }
  0x22   :  { %p5843_p1 = pnand %p5842_p0, %p5836_p11 }
  0x24   :  { %5846 = shalt.err (!%p5843_p1)
}
  0x25   :  { %76 = dma.hbm_to_vmem [thread:$0]  %s6954_s6, 2048, %s71_s18, [#allocation14], %s5990_s13, %s5990_s13, %s5991_s14  }
  0x26   :  { %s5847_s16 = scalar_lea.hbm %s6948_s0, 512 }
  0x27   :  { %p5848_p2 = scmp.ne.s32.totalorder %s6948_s0, %s5847_s16  ;;  %p5851_p3 = scmp.lt.u32.totalorder %s5847_s16, %s6948_s0 }
  0x29   :  { %p5853_p4 = pnand %p5851_p3, %p5848_p2 }
  0x2b   :  { %5856 = shalt.err (!%p5853_p4)
}
  0x2c   :  { %s5857_s24 = scalar_lea.vmem %s29_s20, 512  ;;  %p5862_p6 = scmp.lt.s32.totalorder %s29_s20, %s29_s20 }
  0x2d   :  { %p5858_p5 = scmp.ne.s32.totalorder %s29_s20, %s5857_s24  ;;  %p5863_p7 = scmp.lt.s32.totalorder %s5857_s24, %s5857_s24 }
  0x2f   :  { %p5864_p8 = por %p5863_p7, %p5862_p6 }
  0x31   :  { %p5865_p9 = pnand %p5864_p8, %p5858_p5 }
  0x33   :  { %5868 = shalt.err (!%p5865_p9)
}
  0x34   :  { %s5994_s6 = smov 64   ;;  %s5995_s18 = smov 4  }
  0x35   :  { %34 = dma.hbm_to_vmem [thread:$0]  %s6948_s0, 512, %s29_s20, [#allocation8], %s5994_s6, %s5994_s6, %s5995_s18  }
  0x36   :  { %s5996_s27 = smov [#allocation12]   ;;  %s5997_s2 = smov [#allocation15]  }
  0x37   :  { %s56_s28 = sshll.u32 %s5996_s27, 4  ;;  %s84_s22 = sshll.u32 %s5997_s2, 4  ;;  %s57_s28 = int_to_ptr.vmem [resolvable:$true] %s56_s28  ;;  %s85_s22 = int_to_ptr.vmem [resolvable:$true] %s84_s22 }
  0x38   :  { %s5869_s15 = scalar_lea.hbm %s6952_s4, 1024 }
  0x39   :  { %p5870_p10 = scmp.ne.s32.totalorder %s6952_s4, %s5869_s15  ;;  %p5873_p11 = scmp.lt.u32.totalorder %s5869_s15, %s6952_s4 }
  0x3b   :  { %p5875_p12 = pnand %p5873_p11, %p5870_p10 }
  0x3d   :  { %5878 = shalt.err (!%p5875_p12)
}
  0x3e   :  { %s5879_s0 = scalar_lea.vmem %s57_s28, 1024  ;;  %p5884_p0 = scmp.lt.s32.totalorder %s57_s28, %s57_s28 }
  0x3f   :  { %p5880_p13 = scmp.ne.s32.totalorder %s57_s28, %s5879_s0  ;;  %p5885_p1 = scmp.lt.s32.totalorder %s5879_s0, %s5879_s0 }
  0x41   :  { %p5886_p2 = por %p5885_p1, %p5884_p0 }
  0x43   :  { %p5887_p3 = pnand %p5886_p2, %p5880_p13 }
  0x45   :  { %5890 = shalt.err (!%p5887_p3)
}
  0x46   :  { %62 = dma.hbm_to_vmem [thread:$0]  %s6952_s4, 1024, %s57_s28, [#allocation11], %s5990_s13, %s5990_s13, %s5991_s14  }
  0x47   :  { %s5891_s26 = scalar_lea.hbm %s6956_s8, 1024 }
  0x48   :  { %p5892_p4 = scmp.ne.s32.totalorder %s6956_s8, %s5891_s26  ;;  %p5895_p5 = scmp.lt.u32.totalorder %s5891_s26, %s6956_s8 }
  0x4a   :  { %p5897_p6 = pnand %p5895_p5, %p5892_p4 }
  0x4c   :  { %5900 = shalt.err (!%p5897_p6)
}
  0x4d   :  { %s5901_s15 = scalar_lea.vmem %s85_s22, 1024  ;;  %p5906_p8 = scmp.lt.s32.totalorder %s85_s22, %s85_s22 }
  0x4e   :  { %p5902_p7 = scmp.ne.s32.totalorder %s85_s22, %s5901_s15  ;;  %p5907_p9 = scmp.lt.s32.totalorder %s5901_s15, %s5901_s15 }
  0x50   :  { %p5908_p10 = por %p5907_p9, %p5906_p8 }
  0x52   :  { %p5909_p11 = pnand %p5908_p10, %p5902_p7 }
  0x54   :  { %5912 = shalt.err (!%p5909_p11)
}
  0x55   :  { %90 = dma.hbm_to_vmem [thread:$0]  %s6956_s8, 1024, %s85_s22, [#allocation14], %s5990_s13, %s5990_s13, %s5991_s14  }
  0x56   :  { %5979 = dma.done.wait [#allocation8], 512  }
  0x57   :  { %5980 = vsyncadd [#allocation8], 4294966784 }
  0x58   :  { %5981 = dma.done.wait [#allocation11], 1536  }
  0x59   :  { %5982 = vsyncadd [#allocation11], 4294965760 }
  0x5a   :  { %5983 = dma.done.wait [#allocation14], 3072  }
  0x5b   :  { %5984 = vsyncadd [#allocation14], 4294964224  ;;  %v290_v0 = vld [vmem:[#allocation10 + $0x10] sm:$0xff]  ;;  %v291_v1 = vld [vmem:[#allocation10 + $0x18] sm:$0xff]  ;;  %vm174_vm0 = vcmask 130048   ;;  %v5998_v12 = vmov 0.0|0.0  }
  0x5c   :  { %v5345_v2 = vpack.c.bf16 %v291_v1, %v290_v0  ;;  %v5599_v3 = vld [vmem:[#allocation7] sm:$0xff]   ;;  %v154_v5 = vld [vmem:[#allocation10 + $0x8] sm:$0xff]  ;;  %v5601_v11 = vld [vmem:[#allocation7 + $0x10] sm:$0xff]   ;;  %vm5999_vm1 = vmmov 0   ;;  %v6000_v24 = vmov 0.0   ;;  %vm280_vm2 = vcmask 781312  }
  0x5d   :  { %v153_v4 = vld [vmem:[#allocation10] sm:$0xff]  ;;  %4927 = vmatprep.mubr.msk.f32.mxu1 %vm174_vm0, %v5599_v3  ;;  %v5600_v7 = vld [vmem:[#allocation7 + $0x8] sm:$0xff]   ;;  %4917 = vmatprep.mubr.msk.f32.mxu0 %vm174_vm0, %v5599_v3  ;;  %v5602_v13 = vld [vmem:[#allocation7 + $0x18] sm:$0xff]   ;;  %v6001_v34 = vmov 0   ;;  %s6002_s0 = smov 96   ;;  %vm136_vm3 = vcmask 257024  }
  0x5e   :  { %5346 = vmatprep.subr.bf16.mxu1 %v5345_v2  ;;  %v5341_v6 = vpack.c.bf16 %v154_v5, %v153_v4  ;;  %v410_v8 = vld [vmem:[#allocation12 + $0x20] sm:$0xff]  ;;  %v411_v9 = vld [vmem:[#allocation12 + $0x28] sm:$0xff]  ;;  %v412_v16 = vld [vmem:[#allocation12 + $0x30] sm:$0xff]  ;;  %5598 = vset.pattern.permute.xlu0 %v6001_v34  ;;  %vm423_vm12 = vcmask 261120   ;;  %s6004_s29 = smov [#allocation17]   ;;  %s6005_s15 = smov [#allocation19]  }
  0x5f   :  { %5348 = vmatpush3.bf16.msra.mxu1 %v5345_v2  ;;  %v6147_v10 = vpack.c.bf16 %v411_v9, %v410_v8  ;;  %v405_v14 = vld [vmem:[#allocation12] sm:$0xff]  ;;  %v406_v15 = vld [vmem:[#allocation12 + $0x8] sm:$0xff]  ;;  %v413_v18 = vld [vmem:[#allocation12 + $0x38] sm:$0xff]  ;;  %s4572_s30 = sshll.u32 %s6004_s29, 4  ;;  %s4584_s4 = sshll.u32 %s6005_s15, 4  ;;  %s6887_s30 = int_to_ptr.vmem [resolvable:$true] %s4572_s30  ;;  %s6890_s4 = int_to_ptr.vmem [resolvable:$true] %s4584_s4 }
  0x60   :  { %5342 = vmatprep.subr.bf16.mxu0 %v5341_v6  ;;  %5355 = vmatprep.subr.bf16.mxu1 %v5998_v12  ;;  %v6153_v17 = vpack.c.bf16 %v406_v15, %v405_v14  ;;  %v407_v19 = vld [vmem:[#allocation12 + $0x10] sm:$0xff]  ;;  %v408_v20 = vld [vmem:[#allocation12 + $0x18] sm:$0xff]  ;;  %v6157_v21 = vpack.c.bf16 %v413_v18, %v412_v16  ;;  %v4628_v23 = vld [vmem:[%s6953_s5 + $0x1] ss:$0 sm:$0xff] }
  0x61   :  { %5344 = vmatpush3.bf16.msra.mxu0 %v5341_v6  ;;  %v6163_v22 = vpack.c.bf16 %v408_v20, %v407_v19  ;;  %620 = vrot.lane.b32.xlu0 %v4628_v23, %s5994_s6  ;;  %v4626_v25 = vld [vmem:[%s6953_s5] ss:$0 sm:$0xff]  ;;  %v4619_v26 = vld [vmem:[%s6951_s3 + $0x1] ss:$0 sm:$0xff] }
  0x62   :  { %4928 = vmatmul.mubr.msk.f32.vlgmr.msra.gmra.mrb[0].mxu1 %vm174_vm0, %v5600_v7  ;;  %5349 = vmatprep.subr.bf16.mxu0 %v5998_v12  ;;  %v4613_v30 = vld [vmem:[%s6951_s3] ss:$0 sm:$0xff] }
  0x63   :  { %5357 = vmatpush3.bf16.msra.mxu1 %v6147_v10  ;;  %4930 = vmatprep.mubr.msk.f32.mxu1 %vm174_vm0, %v5601_v11  ;;  %v108_v14 = vld [vmem:[%s6949_s1] sm:$0xf] }
  0x64   :  { %4918 = vmatmul.mubr.msk.f32.vlgmr.msra.gmra.mrb[0].mxu0 %vm174_vm0, %v5600_v7  ;;  %5358 = vmatprep.subr.bf16.mxu1 %v5998_v12 }
  0x65   :  { %5351 = vmatpush3.bf16.msra.mxu0 %v6153_v17  ;;  %4920 = vmatprep.mubr.msk.f32.mxu0 %vm174_vm0, %v5601_v11 }
  0x66   :  { %4931 = vmatmul.mubr.msk.f32.gmra.mrb[2].mxu1 %vm174_vm0, %v5602_v13  ;;  %5352 = vmatprep.subr.bf16.mxu0 %v5998_v12 }
  0x67   :  { %5360 = vmatpush3.bf16.msra.mxu1 %v6157_v21  ;;  %4952 = vmatprep.mubr.msk.f32.mxu1 %vm5999_vm1, %v6000_v24 }
  0x68   :  { %4921 = vmatmul.mubr.msk.f32.gmra.mrb[2].mxu0 %vm174_vm0, %v5602_v13  ;;  %5367 = vmatprep.subr.bf16.mxu1 %v5998_v12 }
  0x69   :  { %5354 = vmatpush3.bf16.msra.mxu0 %v6163_v22  ;;  %4941 = vmatprep.mubr.msk.f32.mxu0 %vm5999_vm1, %v6000_v24 }
  0x6a   :  { %4953 = vmatmul.mubr.f32.vlgmr.msra.gmra.mrb[4].mxu1 %v6000_v24  ;;  %5361 = vmatprep.subr.bf16.mxu0 %v5998_v12 }
  0x6b   :  { %5369 = vmatpush3.bf16.msra.mxu1 %v6147_v10  ;;  %509 = vrot.lane.b32.xlu0 %v4626_v25, %s5994_s6 }
  0x6c   :  { %4942 = vmatmul.mubr.f32.vlgmr.msra.gmra.mrb[4].mxu0 %v6000_v24  ;;  %5370 = vmatprep.subr.bf16.mxu1 %v5998_v12 }
  0x6d   :  { %5363 = vmatpush3.bf16.msra.mxu0 %v6153_v17  ;;  %4974 = vmatprep.mubr.msk.f32.mxu1 %vm5999_vm1, %v6000_v24 }
  0x6e   :  { %5364 = vmatprep.subr.bf16.mxu0 %v5998_v12  ;;  %4963 = vmatprep.mubr.msk.f32.mxu0 %vm5999_vm1, %v6000_v24 }
  0x6f   :  { %5372 = vmatpush3.bf16.msra.mxu1 %v6157_v21 }
  0x70   :  { %5379 = vmatprep.subr.bf16.mxu1 %v5998_v12 }
  0x71   :  { %5366 = vmatpush3.bf16.msra.mxu0 %v6163_v22 }
  0x72   :  { %5373 = vmatprep.subr.bf16.mxu0 %v5998_v12 }
  0xd3   :  { %v6204_v32 = vpop.permute.xlu0 %620 }
  0xdd   :  { %v6216_v53 = vpop.permute.xlu0 %509 }
 0x135   :  { %v4929_v27 = vpop.f32.mrb[0].mxu1 }
 0x136   :  { %v372_v28 = vadd.f32 %v4929_v27, %v4619_v26  ;;  %v366_v29 = vpop.f32.mrb[1].mxu1 }
 0x137   :  { %v367_v31 = vadd.f32 %v4619_v26, %v366_v29  ;;  %v4919_v33 = vpop.f32.mrb[0].mxu0 }
 0x138   :  { %v390_v35 = vcombine.high %v372_v28, %v372_v28  ;;  %399 = vst.msk [vmem:[#allocation3 + $0x8] sm:$0xf] %vm280_vm2, %v372_v28  ;;  %v255_v36 = vadd.f32 %v4919_v33, %v4613_v30  ;;  %v249_v37 = vpop.f32.mrb[1].mxu0 }
 0x139   :  { %v389_v38 = vcombine.high %v367_v31, %v367_v31  ;;  %397 = vst.msk [vmem:[#allocation3] sm:$0xf] %vm280_vm2, %v367_v31  ;;  %v4932_v39 = vpop.f32.mrb[2].mxu1  ;;  %v250_v40 = vadd.f32 %v4613_v30, %v249_v37 }
 0x13a   :  { %400 = vst.msk [vmem:[#allocation3 + $0xc] sm:$0xf] %vm280_vm2, %v390_v35  ;;  %v382_v41 = vadd.f32 %v4932_v39, %v4619_v26  ;;  %v376_v42 = vpop.f32.mrb[3].mxu1  ;;  %v273_v43 = vcombine.high %v255_v36, %v255_v36  ;;  %283 = vst.msk [vmem:[#allocation2 + $0x8] sm:$0xf] %vm280_vm2, %v255_v36 }
 0x13b   :  { %398 = vst.msk [vmem:[#allocation3 + $0x4] sm:$0xf] %vm280_vm2, %v389_v38  ;;  %v377_v44 = vadd.f32 %v4619_v26, %v376_v42  ;;  %v272_v45 = vcombine.high %v250_v40, %v250_v40  ;;  %281 = vst.msk [vmem:[#allocation2] sm:$0xf] %vm280_vm2, %v250_v40  ;;  %v4922_v46 = vpop.f32.mrb[2].mxu0 }
 0x13c   :  { %v392_v47 = vcombine.high %v382_v41, %v382_v41  ;;  %403 = vst.msk [vmem:[#allocation3 + $0x18] sm:$0xf] %vm280_vm2, %v382_v41  ;;  %284 = vst.msk [vmem:[#allocation2 + $0xc] sm:$0xf] %vm280_vm2, %v273_v43  ;;  %v265_v48 = vadd.f32 %v4922_v46, %v4613_v30  ;;  %v259_v49 = vpop.f32.mrb[3].mxu0 }
 0x13d   :  { %v391_v50 = vcombine.high %v377_v44, %v377_v44  ;;  %401 = vst.msk [vmem:[#allocation3 + $0x10] sm:$0xf] %vm280_vm2, %v377_v44  ;;  %v604_v51 = vpop.f32.mrb[4].mxu1  ;;  %282 = vst.msk [vmem:[#allocation2 + $0x4] sm:$0xf] %vm280_vm2, %v272_v45  ;;  %v260_v52 = vadd.f32 %v4613_v30, %v259_v49 }
 0x13e   :  { %404 = vst.msk [vmem:[#allocation3 + $0x1c] sm:$0xf] %vm280_vm2, %v392_v47  ;;  %v4954_v54 = vpop.f32.mrb[5].mxu1  ;;  %v275_v55 = vcombine.high %v265_v48, %v265_v48  ;;  %287 = vst.msk [vmem:[#allocation2 + $0x18] sm:$0xf] %vm280_vm2, %v265_v48  ;;  %v623_v56 = vadd.f32 %v6204_v32, %v604_v51 }
 0x13f   :  { %402 = vst.msk [vmem:[#allocation3 + $0x14] sm:$0xf] %vm280_vm2, %v391_v50  ;;  %v274_v57 = vcombine.high %v260_v52, %v260_v52  ;;  %285 = vst.msk [vmem:[#allocation2 + $0x10] sm:$0xf] %vm280_vm2, %v260_v52  ;;  %v493_v58 = vpop.f32.mrb[4].mxu0 }
 0x140   :  { %288 = vst.msk [vmem:[#allocation2 + $0x1c] sm:$0xf] %vm280_vm2, %v275_v55  ;;  %625 = vrot.lane.b32.xlu1 %v623_v56, %s5994_s6  ;;  %v512_v59 = vadd.f32 %v6216_v53, %v493_v58  ;;  %v4943_v60 = vpop.f32.mrb[5].mxu0 }
 0x141   :  { %286 = vst.msk [vmem:[#allocation2 + $0x14] sm:$0xf] %vm280_vm2, %v274_v57 }
 0x142   :  { %v420_v63 = vld [vmem:[#allocation2] sm:$0xf] }
 0x143   :  { %v497_v1 = vadd.f32 %v493_v58, %v420_v63  ;;  %v657_v57 = vld [vmem:[#allocation3 + $0x18] sm:$0xf] }
 0x144   :  { %514 = vrot.lane.b32.xlu1 %v512_v59, %s5994_s6  ;;  %v655_v59 = vld [vmem:[#allocation2 + $0x4] sm:$0xf] }
 0x145   :  { %v422_v61 = vld [vmem:[#allocation3 + $0x1c] sm:$0xf]  ;;  %v4625_v2 = vmul.f32 -1.442695, %v497_v1 }
 0x146   :  { %v608_v62 = vadd.f32 %v604_v51, %v422_v61 }
 0x148   :  { %v4627_v0 = vmul.f32 -1.442695, %v608_v62 }
 0x14a   :  { %5611 = vpow2.f32 %v4627_v0 }
 0x14b   :  { %5613 = vpow2.f32 %v4625_v2 }
 0x154   :  { %v5612_v3 = vpop.eup %5611 }
 0x155   :  { %v612_v4 = vadd.f32 1.0, %v5612_v3  ;;  %v5614_v5 = vpop.eup %5613 }
 0x156   :  { %v501_v6 = vadd.f32 1.0, %v5614_v5 }
 0x157   :  { %5615 = vrcp.f32 %v612_v4 }
 0x158   :  { %5617 = vrcp.f32 %v501_v6 }
 0x161   :  { %v5616_v7 = vpop.eup %5615 }
 0x162   :  { %v5618_v11 = vpop.eup %5617  ;;  %v635_v16 = vsub.f32 1.0, %v5616_v7 }
 0x163   :  { %v524_v18 = vsub.f32 1.0, %v5618_v11 }
 0x1b2   :  { %v626_v8 = vpop.permute.xlu1 %625 }
 0x1b3   :  { %v628_v9 = vmul.f32 %v5616_v7, %v626_v8 }
 0x1b5   :  { %630 = vrot.lane.b32.xlu0 %v628_v9, %s5994_s6 }
 0x1b6   :  { %v515_v13 = vpop.permute.xlu1 %514 }
 0x1b7   :  { %v517_v15 = vmul.f32 %v5618_v11, %v515_v13 }
 0x1b9   :  { %519 = vrot.lane.b32.xlu1 %v517_v15, %s5994_s6  ;;  %110 = vperm.xlu0 %5598, %v108_v14  }
 0x1bd   :  { %637 = vrot.lane.b32.xlu1 %v635_v16, %s6002_s0  ;;  %526 = vrot.lane.b32.xlu0 %v524_v18, %s6002_s0 }
 0x227   :  { %v631_v19 = vpop.permute.xlu0 %630 }
 0x228   :  { %v633_v20 = vadd.f32 %v631_v19, %v422_v61 }
 0x22a   :  { %5619 = vtanh.f32 %v633_v20 }
 0x22b   :  { %v520_v23 = vpop.permute.xlu1 %519 }
 0x22c   :  { %v522_v25 = vadd.f32 %v520_v23, %v420_v63 }
 0x22e   :  { %5621 = vtanh.f32 %v522_v25 }
 0x22f   :  { %v638_v38 = vpop.permute.xlu1 %637 }
 0x234   :  { %v5620_v26 = vpop.eup %5619 }
 0x235   :  { %642 = vrot.lane.b32.xlu1 %v5620_v26, %s5994_s6 }
 0x238   :  { %v5622_v27 = vpop.eup %5621  ;;  %v111_v28 = vpop.permute.xlu0 %110 }
 0x239   :  { %vm112_vm4 = vcmp.gt.s32.totalorder %v111_v28, 0  ;;  %vm113_vm5 = vcmp.gt.s32.totalorder %v111_v28, 1  ;;  %vm114_vm6 = vcmp.gt.s32.totalorder %v111_v28, 2  ;;  %vm115_vm7 = vcmp.gt.s32.totalorder %v111_v28, 3  ;;  %531 = vrot.lane.b32.xlu1 %v5622_v27, %s5994_s6 }
 0x23a   :  { %vm116_vm8 = vcmp.gt.s32.totalorder %v111_v28, 4  ;;  %vm117_vm9 = vcmp.gt.s32.totalorder %v111_v28, 5  ;;  %vm118_vm10 = vcmp.gt.s32.totalorder %v111_v28, 6  ;;  %vm119_vm11 = vcmp.gt.s32.totalorder %v111_v28, 7 }
 0x23b   :  { %v4605_v29 = vsel %vm112_vm4, 1.0, %v6000_v24  ;;  %v4606_v30 = vsel %vm113_vm5, 1.0, %v6000_v24  ;;  %v4607_v31 = vsel %vm114_vm6, 1.0, %v6000_v24  ;;  %v4608_v33 = vsel %vm115_vm7, 1.0, %v6000_v24 }
 0x23c   :  { %v4609_v34 = vsel %vm116_vm8, 1.0, %v6000_v24  ;;  %v4610_v35 = vsel %vm117_vm9, 1.0, %v6000_v24  ;;  %v4611_v36 = vsel %vm118_vm10, 1.0, %v6000_v24  ;;  %v4612_v37 = vsel %vm119_vm11, 1.0, %v6000_v24  ;;  %137 = vst.msk [vmem:[#allocation6] sm:$0xf] %vm136_vm3, %v4605_v29  ;;  %v527_v44 = vpop.permute.xlu0 %526 }
 0x23d   :  { %138 = vst.msk [vmem:[#allocation6 + $0x4] sm:$0xf] %vm136_vm3, %v4606_v30  ;;  %139 = vst.msk [vmem:[#allocation6 + $0x8] sm:$0xf] %vm136_vm3, %v4607_v31 }
 0x23e   :  { %140 = vst.msk [vmem:[#allocation6 + $0xc] sm:$0xf] %vm136_vm3, %v4608_v33  ;;  %141 = vst.msk [vmem:[#allocation6 + $0x10] sm:$0xf] %vm136_vm3, %v4609_v34 }
 0x23f   :  { %142 = vst.msk [vmem:[#allocation6 + $0x14] sm:$0xf] %vm136_vm3, %v4610_v35  ;;  %143 = vst.msk [vmem:[#allocation6 + $0x18] sm:$0xf] %vm136_vm3, %v4611_v36 }
 0x240   :  { %144 = vst.msk [vmem:[#allocation6 + $0x1c] sm:$0xf] %vm136_vm3, %v4612_v37 }
 0x243   :  { %v417_v41 = vld [vmem:[#allocation6] sm:$0xf] }
 0x244   :  { %v529_v45 = vmul.f32 %v527_v44, %v417_v41  ;;  %v651_v34 = vld [vmem:[#allocation6 + $0x4] sm:$0xf] }
 0x246   :  { %v653_v28 = vld [vmem:[#allocation6 + $0x18] sm:$0xf] }
 0x247   :  { %v419_v39 = vld [vmem:[#allocation6 + $0x1c] sm:$0xf] }
 0x248   :  { %v640_v40 = vmul.f32 %v638_v38, %v419_v39 }
 0x2a7   :  { %v643_v42 = vpop.permute.xlu1 %642 }
 0x2a8   :  { %v6253_v43 = vmul.f32 %v643_v42, %v640_v40 }
 0x2aa   :  { %v647_v46 = vmul.f32 %v6253_v43, %v419_v39  ;;  %4975 = vmatmul.mubr.msk.f32.vlgmr.msra.gmra.mrb[6].mxu1 %vm423_vm12, %v6253_v43 }
 0x2ab   :  { %v532_v47 = vpop.permute.xlu1 %531  ;;  %5381 = vmatpush3.bf16.msra.mxu1 %v6147_v10  ;;  %4996 = vmatprep.mubr.msk.f32.mxu1 %vm5999_vm1, %v6000_v24 }
 0x2ac   :  { %649 = vst.msk [vmem:[#allocation5 + $0x1c] sm:$0xf] %vm136_vm3, %v647_v46  ;;  %v6262_v48 = vmul.f32 %v532_v47, %v529_v45  ;;  %5382 = vmatprep.subr.bf16.mxu1 %v5998_v12 }
 0x2ae   :  { %v536_v49 = vmul.f32 %v6262_v48, %v417_v41  ;;  %4964 = vmatmul.mubr.msk.f32.vlgmr.msra.gmra.mrb[6].mxu0 %vm423_vm12, %v6262_v48 }
 0x2af   :  { %5375 = vmatpush3.bf16.msra.mxu0 %v6153_v17  ;;  %5384 = vmatpush3.bf16.msra.mxu1 %v6157_v21 }
 0x2b0   :  { %537 = vst.msk [vmem:[#allocation4] sm:$0xf] %vm136_vm3, %v536_v49  ;;  %5376 = vmatprep.subr.bf16.mxu0 %v5998_v12  ;;  %4985 = vmatprep.mubr.msk.f32.mxu0 %vm5999_vm1, %v6000_v24 }
 0x2b1   :  { %5391 = vmatprep.subr.bf16.mxu1 %v5998_v12 }
 0x2b3   :  { %5378 = vmatpush3.bf16.msra.mxu0 %v6163_v22 }
 0x2b4   :  { %5385 = vmatprep.subr.bf16.mxu0 %v5998_v12 }
 0x37d   :  { %v838_v50 = vpop.f32.mrb[6].mxu1 }
 0x37e   :  { %v4976_v51 = vpop.f32.mrb[7].mxu1  ;;  %v849_v52 = vadd.f32 %v838_v50, %v6204_v32  ;;  %v842_v58 = vadd.f32 %v838_v50, %v657_v57  ;;  %v885_v50 = vld [vmem:[#allocation2 + $0x8] sm:$0xf] }
 0x380   :  { %851 = vrot.lane.b32.xlu0 %v849_v52, %s5994_s6  ;;  %v4632_v60 = vmul.f32 -1.442695, %v842_v58 }
 0x381   :  { %v727_v54 = vpop.f32.mrb[6].mxu0 }
 0x382   :  { %v4965_v55 = vpop.f32.mrb[7].mxu0  ;;  %v738_v56 = vadd.f32 %v727_v54, %v6216_v53  ;;  %v731_v61 = vadd.f32 %v727_v54, %v655_v59  ;;  %5623 = vpow2.f32 %v4632_v60 }
 0x384   :  { %740 = vrot.lane.b32.xlu1 %v738_v56, %s5994_s6  ;;  %v4630_v62 = vmul.f32 -1.442695, %v731_v61 }
 0x386   :  { %5625 = vpow2.f32 %v4630_v62 }
 0x38c   :  { %v5624_v63 = vpop.eup %5623 }
 0x38d   :  { %v846_v0 = vadd.f32 1.0, %v5624_v63 }
 0x38f   :  { %5627 = vrcp.f32 %v846_v0 }
 0x390   :  { %v5626_v1 = vpop.eup %5625 }
 0x391   :  { %v735_v2 = vadd.f32 1.0, %v5626_v1 }
 0x393   :  { %5629 = vrcp.f32 %v735_v2 }
 0x399   :  { %v5628_v3 = vpop.eup %5627 }
 0x39a   :  { %v861_v9 = vsub.f32 1.0, %v5628_v3 }
 0x39d   :  { %v5630_v6 = vpop.eup %5629 }
 0x39e   :  { %v750_v11 = vsub.f32 1.0, %v5630_v6 }
 0x3f2   :  { %v852_v4 = vpop.permute.xlu0 %851 }
 0x3f3   :  { %v854_v5 = vmul.f32 %v5628_v3, %v852_v4 }
 0x3f5   :  { %856 = vrot.lane.b32.xlu0 %v854_v5, %s5994_s6 }
 0x3f6   :  { %v741_v7 = vpop.permute.xlu1 %740 }
 0x3f7   :  { %v743_v8 = vmul.f32 %v5630_v6, %v741_v7 }
 0x3f9   :  { %745 = vrot.lane.b32.xlu1 %v743_v8, %s5994_s6  ;;  %867 = vrot.lane.b32.xlu0 %v6253_v43, %s5994_s6 }
 0x3fd   :  { %756 = vrot.lane.b32.xlu1 %v6262_v48, %s5994_s6  ;;  %863 = vrot.lane.b32.xlu0 %v861_v9, %s6002_s0 }
 0x401   :  { %752 = vrot.lane.b32.xlu0 %v750_v11, %s6002_s0 }
 0x467   :  { %v857_v13 = vpop.permute.xlu0 %856 }
 0x468   :  { %v859_v14 = vadd.f32 %v857_v13, %v657_v57 }
 0x46a   :  { %5631 = vtanh.f32 %v859_v14 }
 0x46b   :  { %v746_v15 = vpop.permute.xlu1 %745  ;;  %v868_v19 = vpop.permute.xlu0 %867 }
 0x46c   :  { %v748_v16 = vadd.f32 %v746_v15, %v655_v59 }
 0x46e   :  { %5633 = vtanh.f32 %v748_v16  ;;  %v883_v16 = vld [vmem:[#allocation6 + $0x14] sm:$0xf] }
 0x46f   :  { %v757_v25 = vpop.permute.xlu1 %756  ;;  %v864_v27 = vpop.permute.xlu0 %863 }
 0x470   :  { %v866_v29 = vmul.f32 %v864_v27, %v653_v28 }
 0x473   :  { %v753_v30 = vpop.permute.xlu0 %752 }
 0x474   :  { %v5632_v18 = vpop.eup %5631  ;;  %v755_v35 = vmul.f32 %v753_v30, %v651_v34 }
 0x475   :  { %v870_v20 = vsub.f32 %v5632_v18, %v868_v19 }
 0x477   :  { %872 = vrot.lane.b32.xlu1 %v870_v20, %s5994_s6 }
 0x478   :  { %v5634_v23 = vpop.eup %5633 }
 0x479   :  { %v759_v26 = vsub.f32 %v5634_v23, %v757_v25  ;;  %v881_v25 = vld [vmem:[#allocation6 + $0x8] sm:$0xf] }
 0x47b   :  { %761 = vrot.lane.b32.xlu1 %v759_v26, %s5994_s6 }
 0x4e9   :  { %v873_v31 = vpop.permute.xlu1 %872 }
 0x4ea   :  { %v875_v33 = vmul.f32 %v873_v31, %v866_v29 }
 0x4ec   :  { %v6292_v36 = vadd.f32 %v875_v33, %v6253_v43 }
 0x4ed   :  { %v762_v37 = vpop.permute.xlu1 %761 }
 0x4ee   :  { %v877_v38 = vmul.f32 %v6292_v36, %v653_v28  ;;  %v764_v39 = vmul.f32 %v762_v37, %v755_v35  ;;  %4997 = vmatmul.mubr.msk.f32.vlgmr.msra.gmra.mrb[8].mxu1 %vm423_vm12, %v6292_v36 }
 0x4ef   :  { %5393 = vmatpush3.bf16.msra.mxu1 %v6147_v10  ;;  %5018 = vmatprep.mubr.msk.f32.mxu1 %vm5999_vm1, %v6000_v24 }
 0x4f0   :  { %879 = vst.msk [vmem:[#allocation5 + $0x18] sm:$0xf] %vm136_vm3, %v877_v38  ;;  %v6302_v40 = vadd.f32 %v764_v39, %v6262_v48  ;;  %5394 = vmatprep.subr.bf16.mxu1 %v5998_v12  ;;  %v887_v48 = vld [vmem:[#allocation3 + $0x14] sm:$0xf] }
 0x4f2   :  { %v766_v41 = vmul.f32 %v6302_v40, %v651_v34  ;;  %4986 = vmatmul.mubr.msk.f32.vlgmr.msra.gmra.mrb[8].mxu0 %vm423_vm12, %v6302_v40 }
 0x4f3   :  { %5387 = vmatpush3.bf16.msra.mxu0 %v6153_v17  ;;  %5396 = vmatpush3.bf16.msra.mxu1 %v6157_v21 }
 0x4f4   :  { %768 = vst.msk [vmem:[#allocation4 + $0x4] sm:$0xf] %vm136_vm3, %v766_v41  ;;  %5388 = vmatprep.subr.bf16.mxu0 %v5998_v12  ;;  %5007 = vmatprep.mubr.msk.f32.mxu0 %vm5999_vm1, %v6000_v24 }
 0x4f5   :  { %5403 = vmatprep.subr.bf16.mxu1 %v5998_v12 }
 0x4f7   :  { %5390 = vmatpush3.bf16.msra.mxu0 %v6163_v22 }
 0x4f8   :  { %5397 = vmatprep.subr.bf16.mxu0 %v5998_v12 }
 0x5c1   :  { %v1068_v42 = vpop.f32.mrb[8].mxu1 }
 0x5c2   :  { %v4998_v43 = vpop.f32.mrb[9].mxu1  ;;  %v1079_v44 = vadd.f32 %v1068_v42, %v6204_v32  ;;  %v1072_v49 = vadd.f32 %v1068_v42, %v887_v48  ;;  %v1115_v42 = vld [vmem:[#allocation2 + $0xc] sm:$0xf] }
 0x5c4   :  { %1081 = vrot.lane.b32.xlu0 %v1079_v44, %s5994_s6  ;;  %v4636_v51 = vmul.f32 -1.442695, %v1072_v49 }
 0x5c5   :  { %v957_v45 = vpop.f32.mrb[8].mxu0 }
 0x5c6   :  { %v4987_v46 = vpop.f32.mrb[9].mxu0  ;;  %v968_v47 = vadd.f32 %v957_v45, %v6216_v53  ;;  %v961_v52 = vadd.f32 %v957_v45, %v885_v50  ;;  %5635 = vpow2.f32 %v4636_v51 }
 0x5c8   :  { %970 = vrot.lane.b32.xlu1 %v968_v47, %s5994_s6  ;;  %v4634_v54 = vmul.f32 -1.442695, %v961_v52 }
 0x5ca   :  { %5637 = vpow2.f32 %v4634_v54 }
 0x5d0   :  { %v5636_v55 = vpop.eup %5635 }
 0x5d1   :  { %v1076_v56 = vadd.f32 1.0, %v5636_v55 }
 0x5d3   :  { %5639 = vrcp.f32 %v1076_v56 }
 0x5d4   :  { %v5638_v57 = vpop.eup %5637 }
 0x5d5   :  { %v965_v58 = vadd.f32 1.0, %v5638_v57 }
 0x5d7   :  { %5641 = vrcp.f32 %v965_v58 }
 0x5dd   :  { %v5640_v59 = vpop.eup %5639 }
 0x5de   :  { %v1091_v1 = vsub.f32 1.0, %v5640_v59 }
 0x5e1   :  { %v5642_v62 = vpop.eup %5641 }
 0x5e2   :  { %v980_v2 = vsub.f32 1.0, %v5642_v62 }
 0x636   :  { %v1082_v60 = vpop.permute.xlu0 %1081 }
 0x637   :  { %v1084_v61 = vmul.f32 %v5640_v59, %v1082_v60 }
 0x639   :  { %1086 = vrot.lane.b32.xlu0 %v1084_v61, %s5994_s6 }
 0x63a   :  { %v971_v63 = vpop.permute.xlu1 %970 }
 0x63b   :  { %v973_v0 = vmul.f32 %v5642_v62, %v971_v63 }
 0x63d   :  { %975 = vrot.lane.b32.xlu1 %v973_v0, %s5994_s6  ;;  %1097 = vrot.lane.b32.xlu0 %v6292_v36, %s5994_s6 }
 0x641   :  { %986 = vrot.lane.b32.xlu1 %v6302_v40, %s5994_s6  ;;  %1093 = vrot.lane.b32.xlu0 %v1091_v1, %s6002_s0 }
 0x645   :  { %982 = vrot.lane.b32.xlu0 %v980_v2, %s6002_s0 }
 0x6ab   :  { %v1087_v3 = vpop.permute.xlu0 %1086 }
 0x6ac   :  { %v1089_v4 = vadd.f32 %v1087_v3, %v887_v48 }
 0x6ae   :  { %5643 = vtanh.f32 %v1089_v4 }
 0x6af   :  { %v976_v5 = vpop.permute.xlu1 %975  ;;  %v1098_v8 = vpop.permute.xlu0 %1097 }
 0x6b0   :  { %v978_v6 = vadd.f32 %v976_v5, %v885_v50 }
 0x6b2   :  { %5645 = vtanh.f32 %v978_v6  ;;  %v1113_v6 = vld [vmem:[#allocation6 + $0x10] sm:$0xf] }
 0x6b3   :  { %v987_v13 = vpop.permute.xlu1 %986  ;;  %v1094_v15 = vpop.permute.xlu0 %1093 }
 0x6b4   :  { %v1096_v18 = vmul.f32 %v1094_v15, %v883_v16 }
 0x6b7   :  { %v983_v19 = vpop.permute.xlu0 %982 }
 0x6b8   :  { %v5644_v7 = vpop.eup %5643  ;;  %v985_v26 = vmul.f32 %v983_v19, %v881_v25 }
 0x6b9   :  { %v1100_v9 = vsub.f32 %v5644_v7, %v1098_v8 }
 0x6bb   :  { %1102 = vrot.lane.b32.xlu1 %v1100_v9, %s5994_s6 }
 0x6bc   :  { %v5646_v11 = vpop.eup %5645 }
 0x6bd   :  { %v989_v14 = vsub.f32 %v5646_v11, %v987_v13  ;;  %v1111_v13 = vld [vmem:[#allocation6 + $0xc] sm:$0xf] }
 0x6bf   :  { %991 = vrot.lane.b32.xlu1 %v989_v14, %s5994_s6 }
 0x72d   :  { %v1103_v20 = vpop.permute.xlu1 %1102 }
 0x72e   :  { %v1105_v23 = vmul.f32 %v1103_v20, %v1096_v18 }
 0x730   :  { %v6332_v27 = vadd.f32 %v1105_v23, %v6292_v36 }
 0x731   :  { %v992_v28 = vpop.permute.xlu1 %991 }
 0x732   :  { %v1107_v29 = vmul.f32 %v6332_v27, %v883_v16  ;;  %v994_v30 = vmul.f32 %v992_v28, %v985_v26  ;;  %5019 = vmatmul.mubr.msk.f32.vlgmr.msra.gmra.mrb[10].mxu1 %vm423_vm12, %v6332_v27 }
 0x733   :  { %5405 = vmatpush3.bf16.msra.mxu1 %v6147_v10  ;;  %5040 = vmatprep.mubr.msk.f32.mxu1 %vm5999_vm1, %v6000_v24 }
 0x734   :  { %1109 = vst.msk [vmem:[#allocation5 + $0x14] sm:$0xf] %vm136_vm3, %v1107_v29  ;;  %v6342_v31 = vadd.f32 %v994_v30, %v6302_v40  ;;  %5406 = vmatprep.subr.bf16.mxu1 %v5998_v12  ;;  %v1117_v40 = vld [vmem:[#allocation3 + $0x10] sm:$0xf] }
 0x736   :  { %v996_v33 = vmul.f32 %v6342_v31, %v881_v25  ;;  %5008 = vmatmul.mubr.msk.f32.vlgmr.msra.gmra.mrb[10].mxu0 %vm423_vm12, %v6342_v31 }
 0x737   :  { %5399 = vmatpush3.bf16.msra.mxu0 %v6153_v17  ;;  %5408 = vmatpush3.bf16.msra.mxu1 %v6157_v21 }
 0x738   :  { %998 = vst.msk [vmem:[#allocation4 + $0x8] sm:$0xf] %vm136_vm3, %v996_v33  ;;  %5400 = vmatprep.subr.bf16.mxu0 %v5998_v12  ;;  %5029 = vmatprep.mubr.msk.f32.mxu0 %vm5999_vm1, %v6000_v24 }
 0x739   :  { %5415 = vmatprep.subr.bf16.mxu1 %v5998_v12 }
 0x73b   :  { %5402 = vmatpush3.bf16.msra.mxu0 %v6163_v22 }
 0x73c   :  { %5409 = vmatprep.subr.bf16.mxu0 %v5998_v12 }
 0x805   :  { %v1298_v34 = vpop.f32.mrb[10].mxu1 }
 0x806   :  { %v5020_v35 = vpop.f32.mrb[11].mxu1  ;;  %v1309_v36 = vadd.f32 %v1298_v34, %v6204_v32  ;;  %v1302_v41 = vadd.f32 %v1298_v34, %v1117_v40  ;;  %v1343_v34 = vld [vmem:[#allocation2 + $0x10] sm:$0xf] }
 0x808   :  { %1311 = vrot.lane.b32.xlu0 %v1309_v36, %s5994_s6  ;;  %v4640_v43 = vmul.f32 -1.442695, %v1302_v41 }
 0x809   :  { %v1187_v37 = vpop.f32.mrb[10].mxu0 }
 0x80a   :  { %v5009_v38 = vpop.f32.mrb[11].mxu0  ;;  %v1198_v39 = vadd.f32 %v1187_v37, %v6216_v53  ;;  %v1191_v44 = vadd.f32 %v1187_v37, %v1115_v42  ;;  %5647 = vpow2.f32 %v4640_v43 }
 0x80c   :  { %1200 = vrot.lane.b32.xlu1 %v1198_v39, %s5994_s6  ;;  %v4638_v45 = vmul.f32 -1.442695, %v1191_v44 }
 0x80e   :  { %5649 = vpow2.f32 %v4638_v45 }
 0x814   :  { %v5648_v46 = vpop.eup %5647 }
 0x815   :  { %v1306_v47 = vadd.f32 1.0, %v5648_v46 }
 0x817   :  { %5651 = vrcp.f32 %v1306_v47 }
 0x818   :  { %v5650_v48 = vpop.eup %5649 }
 0x819   :  { %v1195_v49 = vadd.f32 1.0, %v5650_v48 }
 0x81b   :  { %5653 = vrcp.f32 %v1195_v49 }
 0x821   :  { %v5652_v50 = vpop.eup %5651 }
 0x822   :  { %v1321_v57 = vsub.f32 1.0, %v5652_v50 }
 0x825   :  { %v5654_v54 = vpop.eup %5653 }
 0x826   :  { %v1210_v58 = vsub.f32 1.0, %v5654_v54 }
 0x87a   :  { %v1312_v51 = vpop.permute.xlu0 %1311 }
 0x87b   :  { %v1314_v52 = vmul.f32 %v5652_v50, %v1312_v51 }
 0x87d   :  { %1316 = vrot.lane.b32.xlu0 %v1314_v52, %s5994_s6 }
 0x87e   :  { %v1201_v55 = vpop.permute.xlu1 %1200 }
 0x87f   :  { %v1203_v56 = vmul.f32 %v5654_v54, %v1201_v55 }
 0x881   :  { %1205 = vrot.lane.b32.xlu1 %v1203_v56, %s5994_s6  ;;  %1327 = vrot.lane.b32.xlu0 %v6332_v27, %s5994_s6 }
 0x885   :  { %1216 = vrot.lane.b32.xlu1 %v6342_v31, %s5994_s6  ;;  %1323 = vrot.lane.b32.xlu0 %v1321_v57, %s6002_s0 }
 0x889   :  { %1212 = vrot.lane.b32.xlu0 %v1210_v58, %s6002_s0 }
 0x8ef   :  { %v1317_v59 = vpop.permute.xlu0 %1316 }
 0x8f0   :  { %v1319_v60 = vadd.f32 %v1317_v59, %v1117_v40 }
 0x8f2   :  { %5655 = vtanh.f32 %v1319_v60 }
 0x8f3   :  { %v1206_v61 = vpop.permute.xlu1 %1205  ;;  %v1328_v0 = vpop.permute.xlu0 %1327 }
 0x8f4   :  { %v1208_v62 = vadd.f32 %v1206_v61, %v1115_v42 }
 0x8f6   :  { %5657 = vtanh.f32 %v1208_v62  ;;  %v1341_v62 = vld [vmem:[#allocation6 + $0xc] sm:$0xf] }
 0x8f7   :  { %v1217_v3 = vpop.permute.xlu1 %1216  ;;  %v1324_v5 = vpop.permute.xlu0 %1323 }
 0x8f8   :  { %v1326_v7 = vmul.f32 %v1324_v5, %v1113_v6 }
 0x8fb   :  { %v1213_v8 = vpop.permute.xlu0 %1212 }
 0x8fc   :  { %v5656_v63 = vpop.eup %5655  ;;  %v1215_v14 = vmul.f32 %v1213_v8, %v1111_v13 }
 0x8fd   :  { %v1330_v1 = vsub.f32 %v5656_v63, %v1328_v0 }
 0x8ff   :  { %1332 = vrot.lane.b32.xlu1 %v1330_v1, %s5994_s6 }
 0x900   :  { %v5658_v2 = vpop.eup %5657 }
 0x901   :  { %v1219_v4 = vsub.f32 %v5658_v2, %v1217_v3  ;;  %v1340_v3 = vld [vmem:[#allocation6 + $0x10] sm:$0xf] }
 0x903   :  { %1221 = vrot.lane.b32.xlu1 %v1219_v4, %s5994_s6 }
 0x971   :  { %v1333_v9 = vpop.permute.xlu1 %1332 }
 0x972   :  { %v1335_v11 = vmul.f32 %v1333_v9, %v1326_v7 }
 0x974   :  { %v6372_v15 = vadd.f32 %v1335_v11, %v6332_v27 }
 0x975   :  { %v1222_v16 = vpop.permute.xlu1 %1221 }
 0x976   :  { %v1337_v18 = vmul.f32 %v6372_v15, %v1113_v6  ;;  %v1224_v19 = vmul.f32 %v1222_v16, %v1215_v14  ;;  %5041 = vmatmul.mubr.msk.f32.vlgmr.msra.gmra.mrb[12].mxu1 %vm423_vm12, %v6372_v15 }
 0x977   :  { %5417 = vmatpush3.bf16.msra.mxu1 %v6147_v10  ;;  %5062 = vmatprep.mubr.msk.f32.mxu1 %vm5999_vm1, %v6000_v24 }
 0x978   :  { %1339 = vst.msk [vmem:[#allocation5 + $0x10] sm:$0xf] %vm136_vm3, %v1337_v18  ;;  %v6382_v20 = vadd.f32 %v1224_v19, %v6342_v31  ;;  %5418 = vmatprep.subr.bf16.mxu1 %v5998_v12  ;;  %v1345_v31 = vld [vmem:[#allocation3 + $0xc] sm:$0xf] }
 0x97a   :  { %v1226_v23 = vmul.f32 %v6382_v20, %v1111_v13  ;;  %5030 = vmatmul.mubr.msk.f32.vlgmr.msra.gmra.mrb[12].mxu0 %vm423_vm12, %v6382_v20 }
 0x97b   :  { %5411 = vmatpush3.bf16.msra.mxu0 %v6153_v17  ;;  %5420 = vmatpush3.bf16.msra.mxu1 %v6157_v21 }
 0x97c   :  { %1228 = vst.msk [vmem:[#allocation4 + $0xc] sm:$0xf] %vm136_vm3, %v1226_v23  ;;  %5412 = vmatprep.subr.bf16.mxu0 %v5998_v12  ;;  %5051 = vmatprep.mubr.msk.f32.mxu0 %vm5999_vm1, %v6000_v24 }
 0x97d   :  { %5427 = vmatprep.subr.bf16.mxu1 %v5998_v12 }
 0x97f   :  { %5414 = vmatpush3.bf16.msra.mxu0 %v6163_v22 }
 0x980   :  { %5421 = vmatprep.subr.bf16.mxu0 %v5998_v12 }
 0xa49   :  { %v1526_v25 = vpop.f32.mrb[12].mxu1 }
 0xa4a   :  { %v5042_v26 = vpop.f32.mrb[13].mxu1  ;;  %v1537_v27 = vadd.f32 %v1526_v25, %v6204_v32  ;;  %v1530_v33 = vadd.f32 %v1526_v25, %v1345_v31  ;;  %v1571_v25 = vld [vmem:[#allocation2 + $0x14] sm:$0xf] }
 0xa4c   :  { %1539 = vrot.lane.b32.xlu0 %v1537_v27, %s5994_s6  ;;  %v4644_v35 = vmul.f32 -1.442695, %v1530_v33 }
 0xa4d   :  { %v1415_v28 = vpop.f32.mrb[12].mxu0 }
 0xa4e   :  { %v5031_v29 = vpop.f32.mrb[13].mxu0  ;;  %v1426_v30 = vadd.f32 %v1415_v28, %v6216_v53  ;;  %v1419_v36 = vadd.f32 %v1415_v28, %v1343_v34  ;;  %5659 = vpow2.f32 %v4644_v35 }
 0xa50   :  { %1428 = vrot.lane.b32.xlu1 %v1426_v30, %s5994_s6  ;;  %v4642_v37 = vmul.f32 -1.442695, %v1419_v36 }
 0xa52   :  { %5661 = vpow2.f32 %v4642_v37 }
 0xa58   :  { %v5660_v38 = vpop.eup %5659 }
 0xa59   :  { %v1534_v39 = vadd.f32 1.0, %v5660_v38 }
 0xa5b   :  { %5663 = vrcp.f32 %v1534_v39 }
 0xa5c   :  { %v5662_v40 = vpop.eup %5661 }
 0xa5d   :  { %v1423_v41 = vadd.f32 1.0, %v5662_v40 }
 0xa5f   :  { %5665 = vrcp.f32 %v1423_v41 }
 0xa65   :  { %v5664_v42 = vpop.eup %5663 }
 0xa66   :  { %v1549_v48 = vsub.f32 1.0, %v5664_v42 }
 0xa69   :  { %v5666_v45 = vpop.eup %5665 }
 0xa6a   :  { %v1438_v49 = vsub.f32 1.0, %v5666_v45 }
 0xabe   :  { %v1540_v43 = vpop.permute.xlu0 %1539 }
 0xabf   :  { %v1542_v44 = vmul.f32 %v5664_v42, %v1540_v43 }
 0xac1   :  { %1544 = vrot.lane.b32.xlu0 %v1542_v44, %s5994_s6 }
 0xac2   :  { %v1429_v46 = vpop.permute.xlu1 %1428 }
 0xac3   :  { %v1431_v47 = vmul.f32 %v5666_v45, %v1429_v46 }
 0xac5   :  { %1433 = vrot.lane.b32.xlu1 %v1431_v47, %s5994_s6  ;;  %1555 = vrot.lane.b32.xlu0 %v6372_v15, %s5994_s6 }
 0xac9   :  { %1444 = vrot.lane.b32.xlu1 %v6382_v20, %s5994_s6  ;;  %1551 = vrot.lane.b32.xlu0 %v1549_v48, %s6002_s0 }
 0xacd   :  { %1440 = vrot.lane.b32.xlu0 %v1438_v49, %s6002_s0 }
 0xb33   :  { %v1545_v50 = vpop.permute.xlu0 %1544 }
 0xb34   :  { %v1547_v51 = vadd.f32 %v1545_v50, %v1345_v31 }
 0xb36   :  { %5667 = vtanh.f32 %v1547_v51 }
 0xb37   :  { %v1434_v52 = vpop.permute.xlu1 %1433  ;;  %v1556_v56 = vpop.permute.xlu0 %1555 }
 0xb38   :  { %v1436_v54 = vadd.f32 %v1434_v52, %v1343_v34 }
 0xb3a   :  { %5669 = vtanh.f32 %v1436_v54  ;;  %v1569_v54 = vld [vmem:[#allocation6 + $0x8] sm:$0xf] }
 0xb3b   :  { %v1445_v59 = vpop.permute.xlu1 %1444  ;;  %v1552_v61 = vpop.permute.xlu0 %1551 }
 0xb3c   :  { %v1554_v63 = vmul.f32 %v1552_v61, %v1341_v62 }
 0xb3f   :  { %v1441_v0 = vpop.permute.xlu0 %1440 }
 0xb40   :  { %v5668_v55 = vpop.eup %5667  ;;  %v1443_v4 = vmul.f32 %v1441_v0, %v1340_v3 }
 0xb41   :  { %v1558_v57 = vsub.f32 %v5668_v55, %v1556_v56 }
 0xb43   :  { %1560 = vrot.lane.b32.xlu1 %v1558_v57, %s5994_s6 }
 0xb44   :  { %v5670_v58 = vpop.eup %5669 }
 0xb45   :  { %v1447_v60 = vsub.f32 %v5670_v58, %v1445_v59  ;;  %v1568_v59 = vld [vmem:[#allocation6 + $0x14] sm:$0xf] }
 0xb47   :  { %1449 = vrot.lane.b32.xlu1 %v1447_v60, %s5994_s6 }
 0xbb5   :  { %v1561_v1 = vpop.permute.xlu1 %1560 }
 0xbb6   :  { %v1563_v2 = vmul.f32 %v1561_v1, %v1554_v63 }
 0xbb8   :  { %v6412_v5 = vadd.f32 %v1563_v2, %v6372_v15 }
 0xbb9   :  { %v1450_v6 = vpop.permute.xlu1 %1449 }
 0xbba   :  { %v1565_v7 = vmul.f32 %v6412_v5, %v1341_v62  ;;  %v1452_v8 = vmul.f32 %v1450_v6, %v1443_v4  ;;  %5063 = vmatmul.mubr.msk.f32.vlgmr.msra.gmra.mrb[14].mxu1 %vm423_vm12, %v6412_v5 }
 0xbbb   :  { %5429 = vmatpush3.bf16.msra.mxu1 %v6147_v10  ;;  %5084 = vmatprep.mubr.msk.f32.mxu1 %vm5999_vm1, %v6000_v24 }
 0xbbc   :  { %1567 = vst.msk [vmem:[#allocation5 + $0xc] sm:$0xf] %vm136_vm3, %v1565_v7  ;;  %v6422_v9 = vadd.f32 %v1452_v8, %v6382_v20  ;;  %5430 = vmatprep.subr.bf16.mxu1 %v5998_v12  ;;  %v1573_v20 = vld [vmem:[#allocation3 + $0x8] sm:$0xf]  ;;  %v1799_v8 = vld [vmem:[#allocation2 + $0x18] sm:$0xf] }
 0xbbe   :  { %v1454_v11 = vmul.f32 %v6422_v9, %v1340_v3  ;;  %5052 = vmatmul.mubr.msk.f32.vlgmr.msra.gmra.mrb[14].mxu0 %vm423_vm12, %v6422_v9 }
 0xbbf   :  { %5423 = vmatpush3.bf16.msra.mxu0 %v6153_v17  ;;  %5432 = vmatpush3.bf16.msra.mxu1 %v6157_v21 }
 0xbc0   :  { %1456 = vst.msk [vmem:[#allocation4 + $0x10] sm:$0xf] %vm136_vm3, %v1454_v11  ;;  %5424 = vmatprep.subr.bf16.mxu0 %v5998_v12  ;;  %5073 = vmatprep.mubr.msk.f32.mxu0 %vm5999_vm1, %v6000_v24 }
 0xbc1   :  { %5439 = vmatprep.subr.bf16.mxu1 %v5998_v12 }
 0xbc3   :  { %5426 = vmatpush3.bf16.msra.mxu0 %v6163_v22 }
 0xbc4   :  { %5433 = vmatprep.subr.bf16.mxu0 %v5998_v12 }
 0xc8d   :  { %v1754_v13 = vpop.f32.mrb[14].mxu1 }
 0xc8e   :  { %v5064_v14 = vpop.f32.mrb[15].mxu1  ;;  %v1765_v15 = vadd.f32 %v1754_v13, %v6204_v32  ;;  %v1758_v23 = vadd.f32 %v1754_v13, %v1573_v20 }
 0xc90   :  { %1767 = vrot.lane.b32.xlu0 %v1765_v15, %s5994_s6  ;;  %v4648_v26 = vmul.f32 -1.442695, %v1758_v23 }
 0xc91   :  { %v1643_v16 = vpop.f32.mrb[14].mxu0 }
 0xc92   :  { %v5053_v18 = vpop.f32.mrb[15].mxu0  ;;  %v1654_v19 = vadd.f32 %v1643_v16, %v6216_v53  ;;  %v1647_v27 = vadd.f32 %v1643_v16, %v1571_v25  ;;  %5671 = vpow2.f32 %v4648_v26 }
 0xc94   :  { %1656 = vrot.lane.b32.xlu1 %v1654_v19, %s5994_s6  ;;  %v4646_v28 = vmul.f32 -1.442695, %v1647_v27 }
 0xc96   :  { %5673 = vpow2.f32 %v4646_v28 }
 0xc9c   :  { %v5672_v29 = vpop.eup %5671 }
 0xc9d   :  { %v1762_v30 = vadd.f32 1.0, %v5672_v29 }
 0xc9f   :  { %5675 = vrcp.f32 %v1762_v30 }
 0xca0   :  { %v5674_v31 = vpop.eup %5673 }
 0xca1   :  { %v1651_v33 = vadd.f32 1.0, %v5674_v31 }
 0xca3   :  { %5677 = vrcp.f32 %v1651_v33 }
 0xca9   :  { %v5676_v34 = vpop.eup %5675 }
 0xcaa   :  { %v1777_v40 = vsub.f32 1.0, %v5676_v34 }
 0xcad   :  { %v5678_v37 = vpop.eup %5677 }
 0xcae   :  { %v1666_v41 = vsub.f32 1.0, %v5678_v37 }
 0xd02   :  { %v1768_v35 = vpop.permute.xlu0 %1767 }
 0xd03   :  { %v1770_v36 = vmul.f32 %v5676_v34, %v1768_v35 }
 0xd05   :  { %1772 = vrot.lane.b32.xlu0 %v1770_v36, %s5994_s6 }
 0xd06   :  { %v1657_v38 = vpop.permute.xlu1 %1656 }
 0xd07   :  { %v1659_v39 = vmul.f32 %v5678_v37, %v1657_v38 }
 0xd09   :  { %1661 = vrot.lane.b32.xlu1 %v1659_v39, %s5994_s6  ;;  %1783 = vrot.lane.b32.xlu0 %v6412_v5, %s5994_s6 }
 0xd0d   :  { %1672 = vrot.lane.b32.xlu1 %v6422_v9, %s5994_s6  ;;  %1779 = vrot.lane.b32.xlu0 %v1777_v40, %s6002_s0 }
 0xd11   :  { %1668 = vrot.lane.b32.xlu0 %v1666_v41, %s6002_s0  ;;  %v1797_v41 = vld [vmem:[#allocation6 + $0x4] sm:$0xf] }
 0xd77   :  { %v1773_v42 = vpop.permute.xlu0 %1772 }
 0xd78   :  { %v1775_v43 = vadd.f32 %v1773_v42, %v1573_v20 }
 0xd7a   :  { %5679 = vtanh.f32 %v1775_v43 }
 0xd7b   :  { %v1662_v44 = vpop.permute.xlu1 %1661  ;;  %v1784_v47 = vpop.permute.xlu0 %1783 }
 0xd7c   :  { %v1664_v45 = vadd.f32 %v1662_v44, %v1571_v25 }
 0xd7e   :  { %5681 = vtanh.f32 %v1664_v45 }
 0xd7f   :  { %v1673_v50 = vpop.permute.xlu1 %1672  ;;  %v1780_v52 = vpop.permute.xlu0 %1779 }
 0xd80   :  { %v1782_v55 = vmul.f32 %v1780_v52, %v1569_v54 }
 0xd83   :  { %v1669_v56 = vpop.permute.xlu0 %1668 }
 0xd84   :  { %v5680_v46 = vpop.eup %5679  ;;  %v1671_v60 = vmul.f32 %v1669_v56, %v1568_v59 }
 0xd85   :  { %v1786_v48 = vsub.f32 %v5680_v46, %v1784_v47  ;;  %v1796_v46 = vld [vmem:[#allocation6 + $0x18] sm:$0xf] }
 0xd87   :  { %1788 = vrot.lane.b32.xlu1 %v1786_v48, %s5994_s6 }
 0xd88   :  { %v5682_v49 = vpop.eup %5681 }
 0xd89   :  { %v1675_v51 = vsub.f32 %v5682_v49, %v1673_v50 }
 0xd8b   :  { %1677 = vrot.lane.b32.xlu1 %v1675_v51, %s5994_s6 }
 0xdf9   :  { %v1789_v57 = vpop.permute.xlu1 %1788 }
 0xdfa   :  { %v1791_v58 = vmul.f32 %v1789_v57, %v1782_v55 }
 0xdfc   :  { %v6452_v61 = vadd.f32 %v1791_v58, %v6412_v5 }
 0xdfd   :  { %v1678_v62 = vpop.permute.xlu1 %1677 }
 0xdfe   :  { %v1793_v63 = vmul.f32 %v6452_v61, %v1569_v54  ;;  %v1680_v0 = vmul.f32 %v1678_v62, %v1671_v60  ;;  %5085 = vmatmul.mubr.msk.f32.vlgmr.msra.gmra.mrb[16].mxu1 %vm423_vm12, %v6452_v61 }
 0xdff   :  { %5441 = vmatpush3.bf16.msra.mxu1 %v6147_v10  ;;  %5106 = vmatprep.mubr.msk.f32.mxu1 %vm5999_vm1, %v6000_v24 }
 0xe00   :  { %1795 = vst.msk [vmem:[#allocation5 + $0x8] sm:$0xf] %vm136_vm3, %v1793_v63  ;;  %v6462_v1 = vadd.f32 %v1680_v0, %v6422_v9  ;;  %5442 = vmatprep.subr.bf16.mxu1 %v5998_v12  ;;  %v2027_v63 = vld [vmem:[#allocation2 + $0x1c] sm:$0xf] }
 0xe02   :  { %v1682_v2 = vmul.f32 %v6462_v1, %v1568_v59  ;;  %5074 = vmatmul.mubr.msk.f32.vlgmr.msra.gmra.mrb[16].mxu0 %vm423_vm12, %v6462_v1 }
 0xe03   :  { %5435 = vmatpush3.bf16.msra.mxu0 %v6153_v17  ;;  %5444 = vmatpush3.bf16.msra.mxu1 %v6157_v21  ;;  %v1801_v21 = vld [vmem:[#allocation3 + $0x4] sm:$0xf] }
 0xe04   :  { %1684 = vst.msk [vmem:[#allocation4 + $0x14] sm:$0xf] %vm136_vm3, %v1682_v2  ;;  %5436 = vmatprep.subr.bf16.mxu0 %v5998_v12  ;;  %5095 = vmatprep.mubr.msk.f32.mxu0 %vm5999_vm1, %v6000_v24 }
 0xe07   :  { %5438 = vmatpush3.bf16.msra.mxu0 %v6163_v22 }
 0xed1   :  { %v1982_v10 = vpop.f32.mrb[16].mxu1 }
 0xed2   :  { %v5086_v3 = vpop.f32.mrb[17].mxu1  ;;  %v1993_v4 = vadd.f32 %v1982_v10, %v6204_v32  ;;  %v1986_v7 = vadd.f32 %v1982_v10, %v1801_v21 }
 0xed4   :  { %1995 = vrot.lane.b32.xlu0 %v1993_v4, %s5994_s6  ;;  %v4652_v9 = vmul.f32 -1.442695, %v1986_v7 }
 0xed5   :  { %v1871_v5 = vpop.f32.mrb[16].mxu0 }
 0xed6   :  { %v5075_v6 = vpop.f32.mrb[17].mxu0  ;;  %v1882_v17 = vadd.f32 %v1871_v5, %v6216_v53  ;;  %v1875_v11 = vadd.f32 %v1871_v5, %v1799_v8  ;;  %5683 = vpow2.f32 %v4652_v9 }
 0xed8   :  { %1884 = vrot.lane.b32.xlu1 %v1882_v17, %s5994_s6  ;;  %v4650_v13 = vmul.f32 -1.442695, %v1875_v11 }
 0xeda   :  { %5685 = vpow2.f32 %v4650_v13 }
 0xee0   :  { %v5684_v22 = vpop.eup %5683 }
 0xee1   :  { %v1990_v14 = vadd.f32 1.0, %v5684_v22 }
 0xee3   :  { %5687 = vrcp.f32 %v1990_v14 }
 0xee4   :  { %v5686_v15 = vpop.eup %5685 }
 0xee5   :  { %v1879_v16 = vadd.f32 1.0, %v5686_v15  ;;  %v2274_v15 = vld [vmem:[#allocation13 + $0x20] sm:$0xff] }
 0xee7   :  { %5689 = vrcp.f32 %v1879_v16  ;;  %v2275_v16 = vld [vmem:[#allocation13 + $0x28] sm:$0xff] }
 0xeed   :  { %v5688_v18 = vpop.eup %5687 }
 0xeee   :  { %v2005_v27 = vsub.f32 1.0, %v5688_v18 }
 0xef1   :  { %v5690_v23 = vpop.eup %5689 }
 0xef2   :  { %v1894_v28 = vsub.f32 1.0, %v5690_v23 }
 0xf46   :  { %v1996_v19 = vpop.permute.xlu0 %1995 }
 0xf47   :  { %v1998_v20 = vmul.f32 %v5688_v18, %v1996_v19  ;;  %v2525_v18 = vld [vmem:[#allocation13 + $0x60] sm:$0xff]  ;;  %v5445_v19 = vpack.c.bf16 %v2275_v16, %v2274_v15  ;;  %v2739_v15 = vld [vmem:[#allocation15 + $0x38] sm:$0xff] }
 0xf49   :  { %2000 = vrot.lane.b32.xlu0 %v1998_v20, %s5994_s6  ;;  %v2526_v20 = vld [vmem:[#allocation13 + $0x68] sm:$0xff]  ;;  %5446 = vmatprep.subr.bf16.mxu0 %v5445_v19 }
 0xf4a   :  { %v1885_v25 = vpop.permute.xlu1 %1884 }
 0xf4b   :  { %v1887_v26 = vmul.f32 %v5690_v23, %v1885_v25  ;;  %v5461_v23 = vpack.c.bf16 %v2526_v20, %v2525_v18  ;;  %v4665_v20 = vld [vmem:[%s6955_s7] ss:$0 sm:$0xff] }
 0xf4d   :  { %1889 = vrot.lane.b32.xlu1 %v1887_v26, %s5994_s6  ;;  %2011 = vrot.lane.b32.xlu0 %v6452_v61, %s5994_s6 }
 0xf4e   :  { %5462 = vmatprep.subr.bf16.mxu1 %v5461_v23 }
 0xf51   :  { %1900 = vrot.lane.b32.xlu1 %v6462_v1, %s5994_s6  ;;  %2007 = vrot.lane.b32.xlu0 %v2005_v27, %s6002_s0  ;;  %v2276_v27 = vld [vmem:[#allocation13 + $0x30] sm:$0xff] }
 0xf55   :  { %1896 = vrot.lane.b32.xlu0 %v1894_v28, %s6002_s0  ;;  %v2277_v28 = vld [vmem:[#allocation13 + $0x38] sm:$0xff] }
 0xfbb   :  { %v2001_v29 = vpop.permute.xlu0 %2000 }
 0xfbc   :  { %v2003_v30 = vadd.f32 %v2001_v29, %v1801_v21  ;;  %v2527_v29 = vld [vmem:[#allocation13 + $0x70] sm:$0xff] }
 0xfbe   :  { %5691 = vtanh.f32 %v2003_v30 }
 0xfbf   :  { %v1890_v31 = vpop.permute.xlu1 %1889  ;;  %v2012_v35 = vpop.permute.xlu0 %2011 }
 0xfc0   :  { %v1892_v33 = vadd.f32 %v1890_v31, %v1799_v8  ;;  %v5449_v31 = vpack.c.bf16 %v2277_v28, %v2276_v27 }
 0xfc2   :  { %5693 = vtanh.f32 %v1892_v33  ;;  %v2528_v33 = vld [vmem:[#allocation13 + $0x78] sm:$0xff] }
 0xfc3   :  { %v1901_v38 = vpop.permute.xlu1 %1900  ;;  %v2008_v40 = vpop.permute.xlu0 %2007 }
 0xfc4   :  { %v2010_v42 = vmul.f32 %v2008_v40, %v1797_v41  ;;  %v2520_v40 = vld [vmem:[#allocation13 + $0x40] sm:$0xff] }
 0xfc7   :  { %v1897_v43 = vpop.permute.xlu0 %1896 }
 0xfc8   :  { %v5692_v34 = vpop.eup %5691  ;;  %v1899_v47 = vmul.f32 %v1897_v43, %v1796_v46 }
 0xfc9   :  { %v2014_v36 = vsub.f32 %v5692_v34, %v2012_v35  ;;  %v5465_v34 = vpack.c.bf16 %v2528_v33, %v2527_v29 }
 0xfcb   :  { %2016 = vrot.lane.b32.xlu1 %v2014_v36, %s5994_s6 }
 0xfcc   :  { %v5694_v37 = vpop.eup %5693 }
 0xfcd   :  { %v1903_v39 = vsub.f32 %v5694_v37, %v1901_v38  ;;  %v2269_v38 = vld [vmem:[#allocation13] sm:$0xff] }
 0xfcf   :  { %1905 = vrot.lane.b32.xlu1 %v1903_v39, %s5994_s6  ;;  %v2270_v39 = vld [vmem:[#allocation13 + $0x8] sm:$0xff] }
0x103d   :  { %v2017_v44 = vpop.permute.xlu1 %2016 }
0x103e   :  { %v2019_v45 = vmul.f32 %v2017_v44, %v2010_v42  ;;  %v2521_v42 = vld [vmem:[#allocation13 + $0x48] sm:$0xff]  ;;  %v4680_v44 = vld [vmem:[%s6957_s9 + $0x1] ss:$0 sm:$0xff] }
0x103f   :  { %v5469_v43 = vpack.c.bf16 %v2521_v42, %v2520_v40 }
0x1040   :  { %v6490_v48 = vadd.f32 %v2019_v45, %v6452_v61  ;;  %v2028_v61 = vld [vmem:[#allocation3] sm:$0xf] }
0x1041   :  { %v1906_v49 = vpop.permute.xlu1 %1905  ;;  %v4678_v45 = vld [vmem:[%s6957_s9] ss:$0 sm:$0xff] }
0x1042   :  { %v2021_v50 = vmul.f32 %v6490_v48, %v1797_v41  ;;  %v1908_v51 = vmul.f32 %v1906_v49, %v1899_v47  ;;  %5107 = vmatmul.mubr.msk.f32.vlgmr.msra.gmra.mrb[18].mxu1 %vm423_vm12, %v6490_v48  ;;  %v5453_v41 = vpack.c.bf16 %v2270_v39, %v2269_v38  ;;  %v2025_v47 = vld [vmem:[#allocation6] sm:$0xf] }
0x1043   :  { %5464 = vmatpush3.bf16.msra.mxu1 %v5461_v23  ;;  %v4675_v23 = vld [vmem:[%s6955_s7 + $0x1] ss:$0 sm:$0xff]  ;;  %s6003_s7 = smov [#allocation16]  }
0x1044   :  { %2023 = vst.msk [vmem:[#allocation5 + $0x4] sm:$0xf] %vm136_vm3, %v2021_v50  ;;  %v6497_v52 = vadd.f32 %v1908_v51, %v6462_v1  ;;  %5466 = vmatprep.subr.bf16.mxu1 %v5465_v34  ;;  %s4560_s2 = sshll.u32 %s6003_s7, 4  ;;  %s4561_s2 = int_to_ptr.vmem [resolvable:$true] %s4560_s2 }
0x1045   :  { %s5913_s28 = scalar_lea.vmem %s4561_s2, 512  ;;  %p5918_p13 = scmp.lt.s32.totalorder %s4561_s2, %s4561_s2 }
0x1046   :  { %v1910_v54 = vmul.f32 %v6497_v52, %v1796_v46  ;;  %5096 = vmatmul.mubr.msk.f32.vlgmr.msra.gmra.mrb[18].mxu0 %vm423_vm12, %v6497_v52  ;;  %p5914_p12 = scmp.ne.s32.totalorder %s4561_s2, %s5913_s28  ;;  %p5919_p0 = scmp.lt.s32.totalorder %s5913_s28, %s5913_s28 }
0x1047   :  { %5448 = vmatpush3.bf16.msra.mxu0 %v5445_v19  ;;  %5468 = vmatpush3.bf16.msra.mxu1 %v5465_v34 }
0x1048   :  { %1912 = vst.msk [vmem:[#allocation4 + $0x18] sm:$0xf] %vm136_vm3, %v1910_v54  ;;  %5450 = vmatprep.subr.bf16.mxu0 %v5449_v31  ;;  %5470 = vmatprep.subr.bf16.mxu1 %v5469_v43  ;;  %p5920_p1 = por %p5919_p0, %p5918_p13 }
0x104a   :  { %p5921_p2 = pnand %p5920_p1, %p5914_p12 }
0x104b   :  { %5452 = vmatpush3.bf16.msra.mxu0 %v5449_v31 }
0x104c   :  { %5454 = vmatprep.subr.bf16.mxu0 %v5453_v41 }
0x1115   :  { %v2209_v55 = vpop.f32.mrb[18].mxu1 }
0x1116   :  { %v5108_v56 = vpop.f32.mrb[19].mxu1  ;;  %v2220_v57 = vadd.f32 %v2209_v55, %v6204_v32  ;;  %v2213_v62 = vadd.f32 %v2209_v55, %v2028_v61  ;;  %v2024_v55 = vld [vmem:[#allocation6 + $0x1c] sm:$0xf] }
0x1118   :  { %2222 = vrot.lane.b32.xlu0 %v2220_v57, %s5994_s6  ;;  %v4656_v0 = vmul.f32 -1.442695, %v2213_v62 }
0x1119   :  { %v2098_v58 = vpop.f32.mrb[18].mxu0 }
0x111a   :  { %v5097_v59 = vpop.f32.mrb[19].mxu0  ;;  %v2109_v60 = vadd.f32 %v2098_v58, %v6216_v53  ;;  %v2102_v1 = vadd.f32 %v2098_v58, %v2027_v63  ;;  %5695 = vpow2.f32 %v4656_v0  ;;  %v2272_v0 = vld [vmem:[#allocation13 + $0x18] sm:$0xff] }
0x111c   :  { %2111 = vrot.lane.b32.xlu1 %v2109_v60, %s5994_s6  ;;  %v4654_v2 = vmul.f32 -1.442695, %v2102_v1  ;;  %v2522_v1 = vld [vmem:[#allocation13 + $0x50] sm:$0xff] }
0x111e   :  { %5697 = vpow2.f32 %v4654_v2  ;;  %v2523_v2 = vld [vmem:[#allocation13 + $0x58] sm:$0xff] }
0x1124   :  { %v5696_v10 = vpop.eup %5695 }
0x1125   :  { %v2217_v3 = vadd.f32 1.0, %v5696_v10 }
0x1127   :  { %5699 = vrcp.f32 %v2217_v3  ;;  %v5605_v3 = vld [vmem:[#allocation5 + $0x10] sm:$0xff]  }
0x1128   :  { %v5698_v4 = vpop.eup %5697 }
0x1129   :  { %v2106_v32 = vadd.f32 1.0, %v5698_v4 }
0x112b   :  { %5701 = vrcp.f32 %v2106_v32  ;;  %v5473_v32 = vpack.c.bf16 %v2523_v2, %v2522_v1 }
0x1131   :  { %v5700_v5 = vpop.eup %5699 }
0x1132   :  { %v2232_v8 = vsub.f32 1.0, %v5700_v5 }
0x1135   :  { %v5702_v53 = vpop.eup %5701 }
0x1136   :  { %v2121_v9 = vsub.f32 1.0, %v5702_v53 }
0x118a   :  { %v2223_v6 = vpop.permute.xlu0 %2222 }
0x118b   :  { %v2225_v17 = vmul.f32 %v5700_v5, %v2223_v6  ;;  %v5607_v5 = vld [vmem:[#allocation4] sm:$0xff]  }
0x118c   :  { %v2731_v6 = vld [vmem:[#allocation15] sm:$0xff] }
0x118d   :  { %2227 = vrot.lane.b32.xlu0 %v2225_v17, %s5994_s6  ;;  %v2732_v17 = vld [vmem:[#allocation15 + $0x8] sm:$0xff] }
0x118e   :  { %v2112_v21 = vpop.permute.xlu1 %2111 }
0x118f   :  { %v2114_v7 = vmul.f32 %v5702_v53, %v2112_v21  ;;  %v2736_v53 = vld [vmem:[#allocation15 + $0x20] sm:$0xff]  ;;  %v2737_v21 = vld [vmem:[#allocation15 + $0x28] sm:$0xff] }
0x1191   :  { %2116 = vrot.lane.b32.xlu1 %v2114_v7, %s5994_s6  ;;  %2238 = vrot.lane.b32.xlu0 %v6490_v48, %s5994_s6  ;;  %v5608_v7 = vld [vmem:[#allocation4 + $0x8] sm:$0xff]  }
0x1195   :  { %2127 = vrot.lane.b32.xlu1 %v6497_v52, %s5994_s6  ;;  %2234 = vrot.lane.b32.xlu0 %v2232_v8, %s6002_s0  ;;  %v6541_v8 = vpack.c.bf16 %v2732_v17, %v2731_v6 }
0x1199   :  { %2123 = vrot.lane.b32.xlu0 %v2121_v9, %s6002_s0  ;;  %v5609_v9 = vld [vmem:[#allocation4 + $0x10] sm:$0xff]  }
0x119d   :  { %2940 = vrot.lane.b32.xlu0 %v4680_v44, %s5994_s6 }
0x11ff   :  { %v2228_v11 = vpop.permute.xlu0 %2227 }
0x1200   :  { %v2230_v13 = vadd.f32 %v2228_v11, %v2028_v61  ;;  %v6545_v11 = vpack.c.bf16 %v2737_v21, %v2736_v53 }
0x1202   :  { %5703 = vtanh.f32 %v2230_v13  ;;  %v2733_v13 = vld [vmem:[#allocation15 + $0x10] sm:$0xff] }
0x1203   :  { %v2117_v22 = vpop.permute.xlu1 %2116  ;;  %v2239_v26 = vpop.permute.xlu0 %2238 }
0x1204   :  { %v2119_v14 = vadd.f32 %v2117_v22, %v2027_v63  ;;  %v2271_v63 = vld [vmem:[#allocation13 + $0x10] sm:$0xff]  ;;  %v2734_v22 = vld [vmem:[#allocation15 + $0x18] sm:$0xff] }
0x1205   :  { %v5457_v4 = vpack.c.bf16 %v2272_v0, %v2271_v63  ;;  %v6552_v18 = vpack.c.bf16 %v2734_v22, %v2733_v13 }
0x1206   :  { %5705 = vtanh.f32 %v2119_v14  ;;  %v2738_v14 = vld [vmem:[#allocation15 + $0x30] sm:$0xff] }
0x1207   :  { %v2128_v36 = vpop.permute.xlu1 %2127  ;;  %v2235_v46 = vpop.permute.xlu0 %2234  ;;  %v6556_v19 = vpack.c.bf16 %v2739_v15, %v2738_v14 }
0x1208   :  { %v2237_v49 = vmul.f32 %v2235_v46, %v2025_v47 }
0x120b   :  { %v2124_v50 = vpop.permute.xlu0 %2123 }
0x120c   :  { %v5704_v25 = vpop.eup %5703  ;;  %v2126_v56 = vmul.f32 %v2124_v50, %v2024_v55 }
0x120d   :  { %v2241_v30 = vsub.f32 %v5704_v25, %v2239_v26 }
0x120f   :  { %2243 = vrot.lane.b32.xlu1 %v2241_v30, %s5994_s6 }
0x1210   :  { %v5706_v35 = vpop.eup %5705 }
0x1211   :  { %v2130_v37 = vsub.f32 %v5706_v35, %v2128_v36 }
0x1213   :  { %2132 = vrot.lane.b32.xlu1 %v2130_v37, %s5994_s6 }
0x1217   :  { %2829 = vrot.lane.b32.xlu1 %v4678_v45, %s5994_s6 }
0x1281   :  { %v2244_v51 = vpop.permute.xlu1 %2243 }
0x1282   :  { %v2246_v54 = vmul.f32 %v2244_v51, %v2237_v49  ;;  %v6602_v51 = vpop.permute.xlu0 %2940 }
0x1284   :  { %v2247_v57 = vadd.f32 %v2246_v54, %v6490_v48  ;;  %v5604_v48 = vld [vmem:[#allocation5 + $0x8] sm:$0xff]  }
0x1285   :  { %v2133_v58 = vpop.permute.xlu1 %2132 }
0x1286   :  { %v2248_v59 = vmul.f32 %v2247_v57, %v2025_v47  ;;  %2252 = vst.msk [vmem:[#allocation19 + $0x4] sm:$0xf] %vm136_vm3, %v2247_v57  ;;  %v2135_v60 = vmul.f32 %v2133_v58, %v2126_v56 }
0x1288   :  { %2249 = vst.msk [vmem:[#allocation5] sm:$0xf] %vm136_vm3, %v2248_v59  ;;  %v2136_v61 = vadd.f32 %v2135_v60, %v6497_v52  ;;  %v5606_v52 = vld [vmem:[#allocation5 + $0x18] sm:$0xff]  }
0x1289   :  { %v6598_v47 = vpop.permute.xlu1 %2829 }
0x128a   :  { %v2137_v62 = vmul.f32 %v2136_v61, %v2024_v55  ;;  %2250 = vst.msk [vmem:[#allocation19] sm:$0xf] %vm136_vm3, %v2136_v61 }
0x128c   :  { %2139 = vst.msk [vmem:[#allocation4 + $0x1c] sm:$0xf] %vm136_vm3, %v2137_v62 }
0x128f   :  { %v5603_v10 = vld [vmem:[#allocation5] sm:$0xff]  }
0x1290   :  { %5117 = vmatprep.mubr.msk.f32.mxu0 %vm423_vm12, %v5603_v10  ;;  %5145 = vmatprep.mubr.msk.f32.mxu1 %vm423_vm12, %v5603_v10 }
0x1291   :  { %5118 = vmatmul.mubr.msk.f32.vlgmr.msra.gmra.mrb[20].mxu0 %vm423_vm12, %v5604_v48  ;;  %5146 = vmatmul.mubr.msk.f32.vlgmr.msra.gmra.mrb[20].mxu1 %vm423_vm12, %v5604_v48 }
0x1292   :  { %5120 = vmatprep.mubr.msk.f32.mxu0 %vm423_vm12, %v5605_v3  ;;  %5456 = vmatpush3.bf16.msra.mxu0 %v5453_v41 }
0x1293   :  { %5148 = vmatprep.mubr.msk.f32.mxu1 %vm423_vm12, %v5605_v3  ;;  %5472 = vmatpush3.bf16.msra.mxu1 %v5469_v43  ;;  %v5610_v16 = vld [vmem:[#allocation4 + $0x18] sm:$0xff]  }
0x1294   :  { %5458 = vmatprep.subr.bf16.mxu0 %v5457_v4  ;;  %5474 = vmatprep.subr.bf16.mxu1 %v5473_v32 }
0x1295   :  { %5121 = vmatmul.mubr.msk.f32.gmra.mrb[22].mxu0 %vm423_vm12, %v5606_v52  ;;  %5149 = vmatmul.mubr.msk.f32.gmra.mrb[22].mxu1 %vm423_vm12, %v5606_v52 }
0x1296   :  { %5460 = vmatpush3.bf16.msra.mxu0 %v5457_v4  ;;  %5131 = vmatprep.mubr.msk.f32.mxu0 %vm423_vm12, %v5607_v5 }
0x1297   :  { %5476 = vmatpush3.bf16.msra.mxu1 %v5473_v32  ;;  %5159 = vmatprep.mubr.msk.f32.mxu1 %vm423_vm12, %v5607_v5 }
0x1298   :  { %5477 = vmatprep.subr.bf16.mxu0 %v5998_v12  ;;  %5483 = vmatprep.subr.bf16.mxu1 %v5998_v12 }
0x1299   :  { %5132 = vmatmul.mubr.msk.f32.vlgmr.msra.gmra.mrb[20].mxu0 %vm423_vm12, %v5608_v7 }
0x129a   :  { %5160 = vmatmul.mubr.msk.f32.vlgmr.msra.gmra.mrb[20].mxu1 %vm423_vm12, %v5608_v7  ;;  %5134 = vmatprep.mubr.msk.f32.mxu0 %vm423_vm12, %v5609_v9 }
0x129b   :  { %5162 = vmatprep.mubr.msk.f32.mxu1 %vm423_vm12, %v5609_v9  ;;  %5479 = vmatpush3.bf16.msra.mxu0 %v6541_v8 }
0x129c   :  { %5485 = vmatpush3.bf16.msra.mxu1 %v6545_v11  ;;  %5480 = vmatprep.subr.bf16.mxu0 %v5998_v12 }
0x129d   :  { %5135 = vmatmul.mubr.msk.f32.gmra.mrb[22].mxu0 %vm423_vm12, %v5610_v16  ;;  %5486 = vmatprep.subr.bf16.mxu1 %v5998_v12 }
0x129e   :  { %5163 = vmatmul.mubr.msk.f32.gmra.mrb[22].mxu1 %vm423_vm12, %v5610_v16  ;;  %5173 = vmatprep.mubr.msk.f32.mxu0 %vm5999_vm1, %v6000_v24 }
0x129f   :  { %5482 = vmatpush3.bf16.msra.mxu0 %v6552_v18  ;;  %5184 = vmatprep.mubr.msk.f32.mxu1 %vm5999_vm1, %v6000_v24 }
0x12a0   :  { %5488 = vmatpush3.bf16.msra.mxu1 %v6556_v19  ;;  %5489 = vmatprep.subr.bf16.mxu0 %v5998_v12 }
0x12a1   :  { %5495 = vmatprep.subr.bf16.mxu1 %v5998_v12 }
0x12a2   :  { %5174 = vmatmul.mubr.f32.vlgmr.msra.gmra.mrb[24].mxu0 %v6000_v24 }
0x12a3   :  { %5185 = vmatmul.mubr.f32.vlgmr.msra.gmra.mrb[24].mxu1 %v6000_v24  ;;  %5491 = vmatpush3.bf16.msra.mxu0 %v6541_v8 }
0x12a4   :  { %5497 = vmatpush3.bf16.msra.mxu1 %v6545_v11  ;;  %5492 = vmatprep.subr.bf16.mxu0 %v5998_v12 }
0x12a5   :  { %5498 = vmatprep.subr.bf16.mxu1 %v5998_v12  ;;  %5195 = vmatprep.mubr.msk.f32.mxu0 %vm5999_vm1, %v6000_v24 }
0x12a6   :  { %5206 = vmatprep.mubr.msk.f32.mxu1 %vm5999_vm1, %v6000_v24 }
0x12a7   :  { %5494 = vmatpush3.bf16.msra.mxu0 %v6552_v18 }
0x12a8   :  { %5500 = vmatpush3.bf16.msra.mxu1 %v6556_v19  ;;  %5501 = vmatprep.subr.bf16.mxu0 %v5998_v12 }
0x12a9   :  { %5507 = vmatprep.subr.bf16.mxu1 %v5998_v12 }
0x136c   :  { %v5133_v25 = vpop.f32.mrb[20].mxu0 }
0x136d   :  { %v2496_v26 = vadd.f32 %v5133_v25, %v4665_v20  ;;  %v5161_v27 = vpop.f32.mrb[20].mxu1  ;;  %v2469_v28 = vpop.f32.mrb[21].mxu0  ;;  %v2743_v25 = vld [vmem:[#allocation6] sm:$0xf] }
0x136e   :  { %v2708_v29 = vadd.f32 %v5161_v27, %v4675_v23  ;;  %v2495_v30 = vadd.f32 %v4665_v20, %v2469_v28  ;;  %v2680_v31 = vpop.f32.mrb[21].mxu1  ;;  %v2744_v27 = vld [vmem:[#allocation6 + $0x1c] sm:$0xf] }
0x136f   :  { %v2504_v33 = vcombine.high %v2496_v26, %v2496_v26  ;;  %2513 = vst.msk [vmem:[#allocation2 + $0x8] sm:$0xf] %vm280_vm2, %v2496_v26  ;;  %v2707_v34 = vadd.f32 %v4675_v23, %v2680_v31 }
0x1370   :  { %v2716_v35 = vcombine.high %v2708_v29, %v2708_v29  ;;  %2725 = vst.msk [vmem:[#allocation3 + $0x8] sm:$0xf] %vm280_vm2, %v2708_v29  ;;  %v2503_v36 = vcombine.high %v2495_v30, %v2495_v30  ;;  %2511 = vst.msk [vmem:[#allocation2] sm:$0xf] %vm280_vm2, %v2495_v30  ;;  %v5136_v37 = vpop.f32.mrb[22].mxu0 }
0x1371   :  { %2514 = vst.msk [vmem:[#allocation2 + $0xc] sm:$0xf] %vm280_vm2, %v2504_v33  ;;  %v2715_v38 = vcombine.high %v2707_v34, %v2707_v34  ;;  %2723 = vst.msk [vmem:[#allocation3] sm:$0xf] %vm280_vm2, %v2707_v34  ;;  %v2498_v39 = vadd.f32 %v5136_v37, %v4665_v20  ;;  %v5164_v40 = vpop.f32.mrb[22].mxu1  ;;  %v2479_v41 = vpop.f32.mrb[23].mxu0 }
0x1372   :  { %2726 = vst.msk [vmem:[#allocation3 + $0xc] sm:$0xf] %vm280_vm2, %v2716_v35  ;;  %2512 = vst.msk [vmem:[#allocation2 + $0x4] sm:$0xf] %vm280_vm2, %v2503_v36  ;;  %v2710_v42 = vadd.f32 %v5164_v40, %v4675_v23  ;;  %v2497_v43 = vadd.f32 %v4665_v20, %v2479_v41  ;;  %v2690_v44 = vpop.f32.mrb[23].mxu1 }
0x1373   :  { %2724 = vst.msk [vmem:[#allocation3 + $0x4] sm:$0xf] %vm280_vm2, %v2715_v38  ;;  %v2506_v45 = vcombine.high %v2498_v39, %v2498_v39  ;;  %2517 = vst.msk [vmem:[#allocation2 + $0x18] sm:$0xf] %vm280_vm2, %v2498_v39  ;;  %v2709_v46 = vadd.f32 %v4675_v23, %v2690_v44 }
0x1374   :  { %v2718_v49 = vcombine.high %v2710_v42, %v2710_v42  ;;  %2729 = vst.msk [vmem:[#allocation3 + $0x18] sm:$0xf] %vm280_vm2, %v2710_v42  ;;  %v2505_v50 = vcombine.high %v2497_v43, %v2497_v43  ;;  %2515 = vst.msk [vmem:[#allocation2 + $0x10] sm:$0xf] %vm280_vm2, %v2497_v43 }
0x1375   :  { %2518 = vst.msk [vmem:[#allocation2 + $0x1c] sm:$0xf] %vm280_vm2, %v2506_v45  ;;  %v2717_v54 = vcombine.high %v2709_v46, %v2709_v46  ;;  %2727 = vst.msk [vmem:[#allocation3 + $0x10] sm:$0xf] %vm280_vm2, %v2709_v46  ;;  %v2813_v55 = vpop.f32.mrb[24].mxu0 }
0x1376   :  { %2730 = vst.msk [vmem:[#allocation3 + $0x1c] sm:$0xf] %vm280_vm2, %v2718_v49  ;;  %2516 = vst.msk [vmem:[#allocation2 + $0x14] sm:$0xf] %vm280_vm2, %v2505_v50  ;;  %v2924_v56 = vpop.f32.mrb[24].mxu1  ;;  %v5175_v57 = vpop.f32.mrb[25].mxu0  ;;  %v2832_v58 = vadd.f32 %v6598_v47, %v2813_v55 }
0x1377   :  { %2728 = vst.msk [vmem:[#allocation3 + $0x14] sm:$0xf] %vm280_vm2, %v2717_v54  ;;  %v5186_v59 = vpop.f32.mrb[25].mxu1  ;;  %v2943_v60 = vadd.f32 %v6602_v51, %v2924_v56  ;;  %v2745_v61 = vld [vmem:[#allocation2] sm:$0xf] }
0x1378   :  { %2834 = vrot.lane.b32.xlu1 %v2832_v58, %s5994_s6  ;;  %v2817_v63 = vadd.f32 %v2813_v55, %v2745_v61 }
0x1379   :  { %2945 = vrot.lane.b32.xlu0 %v2943_v60, %s5994_s6  ;;  %v2972_v42 = vld [vmem:[#allocation2 + $0x4] sm:$0xf] }
0x137a   :  { %v4677_v1 = vmul.f32 -1.442695, %v2817_v63 }
0x137b   :  { %v2973_v44 = vld [vmem:[#allocation3 + $0x18] sm:$0xf] }
0x137c   :  { %5707 = vpow2.f32 %v4677_v1 }
0x137d   :  { %v2746_v62 = vld [vmem:[#allocation3 + $0x1c] sm:$0xf] }
0x137e   :  { %v2928_v0 = vadd.f32 %v2924_v56, %v2746_v62 }
0x1380   :  { %v4679_v2 = vmul.f32 -1.442695, %v2928_v0 }
0x1382   :  { %5709 = vpow2.f32 %v4679_v2 }
0x1386   :  { %v5708_v10 = vpop.eup %5707 }
0x1387   :  { %v2821_v3 = vadd.f32 1.0, %v5708_v10 }
0x1389   :  { %5711 = vrcp.f32 %v2821_v3 }
0x138c   :  { %v5710_v48 = vpop.eup %5709 }
0x138d   :  { %v2932_v4 = vadd.f32 1.0, %v5710_v48 }
0x138f   :  { %5713 = vrcp.f32 %v2932_v4 }
0x1393   :  { %v5712_v32 = vpop.eup %5711 }
0x1394   :  { %v2844_v21 = vsub.f32 1.0, %v5712_v32 }
0x1399   :  { %v5714_v5 = vpop.eup %5713 }
0x139a   :  { %v2955_v7 = vsub.f32 1.0, %v5714_v5 }
0x13ea   :  { %v2835_v52 = vpop.permute.xlu1 %2834 }
0x13eb   :  { %v2837_v6 = vmul.f32 %v5712_v32, %v2835_v52  ;;  %v2946_v17 = vpop.permute.xlu0 %2945 }
0x13ec   :  { %v2948_v53 = vmul.f32 %v5714_v5, %v2946_v17 }
0x13ed   :  { %2839 = vrot.lane.b32.xlu1 %v2837_v6, %s5994_s6 }
0x13ee   :  { %2950 = vrot.lane.b32.xlu0 %v2948_v53, %s5994_s6 }
0x13f1   :  { %2846 = vrot.lane.b32.xlu1 %v2844_v21, %s6002_s0  ;;  %v2970_v21 = vld [vmem:[#allocation6 + $0x4] sm:$0xf] }
0x13f2   :  { %2957 = vrot.lane.b32.xlu0 %v2955_v7, %s6002_s0 }
0x145f   :  { %v2840_v9 = vpop.permute.xlu1 %2839 }
0x1460   :  { %v2842_v13 = vadd.f32 %v2840_v9, %v2745_v61  ;;  %v2951_v22 = vpop.permute.xlu0 %2950  ;;  %v2971_v9 = vld [vmem:[#allocation6 + $0x18] sm:$0xf] }
0x1461   :  { %v2953_v14 = vadd.f32 %v2951_v22, %v2746_v62 }
0x1462   :  { %5715 = vtanh.f32 %v2842_v13 }
0x1463   :  { %5717 = vtanh.f32 %v2953_v14  ;;  %v2847_v20 = vpop.permute.xlu1 %2846 }
0x1464   :  { %v2958_v23 = vpop.permute.xlu0 %2957  ;;  %v2849_v26 = vmul.f32 %v2847_v20, %v2743_v25 }
0x1465   :  { %v2960_v28 = vmul.f32 %v2958_v23, %v2744_v27 }
0x146c   :  { %v5716_v15 = vpop.eup %5715 }
0x146d   :  { %v5718_v16 = vpop.eup %5717  ;;  %2851 = vrot.lane.b32.xlu1 %v5716_v15, %s5994_s6 }
0x146e   :  { %2962 = vrot.lane.b32.xlu0 %v5718_v16, %s5994_s6 }
0x14df   :  { %v2852_v29 = vpop.permute.xlu1 %2851 }
0x14e0   :  { %v6619_v30 = vmul.f32 %v2852_v29, %v2849_v26  ;;  %v2963_v31 = vpop.permute.xlu0 %2962 }
0x14e1   :  { %v6621_v33 = vmul.f32 %v2963_v31, %v2960_v28 }
0x14e2   :  { %v2856_v34 = vmul.f32 %v6619_v30, %v2743_v25  ;;  %5196 = vmatmul.mubr.msk.f32.vlgmr.msra.gmra.mrb[26].mxu0 %vm423_vm12, %v6619_v30 }
0x14e3   :  { %v2967_v35 = vmul.f32 %v6621_v33, %v2744_v27  ;;  %5207 = vmatmul.mubr.msk.f32.vlgmr.msra.gmra.mrb[26].mxu1 %vm423_vm12, %v6621_v33  ;;  %5503 = vmatpush3.bf16.msra.mxu0 %v6541_v8 }
0x14e4   :  { %2857 = vst.msk [vmem:[#allocation16] sm:$0xf] %vm136_vm3, %v2856_v34  ;;  %5509 = vmatpush3.bf16.msra.mxu1 %v6545_v11  ;;  %5504 = vmatprep.subr.bf16.mxu0 %v5998_v12  ;;  %v3198_v34 = vld [vmem:[#allocation2 + $0x8] sm:$0xf] }
0x14e5   :  { %2969 = vst.msk [vmem:[#allocation17 + $0x1c] sm:$0xf] %vm136_vm3, %v2967_v35  ;;  %5510 = vmatprep.subr.bf16.mxu1 %v5998_v12  ;;  %5217 = vmatprep.mubr.msk.f32.mxu0 %vm5999_vm1, %v6000_v24 }
0x14e6   :  { %5228 = vmatprep.mubr.msk.f32.mxu1 %vm5999_vm1, %v6000_v24 }
0x14e7   :  { %5506 = vmatpush3.bf16.msra.mxu0 %v6552_v18 }
0x14e8   :  { %5512 = vmatpush3.bf16.msra.mxu1 %v6556_v19  ;;  %5513 = vmatprep.subr.bf16.mxu0 %v5998_v12 }
0x14e9   :  { %5519 = vmatprep.subr.bf16.mxu1 %v5998_v12 }
0x15b5   :  { %v3043_v36 = vpop.f32.mrb[26].mxu0 }
0x15b6   :  { %v3154_v37 = vpop.f32.mrb[26].mxu1  ;;  %v5197_v38 = vpop.f32.mrb[27].mxu0  ;;  %v3054_v39 = vadd.f32 %v3043_v36, %v6598_v47  ;;  %v3047_v43 = vadd.f32 %v3043_v36, %v2972_v42  ;;  %v3199_v36 = vld [vmem:[#allocation3 + $0x14] sm:$0xf] }
0x15b7   :  { %v5208_v40 = vpop.f32.mrb[27].mxu1  ;;  %v3165_v41 = vadd.f32 %v3154_v37, %v6602_v51  ;;  %v3158_v45 = vadd.f32 %v3154_v37, %v2973_v44 }
0x15b8   :  { %3056 = vrot.lane.b32.xlu1 %v3054_v39, %s5994_s6  ;;  %v4682_v46 = vmul.f32 -1.442695, %v3047_v43 }
0x15b9   :  { %3167 = vrot.lane.b32.xlu0 %v3165_v41, %s5994_s6  ;;  %v4684_v49 = vmul.f32 -1.442695, %v3158_v45 }
0x15ba   :  { %5719 = vpow2.f32 %v4682_v46 }
0x15bb   :  { %5721 = vpow2.f32 %v4684_v49 }
0x15c4   :  { %v5720_v50 = vpop.eup %5719 }
0x15c5   :  { %v5722_v54 = vpop.eup %5721  ;;  %v3051_v55 = vadd.f32 1.0, %v5720_v50 }
0x15c6   :  { %v3162_v56 = vadd.f32 1.0, %v5722_v54 }
0x15c7   :  { %5723 = vrcp.f32 %v3051_v55 }
0x15c8   :  { %5725 = vrcp.f32 %v3162_v56 }
0x15d1   :  { %v5724_v57 = vpop.eup %5723 }
0x15d2   :  { %v5726_v59 = vpop.eup %5725  ;;  %v3066_v63 = vsub.f32 1.0, %v5724_v57 }
0x15d3   :  { %v3177_v0 = vsub.f32 1.0, %v5726_v59 }
0x162a   :  { %v3057_v58 = vpop.permute.xlu1 %3056 }
0x162b   :  { %v3059_v60 = vmul.f32 %v5724_v57, %v3057_v58  ;;  %v3168_v61 = vpop.permute.xlu0 %3167 }
0x162c   :  { %v3170_v62 = vmul.f32 %v5726_v59, %v3168_v61 }
0x162d   :  { %3061 = vrot.lane.b32.xlu1 %v3059_v60, %s5994_s6 }
0x162e   :  { %3172 = vrot.lane.b32.xlu0 %v3170_v62, %s5994_s6 }
0x1631   :  { %3072 = vrot.lane.b32.xlu1 %v6619_v30, %s5994_s6 }
0x1632   :  { %3183 = vrot.lane.b32.xlu0 %v6621_v33, %s5994_s6 }
0x1635   :  { %3068 = vrot.lane.b32.xlu1 %v3066_v63, %s6002_s0 }
0x1636   :  { %3179 = vrot.lane.b32.xlu0 %v3177_v0, %s6002_s0 }
0x169f   :  { %v3062_v1 = vpop.permute.xlu1 %3061 }
0x16a0   :  { %v3064_v2 = vadd.f32 %v3062_v1, %v2972_v42  ;;  %v3173_v10 = vpop.permute.xlu0 %3172 }
0x16a1   :  { %v3175_v48 = vadd.f32 %v3173_v10, %v2973_v44 }
0x16a2   :  { %5727 = vtanh.f32 %v3064_v2 }
0x16a3   :  { %5729 = vtanh.f32 %v3175_v48  ;;  %v3073_v4 = vpop.permute.xlu1 %3072 }
0x16a4   :  { %v3184_v5 = vpop.permute.xlu0 %3183 }
0x16a7   :  { %v3069_v17 = vpop.permute.xlu1 %3068 }
0x16a8   :  { %v3180_v53 = vpop.permute.xlu0 %3179  ;;  %v3071_v7 = vmul.f32 %v3069_v17, %v2970_v21 }
0x16a9   :  { %v3182_v13 = vmul.f32 %v3180_v53, %v2971_v9 }
0x16ac   :  { %v5728_v3 = vpop.eup %5727 }
0x16ad   :  { %v5730_v32 = vpop.eup %5729  ;;  %v3075_v52 = vsub.f32 %v5728_v3, %v3073_v4  ;;  %v3196_v3 = vld [vmem:[#allocation6 + $0x8] sm:$0xf] }
0x16ae   :  { %v3186_v6 = vsub.f32 %v5730_v32, %v3184_v5  ;;  %v3197_v32 = vld [vmem:[#allocation6 + $0x14] sm:$0xf] }
0x16af   :  { %3077 = vrot.lane.b32.xlu1 %v3075_v52, %s5994_s6 }
0x16b0   :  { %3188 = vrot.lane.b32.xlu0 %v3186_v6, %s5994_s6 }
0x1721   :  { %v3078_v22 = vpop.permute.xlu1 %3077 }
0x1722   :  { %v3080_v14 = vmul.f32 %v3078_v22, %v3071_v7  ;;  %v3189_v15 = vpop.permute.xlu0 %3188 }
0x1723   :  { %v3191_v16 = vmul.f32 %v3189_v15, %v3182_v13 }
0x1724   :  { %v6658_v20 = vadd.f32 %v3080_v14, %v6619_v30 }
0x1725   :  { %v6661_v23 = vadd.f32 %v3191_v16, %v6621_v33 }
0x1726   :  { %v3082_v25 = vmul.f32 %v6658_v20, %v2970_v21  ;;  %5218 = vmatmul.mubr.msk.f32.vlgmr.msra.gmra.mrb[28].mxu0 %vm423_vm12, %v6658_v20 }
0x1727   :  { %v3193_v26 = vmul.f32 %v6661_v23, %v2971_v9  ;;  %5229 = vmatmul.mubr.msk.f32.vlgmr.msra.gmra.mrb[28].mxu1 %vm423_vm12, %v6661_v23  ;;  %5515 = vmatpush3.bf16.msra.mxu0 %v6541_v8 }
0x1728   :  { %3084 = vst.msk [vmem:[#allocation16 + $0x4] sm:$0xf] %vm136_vm3, %v3082_v25  ;;  %5521 = vmatpush3.bf16.msra.mxu1 %v6545_v11  ;;  %5516 = vmatprep.subr.bf16.mxu0 %v5998_v12  ;;  %v3424_v25 = vld [vmem:[#allocation2 + $0xc] sm:$0xf] }
0x1729   :  { %3195 = vst.msk [vmem:[#allocation17 + $0x18] sm:$0xf] %vm136_vm3, %v3193_v26  ;;  %5522 = vmatprep.subr.bf16.mxu1 %v5998_v12  ;;  %5239 = vmatprep.mubr.msk.f32.mxu0 %vm5999_vm1, %v6000_v24 }
0x172a   :  { %5250 = vmatprep.mubr.msk.f32.mxu1 %vm5999_vm1, %v6000_v24 }
0x172b   :  { %5518 = vmatpush3.bf16.msra.mxu0 %v6552_v18 }
0x172c   :  { %5524 = vmatpush3.bf16.msra.mxu1 %v6556_v19  ;;  %5525 = vmatprep.subr.bf16.mxu0 %v5998_v12 }
0x172d   :  { %5531 = vmatprep.subr.bf16.mxu1 %v5998_v12 }
0x17f9   :  { %v3269_v27 = vpop.f32.mrb[28].mxu0 }
0x17fa   :  { %v3280_v28 = vadd.f32 %v3269_v27, %v6598_v47  ;;  %v3380_v29 = vpop.f32.mrb[28].mxu1  ;;  %v5219_v30 = vpop.f32.mrb[29].mxu0  ;;  %v3273_v35 = vadd.f32 %v3269_v27, %v3198_v34  ;;  %v3425_v27 = vld [vmem:[#allocation3 + $0x10] sm:$0xf] }
0x17fb   :  { %v3391_v31 = vadd.f32 %v3380_v29, %v6602_v51  ;;  %v5230_v33 = vpop.f32.mrb[29].mxu1  ;;  %v3384_v37 = vadd.f32 %v3380_v29, %v3199_v36 }
0x17fc   :  { %3282 = vrot.lane.b32.xlu1 %v3280_v28, %s5994_s6  ;;  %v4686_v38 = vmul.f32 -1.442695, %v3273_v35 }
0x17fd   :  { %3393 = vrot.lane.b32.xlu0 %v3391_v31, %s5994_s6  ;;  %v4688_v39 = vmul.f32 -1.442695, %v3384_v37 }
0x17fe   :  { %5731 = vpow2.f32 %v4686_v38 }
0x17ff   :  { %5733 = vpow2.f32 %v4688_v39 }
0x1808   :  { %v5732_v40 = vpop.eup %5731 }
0x1809   :  { %v5734_v41 = vpop.eup %5733  ;;  %v3277_v42 = vadd.f32 1.0, %v5732_v40 }
0x180a   :  { %v3388_v43 = vadd.f32 1.0, %v5734_v41 }
0x180b   :  { %5735 = vrcp.f32 %v3277_v42 }
0x180c   :  { %5737 = vrcp.f32 %v3388_v43 }
0x1815   :  { %v5736_v44 = vpop.eup %5735 }
0x1816   :  { %v5738_v46 = vpop.eup %5737  ;;  %v3292_v55 = vsub.f32 1.0, %v5736_v44 }
0x1817   :  { %v3403_v56 = vsub.f32 1.0, %v5738_v46 }
0x186e   :  { %v3283_v45 = vpop.permute.xlu1 %3282 }
0x186f   :  { %v3285_v49 = vmul.f32 %v5736_v44, %v3283_v45  ;;  %v3394_v50 = vpop.permute.xlu0 %3393 }
0x1870   :  { %v3396_v54 = vmul.f32 %v5738_v46, %v3394_v50 }
0x1871   :  { %3287 = vrot.lane.b32.xlu1 %v3285_v49, %s5994_s6 }
0x1872   :  { %3398 = vrot.lane.b32.xlu0 %v3396_v54, %s5994_s6 }
0x1875   :  { %3298 = vrot.lane.b32.xlu1 %v6658_v20, %s5994_s6 }
0x1876   :  { %3409 = vrot.lane.b32.xlu0 %v6661_v23, %s5994_s6 }
0x1879   :  { %3294 = vrot.lane.b32.xlu1 %v3292_v55, %s6002_s0 }
0x187a   :  { %3405 = vrot.lane.b32.xlu0 %v3403_v56, %s6002_s0 }
0x18e3   :  { %v3288_v57 = vpop.permute.xlu1 %3287 }
0x18e4   :  { %v3290_v58 = vadd.f32 %v3288_v57, %v3198_v34  ;;  %v3399_v59 = vpop.permute.xlu0 %3398 }
0x18e5   :  { %v3401_v60 = vadd.f32 %v3399_v59, %v3199_v36 }
0x18e6   :  { %5739 = vtanh.f32 %v3290_v58 }
0x18e7   :  { %5741 = vtanh.f32 %v3401_v60  ;;  %v3299_v62 = vpop.permute.xlu1 %3298 }
0x18e8   :  { %v3410_v1 = vpop.permute.xlu0 %3409 }
0x18eb   :  { %v3295_v10 = vpop.permute.xlu1 %3294 }
0x18ec   :  { %v3406_v48 = vpop.permute.xlu0 %3405  ;;  %v3297_v4 = vmul.f32 %v3295_v10, %v3196_v3 }
0x18ed   :  { %v3408_v52 = vmul.f32 %v3406_v48, %v3197_v32 }
0x18f0   :  { %v5740_v61 = vpop.eup %5739 }
0x18f1   :  { %v5742_v63 = vpop.eup %5741  ;;  %v3301_v0 = vsub.f32 %v5740_v61, %v3299_v62  ;;  %v3422_v61 = vld [vmem:[#allocation6 + $0xc] sm:$0xf] }
0x18f2   :  { %v3412_v2 = vsub.f32 %v5742_v63, %v3410_v1  ;;  %v3423_v63 = vld [vmem:[#allocation6 + $0x10] sm:$0xf] }
0x18f3   :  { %3303 = vrot.lane.b32.xlu1 %v3301_v0, %s5994_s6 }
0x18f4   :  { %3414 = vrot.lane.b32.xlu0 %v3412_v2, %s5994_s6 }
0x1965   :  { %v3304_v5 = vpop.permute.xlu1 %3303 }
0x1966   :  { %v3306_v6 = vmul.f32 %v3304_v5, %v3297_v4  ;;  %v3415_v17 = vpop.permute.xlu0 %3414 }
0x1967   :  { %v3417_v53 = vmul.f32 %v3415_v17, %v3408_v52 }
0x1968   :  { %v6698_v21 = vadd.f32 %v3306_v6, %v6658_v20 }
0x1969   :  { %v6701_v7 = vadd.f32 %v3417_v53, %v6661_v23 }
0x196a   :  { %v3308_v9 = vmul.f32 %v6698_v21, %v3196_v3  ;;  %5240 = vmatmul.mubr.msk.f32.vlgmr.msra.gmra.mrb[30].mxu0 %vm423_vm12, %v6698_v21 }
0x196b   :  { %v3419_v13 = vmul.f32 %v6701_v7, %v3197_v32  ;;  %5251 = vmatmul.mubr.msk.f32.vlgmr.msra.gmra.mrb[30].mxu1 %vm423_vm12, %v6701_v7  ;;  %5527 = vmatpush3.bf16.msra.mxu0 %v6541_v8 }
0x196c   :  { %3310 = vst.msk [vmem:[#allocation16 + $0x8] sm:$0xf] %vm136_vm3, %v3308_v9  ;;  %5533 = vmatpush3.bf16.msra.mxu1 %v6545_v11  ;;  %5528 = vmatprep.subr.bf16.mxu0 %v5998_v12  ;;  %v3650_v9 = vld [vmem:[#allocation2 + $0x10] sm:$0xf] }
0x196d   :  { %3421 = vst.msk [vmem:[#allocation17 + $0x14] sm:$0xf] %vm136_vm3, %v3419_v13  ;;  %5534 = vmatprep.subr.bf16.mxu1 %v5998_v12  ;;  %5261 = vmatprep.mubr.msk.f32.mxu0 %vm5999_vm1, %v6000_v24 }
0x196e   :  { %5272 = vmatprep.mubr.msk.f32.mxu1 %vm5999_vm1, %v6000_v24 }
0x196f   :  { %5530 = vmatpush3.bf16.msra.mxu0 %v6552_v18 }
0x1970   :  { %5536 = vmatpush3.bf16.msra.mxu1 %v6556_v19  ;;  %5537 = vmatprep.subr.bf16.mxu0 %v5998_v12 }
0x1971   :  { %5543 = vmatprep.subr.bf16.mxu1 %v5998_v12 }
0x1a3d   :  { %v3495_v22 = vpop.f32.mrb[30].mxu0 }
0x1a3e   :  { %v3506_v14 = vadd.f32 %v3495_v22, %v6598_v47  ;;  %v3606_v15 = vpop.f32.mrb[30].mxu1  ;;  %v5241_v16 = vpop.f32.mrb[31].mxu0  ;;  %v3499_v26 = vadd.f32 %v3495_v22, %v3424_v25  ;;  %v3651_v22 = vld [vmem:[#allocation3 + $0xc] sm:$0xf] }
0x1a3f   :  { %v3617_v20 = vadd.f32 %v3606_v15, %v6602_v51  ;;  %v5252_v23 = vpop.f32.mrb[31].mxu1  ;;  %v3610_v28 = vadd.f32 %v3606_v15, %v3425_v27 }
0x1a40   :  { %3508 = vrot.lane.b32.xlu1 %v3506_v14, %s5994_s6  ;;  %v4690_v29 = vmul.f32 -1.442695, %v3499_v26 }
0x1a41   :  { %3619 = vrot.lane.b32.xlu0 %v3617_v20, %s5994_s6  ;;  %v4692_v30 = vmul.f32 -1.442695, %v3610_v28 }
0x1a42   :  { %5743 = vpow2.f32 %v4690_v29 }
0x1a43   :  { %5745 = vpow2.f32 %v4692_v30 }
0x1a4c   :  { %v5744_v31 = vpop.eup %5743 }
0x1a4d   :  { %v5746_v33 = vpop.eup %5745  ;;  %v3503_v34 = vadd.f32 1.0, %v5744_v31 }
0x1a4e   :  { %v3614_v35 = vadd.f32 1.0, %v5746_v33 }
0x1a4f   :  { %5747 = vrcp.f32 %v3503_v34 }
0x1a50   :  { %5749 = vrcp.f32 %v3614_v35 }
0x1a59   :  { %v5748_v36 = vpop.eup %5747 }
0x1a5a   :  { %v5750_v38 = vpop.eup %5749  ;;  %v3518_v42 = vsub.f32 1.0, %v5748_v36 }
0x1a5b   :  { %v3629_v43 = vsub.f32 1.0, %v5750_v38 }
0x1ab2   :  { %v3509_v37 = vpop.permute.xlu1 %3508 }
0x1ab3   :  { %v3511_v39 = vmul.f32 %v5748_v36, %v3509_v37  ;;  %v3620_v40 = vpop.permute.xlu0 %3619 }
0x1ab4   :  { %v3622_v41 = vmul.f32 %v5750_v38, %v3620_v40 }
0x1ab5   :  { %3513 = vrot.lane.b32.xlu1 %v3511_v39, %s5994_s6 }
0x1ab6   :  { %3624 = vrot.lane.b32.xlu0 %v3622_v41, %s5994_s6 }
0x1ab9   :  { %3524 = vrot.lane.b32.xlu1 %v6698_v21, %s5994_s6 }
0x1aba   :  { %3635 = vrot.lane.b32.xlu0 %v6701_v7, %s5994_s6 }
0x1abd   :  { %3520 = vrot.lane.b32.xlu1 %v3518_v42, %s6002_s0 }
0x1abe   :  { %3631 = vrot.lane.b32.xlu0 %v3629_v43, %s6002_s0 }
0x1b27   :  { %v3514_v44 = vpop.permute.xlu1 %3513 }
0x1b28   :  { %v3516_v45 = vadd.f32 %v3514_v44, %v3424_v25  ;;  %v3625_v46 = vpop.permute.xlu0 %3624 }
0x1b29   :  { %v3627_v49 = vadd.f32 %v3625_v46, %v3425_v27 }
0x1b2a   :  { %5751 = vtanh.f32 %v3516_v45 }
0x1b2b   :  { %5753 = vtanh.f32 %v3627_v49  ;;  %v3525_v54 = vpop.permute.xlu1 %3524 }
0x1b2c   :  { %v3636_v57 = vpop.permute.xlu0 %3635 }
0x1b2f   :  { %v3521_v59 = vpop.permute.xlu1 %3520 }
0x1b30   :  { %v3632_v60 = vpop.permute.xlu0 %3631  ;;  %v3523_v62 = vmul.f32 %v3521_v59, %v3422_v61 }
0x1b31   :  { %v3634_v0 = vmul.f32 %v3632_v60, %v3423_v63 }
0x1b34   :  { %v5752_v50 = vpop.eup %5751 }
0x1b35   :  { %v5754_v55 = vpop.eup %5753  ;;  %v3527_v56 = vsub.f32 %v5752_v50, %v3525_v54  ;;  %v3648_v50 = vld [vmem:[#allocation6 + $0x10] sm:$0xf] }
0x1b36   :  { %v3638_v58 = vsub.f32 %v5754_v55, %v3636_v57  ;;  %v3649_v55 = vld [vmem:[#allocation6 + $0xc] sm:$0xf] }
0x1b37   :  { %3529 = vrot.lane.b32.xlu1 %v3527_v56, %s5994_s6 }
0x1b38   :  { %3640 = vrot.lane.b32.xlu0 %v3638_v58, %s5994_s6 }
0x1ba9   :  { %v3530_v1 = vpop.permute.xlu1 %3529 }
0x1baa   :  { %v3532_v2 = vmul.f32 %v3530_v1, %v3523_v62  ;;  %v3641_v10 = vpop.permute.xlu0 %3640 }
0x1bab   :  { %v3643_v48 = vmul.f32 %v3641_v10, %v3634_v0 }
0x1bac   :  { %v6738_v3 = vadd.f32 %v3532_v2, %v6698_v21 }
0x1bad   :  { %v6741_v4 = vadd.f32 %v3643_v48, %v6701_v7 }
0x1bae   :  { %v3534_v32 = vmul.f32 %v6738_v3, %v3422_v61  ;;  %5262 = vmatmul.mubr.msk.f32.vlgmr.msra.gmra.mrb[32].mxu0 %vm423_vm12, %v6738_v3 }
0x1baf   :  { %v3645_v52 = vmul.f32 %v6741_v4, %v3423_v63  ;;  %5273 = vmatmul.mubr.msk.f32.vlgmr.msra.gmra.mrb[32].mxu1 %vm423_vm12, %v6741_v4  ;;  %5539 = vmatpush3.bf16.msra.mxu0 %v6541_v8 }
0x1bb0   :  { %3536 = vst.msk [vmem:[#allocation16 + $0xc] sm:$0xf] %vm136_vm3, %v3534_v32  ;;  %5545 = vmatpush3.bf16.msra.mxu1 %v6545_v11  ;;  %5540 = vmatprep.subr.bf16.mxu0 %v5998_v12  ;;  %v3876_v32 = vld [vmem:[#allocation2 + $0x14] sm:$0xf] }
0x1bb1   :  { %3647 = vst.msk [vmem:[#allocation17 + $0x10] sm:$0xf] %vm136_vm3, %v3645_v52  ;;  %5546 = vmatprep.subr.bf16.mxu1 %v5998_v12  ;;  %5283 = vmatprep.mubr.msk.f32.mxu0 %vm5999_vm1, %v6000_v24 }
0x1bb2   :  { %5294 = vmatprep.mubr.msk.f32.mxu1 %vm5999_vm1, %v6000_v24 }
0x1bb3   :  { %5542 = vmatpush3.bf16.msra.mxu0 %v6552_v18 }
0x1bb4   :  { %5548 = vmatpush3.bf16.msra.mxu1 %v6556_v19  ;;  %5549 = vmatprep.subr.bf16.mxu0 %v5998_v12 }
0x1bb5   :  { %5555 = vmatprep.subr.bf16.mxu1 %v5998_v12 }
0x1c81   :  { %v3721_v5 = vpop.f32.mrb[32].mxu0 }
0x1c82   :  { %v3732_v6 = vadd.f32 %v3721_v5, %v6598_v47  ;;  %v3832_v17 = vpop.f32.mrb[32].mxu1  ;;  %v5263_v53 = vpop.f32.mrb[33].mxu0  ;;  %v3725_v13 = vadd.f32 %v3721_v5, %v3650_v9  ;;  %v3877_v5 = vld [vmem:[#allocation3 + $0x8] sm:$0xf] }
0x1c83   :  { %v3843_v21 = vadd.f32 %v3832_v17, %v6602_v51  ;;  %v5274_v7 = vpop.f32.mrb[33].mxu1  ;;  %v3836_v14 = vadd.f32 %v3832_v17, %v3651_v22 }
0x1c84   :  { %3734 = vrot.lane.b32.xlu1 %v3732_v6, %s5994_s6  ;;  %v4694_v15 = vmul.f32 -1.442695, %v3725_v13 }
0x1c85   :  { %3845 = vrot.lane.b32.xlu0 %v3843_v21, %s5994_s6  ;;  %v4696_v16 = vmul.f32 -1.442695, %v3836_v14 }
0x1c86   :  { %5755 = vpow2.f32 %v4694_v15 }
0x1c87   :  { %5757 = vpow2.f32 %v4696_v16 }
0x1c90   :  { %v5756_v20 = vpop.eup %5755 }
0x1c91   :  { %v5758_v23 = vpop.eup %5757  ;;  %v3729_v25 = vadd.f32 1.0, %v5756_v20 }
0x1c92   :  { %v3840_v26 = vadd.f32 1.0, %v5758_v23 }
0x1c93   :  { %5759 = vrcp.f32 %v3729_v25 }
0x1c94   :  { %5761 = vrcp.f32 %v3840_v26 }
0x1c9d   :  { %v5760_v27 = vpop.eup %5759 }
0x1c9e   :  { %v5762_v29 = vpop.eup %5761  ;;  %v3744_v34 = vsub.f32 1.0, %v5760_v27 }
0x1c9f   :  { %v3855_v35 = vsub.f32 1.0, %v5762_v29 }
0x1cf6   :  { %v3735_v28 = vpop.permute.xlu1 %3734 }
0x1cf7   :  { %v3737_v30 = vmul.f32 %v5760_v27, %v3735_v28  ;;  %v3846_v31 = vpop.permute.xlu0 %3845 }
0x1cf8   :  { %v3848_v33 = vmul.f32 %v5762_v29, %v3846_v31 }
0x1cf9   :  { %3739 = vrot.lane.b32.xlu1 %v3737_v30, %s5994_s6 }
0x1cfa   :  { %3850 = vrot.lane.b32.xlu0 %v3848_v33, %s5994_s6 }
0x1cfd   :  { %3750 = vrot.lane.b32.xlu1 %v6738_v3, %s5994_s6 }
0x1cfe   :  { %3861 = vrot.lane.b32.xlu0 %v6741_v4, %s5994_s6 }
0x1d01   :  { %3746 = vrot.lane.b32.xlu1 %v3744_v34, %s6002_s0 }
0x1d02   :  { %3857 = vrot.lane.b32.xlu0 %v3855_v35, %s6002_s0 }
0x1d6b   :  { %v3740_v36 = vpop.permute.xlu1 %3739 }
0x1d6c   :  { %v3742_v37 = vadd.f32 %v3740_v36, %v3650_v9  ;;  %v3851_v38 = vpop.permute.xlu0 %3850 }
0x1d6d   :  { %v3853_v39 = vadd.f32 %v3851_v38, %v3651_v22 }
0x1d6e   :  { %5763 = vtanh.f32 %v3742_v37 }
0x1d6f   :  { %5765 = vtanh.f32 %v3853_v39  ;;  %v3751_v41 = vpop.permute.xlu1 %3750 }
0x1d70   :  { %v3862_v44 = vpop.permute.xlu0 %3861 }
0x1d73   :  { %v3747_v46 = vpop.permute.xlu1 %3746 }
0x1d74   :  { %v3858_v49 = vpop.permute.xlu0 %3857  ;;  %v3749_v54 = vmul.f32 %v3747_v46, %v3648_v50 }
0x1d75   :  { %v3860_v56 = vmul.f32 %v3858_v49, %v3649_v55 }
0x1d78   :  { %v5764_v40 = vpop.eup %5763 }
0x1d79   :  { %v5766_v42 = vpop.eup %5765  ;;  %v3753_v43 = vsub.f32 %v5764_v40, %v3751_v41  ;;  %v3874_v40 = vld [vmem:[#allocation6 + $0x14] sm:$0xf] }
0x1d7a   :  { %v3864_v45 = vsub.f32 %v5766_v42, %v3862_v44  ;;  %v3875_v42 = vld [vmem:[#allocation6 + $0x8] sm:$0xf] }
0x1d7b   :  { %3755 = vrot.lane.b32.xlu1 %v3753_v43, %s5994_s6 }
0x1d7c   :  { %3866 = vrot.lane.b32.xlu0 %v3864_v45, %s5994_s6 }
0x1ded   :  { %v3756_v57 = vpop.permute.xlu1 %3755 }
0x1dee   :  { %v3758_v58 = vmul.f32 %v3756_v57, %v3749_v54  ;;  %v3867_v59 = vpop.permute.xlu0 %3866 }
0x1def   :  { %v3869_v60 = vmul.f32 %v3867_v59, %v3860_v56 }
0x1df0   :  { %v6778_v61 = vadd.f32 %v3758_v58, %v6738_v3 }
0x1df1   :  { %v6781_v62 = vadd.f32 %v3869_v60, %v6741_v4 }
0x1df2   :  { %v3760_v63 = vmul.f32 %v6778_v61, %v3648_v50  ;;  %5284 = vmatmul.mubr.msk.f32.vlgmr.msra.gmra.mrb[34].mxu0 %vm423_vm12, %v6778_v61 }
0x1df3   :  { %v3871_v0 = vmul.f32 %v6781_v62, %v3649_v55  ;;  %5295 = vmatmul.mubr.msk.f32.vlgmr.msra.gmra.mrb[34].mxu1 %vm423_vm12, %v6781_v62  ;;  %5551 = vmatpush3.bf16.msra.mxu0 %v6541_v8 }
0x1df4   :  { %3762 = vst.msk [vmem:[#allocation16 + $0x10] sm:$0xf] %vm136_vm3, %v3760_v63  ;;  %5557 = vmatpush3.bf16.msra.mxu1 %v6545_v11  ;;  %5552 = vmatprep.subr.bf16.mxu0 %v5998_v12 }
0x1df5   :  { %3873 = vst.msk [vmem:[#allocation17 + $0xc] sm:$0xf] %vm136_vm3, %v3871_v0  ;;  %5558 = vmatprep.subr.bf16.mxu1 %v5998_v12  ;;  %5305 = vmatprep.mubr.msk.f32.mxu0 %vm5999_vm1, %v6000_v24 }
0x1df6   :  { %5316 = vmatprep.mubr.msk.f32.mxu1 %vm5999_vm1, %v6000_v24 }
0x1df7   :  { %5554 = vmatpush3.bf16.msra.mxu0 %v6552_v18 }
0x1df8   :  { %5560 = vmatpush3.bf16.msra.mxu1 %v6556_v19  ;;  %5561 = vmatprep.subr.bf16.mxu0 %v5998_v12 }
0x1df9   :  { %5567 = vmatprep.subr.bf16.mxu1 %v5998_v12 }
0x1ec5   :  { %v3947_v1 = vpop.f32.mrb[34].mxu0 }
0x1ec6   :  { %v3958_v2 = vadd.f32 %v3947_v1, %v6598_v47  ;;  %v4058_v10 = vpop.f32.mrb[34].mxu1  ;;  %v5285_v48 = vpop.f32.mrb[35].mxu0  ;;  %v3951_v52 = vadd.f32 %v3947_v1, %v3876_v32 }
0x1ec7   :  { %v4069_v3 = vadd.f32 %v4058_v10, %v6602_v51  ;;  %v5296_v4 = vpop.f32.mrb[35].mxu1  ;;  %v4062_v6 = vadd.f32 %v4058_v10, %v3877_v5 }
0x1ec8   :  { %3960 = vrot.lane.b32.xlu1 %v3958_v2, %s5994_s6  ;;  %v4698_v17 = vmul.f32 -1.442695, %v3951_v52 }
0x1ec9   :  { %4071 = vrot.lane.b32.xlu0 %v4069_v3, %s5994_s6  ;;  %v4700_v53 = vmul.f32 -1.442695, %v4062_v6 }
0x1eca   :  { %5767 = vpow2.f32 %v4698_v17 }
0x1ecb   :  { %5769 = vpow2.f32 %v4700_v53 }
0x1ed4   :  { %v5768_v21 = vpop.eup %5767 }
0x1ed5   :  { %v5770_v7 = vpop.eup %5769  ;;  %v3955_v9 = vadd.f32 1.0, %v5768_v21 }
0x1ed6   :  { %v4066_v13 = vadd.f32 1.0, %v5770_v7 }
0x1ed7   :  { %5771 = vrcp.f32 %v3955_v9 }
0x1ed8   :  { %5773 = vrcp.f32 %v4066_v13 }
0x1ee1   :  { %v5772_v22 = vpop.eup %5771 }
0x1ee2   :  { %v5774_v15 = vpop.eup %5773  ;;  %v3970_v25 = vsub.f32 1.0, %v5772_v22 }
0x1ee3   :  { %v4081_v26 = vsub.f32 1.0, %v5774_v15 }
0x1f3a   :  { %v3961_v14 = vpop.permute.xlu1 %3960 }
0x1f3b   :  { %v3963_v16 = vmul.f32 %v5772_v22, %v3961_v14  ;;  %v4072_v20 = vpop.permute.xlu0 %4071 }
0x1f3c   :  { %v4074_v23 = vmul.f32 %v5774_v15, %v4072_v20 }
0x1f3d   :  { %3965 = vrot.lane.b32.xlu1 %v3963_v16, %s5994_s6 }
0x1f3e   :  { %4076 = vrot.lane.b32.xlu0 %v4074_v23, %s5994_s6 }
0x1f41   :  { %3976 = vrot.lane.b32.xlu1 %v6778_v61, %s5994_s6 }
0x1f42   :  { %4087 = vrot.lane.b32.xlu0 %v6781_v62, %s5994_s6 }
0x1f45   :  { %3972 = vrot.lane.b32.xlu1 %v3970_v25, %s6002_s0  ;;  %v4100_v25 = vld [vmem:[#allocation6 + $0x18] sm:$0xf] }
0x1f46   :  { %4083 = vrot.lane.b32.xlu0 %v4081_v26, %s6002_s0 }
0x1faf   :  { %v3966_v27 = vpop.permute.xlu1 %3965 }
0x1fb0   :  { %v3968_v28 = vadd.f32 %v3966_v27, %v3876_v32  ;;  %v4077_v29 = vpop.permute.xlu0 %4076  ;;  %v4101_v27 = vld [vmem:[#allocation6 + $0x4] sm:$0xf] }
0x1fb1   :  { %v4079_v30 = vadd.f32 %v4077_v29, %v3877_v5 }
0x1fb2   :  { %5775 = vtanh.f32 %v3968_v28 }
0x1fb3   :  { %5777 = vtanh.f32 %v4079_v30  ;;  %v3977_v33 = vpop.permute.xlu1 %3976 }
0x1fb4   :  { %v4088_v36 = vpop.permute.xlu0 %4087 }
0x1fb7   :  { %v3973_v38 = vpop.permute.xlu1 %3972 }
0x1fb8   :  { %v4084_v39 = vpop.permute.xlu0 %4083  ;;  %v3975_v41 = vmul.f32 %v3973_v38, %v3874_v40 }
0x1fb9   :  { %v4086_v43 = vmul.f32 %v4084_v39, %v3875_v42 }
0x1fbc   :  { %v5776_v31 = vpop.eup %5775 }
0x1fbd   :  { %v5778_v34 = vpop.eup %5777  ;;  %v3979_v35 = vsub.f32 %v5776_v31, %v3977_v33 }
0x1fbe   :  { %v4090_v37 = vsub.f32 %v5778_v34, %v4088_v36 }
0x1fbf   :  { %3981 = vrot.lane.b32.xlu1 %v3979_v35, %s5994_s6 }
0x1fc0   :  { %4092 = vrot.lane.b32.xlu0 %v4090_v37, %s5994_s6 }
0x2031   :  { %v3982_v44 = vpop.permute.xlu1 %3981 }
0x2032   :  { %v3984_v45 = vmul.f32 %v3982_v44, %v3975_v41  ;;  %v4093_v46 = vpop.permute.xlu0 %4092  ;;  %v4328_v44 = vld [vmem:[#allocation2 + $0x1c] sm:$0xf] }
0x2033   :  { %v4095_v49 = vmul.f32 %v4093_v46, %v4086_v43  ;;  %v4329_v46 = vld [vmem:[#allocation3] sm:$0xf] }
0x2034   :  { %v6818_v50 = vadd.f32 %v3984_v45, %v6778_v61 }
0x2035   :  { %v6821_v54 = vadd.f32 %v4095_v49, %v6781_v62  ;;  %v4103_v62 = vld [vmem:[#allocation3 + $0x4] sm:$0xf] }
0x2036   :  { %v3986_v55 = vmul.f32 %v6818_v50, %v3874_v40  ;;  %5306 = vmatmul.mubr.msk.f32.vlgmr.msra.gmra.mrb[36].mxu0 %vm423_vm12, %v6818_v50 }
0x2037   :  { %v4097_v56 = vmul.f32 %v6821_v54, %v3875_v42  ;;  %5317 = vmatmul.mubr.msk.f32.vlgmr.msra.gmra.mrb[36].mxu1 %vm423_vm12, %v6821_v54  ;;  %5563 = vmatpush3.bf16.msra.mxu0 %v6541_v8 }
0x2038   :  { %3988 = vst.msk [vmem:[#allocation16 + $0x14] sm:$0xf] %vm136_vm3, %v3986_v55  ;;  %5569 = vmatpush3.bf16.msra.mxu1 %v6545_v11  ;;  %5564 = vmatprep.subr.bf16.mxu0 %v5998_v12 }
0x2039   :  { %4099 = vst.msk [vmem:[#allocation17 + $0x8] sm:$0xf] %vm136_vm3, %v4097_v56  ;;  %5570 = vmatprep.subr.bf16.mxu1 %v5998_v12  ;;  %5327 = vmatprep.mubr.msk.f32.mxu0 %vm5999_vm1, %v6000_v24  ;;  %v4102_v12 = vld [vmem:[#allocation2 + $0x18] sm:$0xf] }
0x203a   :  { %5338 = vmatprep.mubr.msk.f32.mxu1 %vm5999_vm1, %v6000_v24 }
0x203b   :  { %5566 = vmatpush3.bf16.msra.mxu0 %v6552_v18 }
0x203c   :  { %5572 = vmatpush3.bf16.msra.mxu1 %v6556_v19 }
0x2109   :  { %v4173_v8 = vpop.f32.mrb[36].mxu0 }
0x210a   :  { %v4184_v57 = vadd.f32 %v4173_v8, %v6598_v47  ;;  %v4284_v11 = vpop.f32.mrb[36].mxu1  ;;  %v5307_v58 = vpop.f32.mrb[37].mxu0  ;;  %v4177_v61 = vadd.f32 %v4173_v8, %v4102_v12 }
0x210b   :  { %v4295_v59 = vadd.f32 %v4284_v11, %v6602_v51  ;;  %v5318_v60 = vpop.f32.mrb[37].mxu1  ;;  %v4288_v24 = vadd.f32 %v4284_v11, %v4103_v62 }
0x210c   :  { %4186 = vrot.lane.b32.xlu1 %v4184_v57, %s5994_s6  ;;  %v4702_v63 = vmul.f32 -1.442695, %v4177_v61 }
0x210d   :  { %4297 = vrot.lane.b32.xlu0 %v4295_v59, %s5994_s6  ;;  %v4704_v18 = vmul.f32 -1.442695, %v4288_v24 }
0x210e   :  { %5779 = vpow2.f32 %v4702_v63 }
0x210f   :  { %5781 = vpow2.f32 %v4704_v18 }
0x2118   :  { %v5780_v19 = vpop.eup %5779 }
0x2119   :  { %v5782_v0 = vpop.eup %5781  ;;  %v4181_v1 = vadd.f32 1.0, %v5780_v19 }
0x211a   :  { %v4292_v2 = vadd.f32 1.0, %v5782_v0 }
0x211b   :  { %5783 = vrcp.f32 %v4181_v1 }
0x211c   :  { %5785 = vrcp.f32 %v4292_v2 }
0x2125   :  { %v5784_v10 = vpop.eup %5783 }
0x2126   :  { %v5786_v3 = vpop.eup %5785  ;;  %v4196_v5 = vsub.f32 1.0, %v5784_v10 }
0x2127   :  { %v4307_v6 = vsub.f32 1.0, %v5786_v3 }
0x217e   :  { %v4187_v48 = vpop.permute.xlu1 %4186 }
0x217f   :  { %v4189_v4 = vmul.f32 %v5784_v10, %v4187_v48  ;;  %v4298_v32 = vpop.permute.xlu0 %4297 }
0x2180   :  { %v4300_v52 = vmul.f32 %v5786_v3, %v4298_v32  ;;  %v4326_v32 = vld [vmem:[#allocation6 + $0x1c] sm:$0xf] }
0x2181   :  { %4191 = vrot.lane.b32.xlu1 %v4189_v4, %s5994_s6 }
0x2182   :  { %4302 = vrot.lane.b32.xlu0 %v4300_v52, %s5994_s6 }
0x2185   :  { %4202 = vrot.lane.b32.xlu1 %v6818_v50, %s5994_s6 }
0x2186   :  { %4313 = vrot.lane.b32.xlu0 %v6821_v54, %s5994_s6 }
0x2189   :  { %4198 = vrot.lane.b32.xlu1 %v4196_v5, %s6002_s0  ;;  %v4327_v5 = vld [vmem:[#allocation6] sm:$0xf] }
0x218a   :  { %4309 = vrot.lane.b32.xlu0 %v4307_v6, %s6002_s0 }
0x21f3   :  { %v4192_v17 = vpop.permute.xlu1 %4191 }
0x21f4   :  { %v4194_v53 = vadd.f32 %v4192_v17, %v4102_v12  ;;  %v4303_v21 = vpop.permute.xlu0 %4302 }
0x21f5   :  { %v4305_v7 = vadd.f32 %v4303_v21, %v4103_v62 }
0x21f6   :  { %5787 = vtanh.f32 %v4194_v53 }
0x21f7   :  { %5789 = vtanh.f32 %v4305_v7  ;;  %v4203_v13 = vpop.permute.xlu1 %4202 }
0x21f8   :  { %v4314_v15 = vpop.permute.xlu0 %4313 }
0x21fb   :  { %v4199_v20 = vpop.permute.xlu1 %4198 }
0x21fc   :  { %v4310_v23 = vpop.permute.xlu0 %4309  ;;  %v4201_v26 = vmul.f32 %v4199_v20, %v4100_v25 }
0x21fd   :  { %v4312_v28 = vmul.f32 %v4310_v23, %v4101_v27 }
0x2200   :  { %v5788_v9 = vpop.eup %5787 }
0x2201   :  { %v5790_v22 = vpop.eup %5789  ;;  %v4205_v14 = vsub.f32 %v5788_v9, %v4203_v13 }
0x2202   :  { %v4316_v16 = vsub.f32 %v5790_v22, %v4314_v15 }
0x2203   :  { %4207 = vrot.lane.b32.xlu1 %v4205_v14, %s5994_s6 }
0x2204   :  { %4318 = vrot.lane.b32.xlu0 %v4316_v16, %s5994_s6 }
0x2275   :  { %v4208_v29 = vpop.permute.xlu1 %4207 }
0x2276   :  { %v4210_v30 = vmul.f32 %v4208_v29, %v4201_v26  ;;  %v4319_v31 = vpop.permute.xlu0 %4318 }
0x2277   :  { %v4321_v33 = vmul.f32 %v4319_v31, %v4312_v28 }
0x2278   :  { %v6856_v34 = vadd.f32 %v4210_v30, %v6818_v50 }
0x2279   :  { %v6859_v35 = vadd.f32 %v4321_v33, %v6821_v54 }
0x227a   :  { %v4212_v36 = vmul.f32 %v6856_v34, %v4100_v25  ;;  %5328 = vmatmul.mubr.msk.f32.vlgmr.msra.gmra.mrb[38].mxu0 %vm423_vm12, %v6856_v34 }
0x227b   :  { %v4323_v37 = vmul.f32 %v6859_v35, %v4101_v27  ;;  %5339 = vmatmul.mubr.msk.f32.vlgmr.msra.gmra.mrb[38].mxu1 %vm423_vm12, %v6859_v35 }
0x227c   :  { %4214 = vst.msk [vmem:[#allocation16 + $0x18] sm:$0xf] %vm136_vm3, %v4212_v36 }
0x227d   :  { %4325 = vst.msk [vmem:[#allocation17 + $0x4] sm:$0xf] %vm136_vm3, %v4323_v37 }
0x234d   :  { %v4399_v38 = vpop.f32.mrb[38].mxu0 }
0x234e   :  { %v4410_v39 = vadd.f32 %v4399_v38, %v6598_v47  ;;  %v4510_v40 = vpop.f32.mrb[38].mxu1  ;;  %v5329_v41 = vpop.f32.mrb[39].mxu0  ;;  %v4403_v45 = vadd.f32 %v4399_v38, %v4328_v44 }
0x234f   :  { %v4521_v42 = vadd.f32 %v4510_v40, %v6602_v51  ;;  %v5340_v43 = vpop.f32.mrb[39].mxu1  ;;  %v4514_v49 = vadd.f32 %v4510_v40, %v4329_v46 }
0x2350   :  { %4412 = vrot.lane.b32.xlu1 %v4410_v39, %s5994_s6  ;;  %v4706_v50 = vmul.f32 -1.442695, %v4403_v45 }
0x2351   :  { %4523 = vrot.lane.b32.xlu0 %v4521_v42, %s5994_s6  ;;  %v4708_v54 = vmul.f32 -1.442695, %v4514_v49 }
0x2352   :  { %5791 = vpow2.f32 %v4706_v50 }
0x2353   :  { %5793 = vpow2.f32 %v4708_v54 }
0x235c   :  { %v5792_v55 = vpop.eup %5791 }
0x235d   :  { %v5794_v56 = vpop.eup %5793  ;;  %v4407_v47 = vadd.f32 1.0, %v5792_v55 }
0x235e   :  { %v4518_v8 = vadd.f32 1.0, %v5794_v56 }
0x235f   :  { %5795 = vrcp.f32 %v4407_v47 }
0x2360   :  { %5797 = vrcp.f32 %v4518_v8 }
0x2369   :  { %v5796_v51 = vpop.eup %5795 }
0x236a   :  { %v5798_v11 = vpop.eup %5797  ;;  %v4422_v12 = vsub.f32 1.0, %v5796_v51 }
0x236b   :  { %v4533_v61 = vsub.f32 1.0, %v5798_v11 }
0x23c2   :  { %v4413_v57 = vpop.permute.xlu1 %4412 }
0x23c3   :  { %v4415_v58 = vmul.f32 %v5796_v51, %v4413_v57  ;;  %v4524_v59 = vpop.permute.xlu0 %4523 }
0x23c4   :  { %v4526_v60 = vmul.f32 %v5798_v11, %v4524_v59 }
0x23c5   :  { %4417 = vrot.lane.b32.xlu1 %v4415_v58, %s5994_s6 }
0x23c6   :  { %4528 = vrot.lane.b32.xlu0 %v4526_v60, %s5994_s6 }
0x23c9   :  { %4428 = vrot.lane.b32.xlu1 %v6856_v34, %s5994_s6 }
0x23ca   :  { %4539 = vrot.lane.b32.xlu0 %v6859_v35, %s5994_s6 }
0x23cd   :  { %4424 = vrot.lane.b32.xlu1 %v4422_v12, %s6002_s0 }
0x23ce   :  { %4535 = vrot.lane.b32.xlu0 %v4533_v61, %s6002_s0 }
0x2437   :  { %v4418_v62 = vpop.permute.xlu1 %4417 }
0x2438   :  { %v4420_v24 = vadd.f32 %v4418_v62, %v4328_v44  ;;  %v4529_v63 = vpop.permute.xlu0 %4528 }
0x2439   :  { %v4531_v18 = vadd.f32 %v4529_v63, %v4329_v46 }
0x243a   :  { %5799 = vtanh.f32 %v4420_v24 }
0x243b   :  { %5801 = vtanh.f32 %v4531_v18  ;;  %v4429_v0 = vpop.permute.xlu1 %4428 }
0x243c   :  { %v4540_v10 = vpop.permute.xlu0 %4539 }
0x243f   :  { %v4425_v3 = vpop.permute.xlu1 %4424 }
0x2440   :  { %v4536_v4 = vpop.permute.xlu0 %4535  ;;  %v4427_v52 = vmul.f32 %v4425_v3, %v4326_v32 }
0x2441   :  { %v4538_v6 = vmul.f32 %v4536_v4, %v4327_v5 }
0x2444   :  { %v5800_v19 = vpop.eup %5799 }
0x2445   :  { %v5802_v1 = vpop.eup %5801  ;;  %v4431_v2 = vsub.f32 %v5800_v19, %v4429_v0 }
0x2446   :  { %v4542_v48 = vsub.f32 %v5802_v1, %v4540_v10 }
0x2447   :  { %4433 = vrot.lane.b32.xlu1 %v4431_v2, %s5994_s6 }
0x2448   :  { %4544 = vrot.lane.b32.xlu0 %v4542_v48, %s5994_s6 }
0x24b9   :  { %v4434_v17 = vpop.permute.xlu1 %4433 }
0x24ba   :  { %v4436_v53 = vmul.f32 %v4434_v17, %v4427_v52  ;;  %v4545_v21 = vpop.permute.xlu0 %4544 }
0x24bb   :  { %v4547_v7 = vmul.f32 %v4545_v21, %v4538_v6 }
0x24bc   :  { %v4437_v9 = vadd.f32 %v4436_v53, %v6856_v34 }
0x24bd   :  { %v4548_v13 = vadd.f32 %v4547_v7, %v6859_v35 }
0x24be   :  { %v4438_v22 = vmul.f32 %v4437_v9, %v4326_v32  ;;  %4552 = vst.msk [vmem:[#allocation19 + $0x8] sm:$0xf] %vm136_vm3, %v4437_v9 }
0x24bf   :  { %v4549_v14 = vmul.f32 %v4548_v13, %v4327_v5  ;;  %4554 = vst.msk [vmem:[#allocation19 + $0xc] sm:$0xf] %vm136_vm3, %v4548_v13 }
0x24c0   :  { %4440 = vst.msk [vmem:[#allocation16 + $0x1c] sm:$0xf] %vm136_vm3, %v4438_v22 }
0x24c1   :  { %4550 = vst.msk [vmem:[#allocation17] sm:$0xf] %vm136_vm3, %v4549_v14 }
0x24c2   :  { %5924 = shalt.err (!%p5921_p2)
}
0x24c3   :  { %s5925_s14 = scalar_lea.hbm %s6958_s10, 512 }
0x24c4   :  { %p5926_p3 = scmp.ne.s32.totalorder %s6958_s10, %s5925_s14  ;;  %p5929_p4 = scmp.lt.u32.totalorder %s5925_s14, %s6958_s10 }
0x24c6   :  { %p5931_p5 = pnand %p5929_p4, %p5926_p3 }
0x24c8   :  { %5934 = shalt.err (!%p5931_p5)
}
0x24c9   :  { %4566 = dma.vmem_to_hbm [thread:$0]  %s4561_s2, 512, %s6958_s10, [#allocation9], %s5994_s6, %s5994_s6, %s5995_s18  }
0x24ca   :  { %s5935_s21 = scalar_lea.vmem %s6887_s30, 512  ;;  %p5940_p7 = scmp.lt.s32.totalorder %s6887_s30, %s6887_s30 }
0x24cb   :  { %p5936_p6 = scmp.ne.s32.totalorder %s6887_s30, %s5935_s21  ;;  %p5941_p8 = scmp.lt.s32.totalorder %s5935_s21, %s5935_s21 }
0x24cd   :  { %p5942_p9 = por %p5941_p8, %p5940_p7 }
0x24cf   :  { %p5943_p10 = pnand %p5942_p9, %p5936_p6 }
0x24d1   :  { %5946 = shalt.err (!%p5943_p10)
}
0x24d2   :  { %s5947_s20 = scalar_lea.hbm %s6959_s11, 512 }
0x24d3   :  { %p5948_p11 = scmp.ne.s32.totalorder %s6959_s11, %s5947_s20  ;;  %p5951_p12 = scmp.lt.u32.totalorder %s5947_s20, %s6959_s11 }
0x24d5   :  { %p5953_p13 = pnand %p5951_p12, %p5948_p11 }
0x24d7   :  { %5956 = shalt.err (!%p5953_p13)
}
0x24d8   :  { %4578 = dma.vmem_to_hbm [thread:$0]  %s6887_s30, 512, %s6959_s11, [#allocation18], %s5994_s6, %s5994_s6, %s5995_s18  }
0x24d9   :  { %s5957_s27 = scalar_lea.vmem %s6890_s4, 256  ;;  %p5962_p1 = scmp.lt.s32.totalorder %s6890_s4, %s6890_s4 }
0x24da   :  { %p5958_p0 = scmp.ne.s32.totalorder %s6890_s4, %s5957_s27  ;;  %p5963_p2 = scmp.lt.s32.totalorder %s5957_s27, %s5957_s27 }
0x24dc   :  { %p5964_p3 = por %p5963_p2, %p5962_p1 }
0x24de   :  { %p5965_p4 = pnand %p5964_p3, %p5958_p0 }
0x24e0   :  { %5968 = shalt.err (!%p5965_p4)
}
0x24e1   :  { %s5969_s29 = scalar_lea.hbm %s6960_s12, 256 }
0x24e2   :  { %p5970_p5 = scmp.ne.s32.totalorder %s6960_s12, %s5969_s29  ;;  %p5973_p6 = scmp.lt.u32.totalorder %s5969_s29, %s6960_s12 }
0x24e4   :  { %p5975_p7 = pnand %p5973_p6, %p5970_p5 }
0x24e6   :  { %5978 = shalt.err (!%p5975_p7)
}
0x24e7   :  { %4590 = dma.vmem_to_hbm [thread:$0]  %s6890_s4, 256, %s6960_s12, [#allocation18], %s5994_s6, %s5994_s6, %s5995_s18  }
0x24e8   :  { %5985 = dma.done.wait [#allocation9], 512  }
0x24e9   :  { %5986 = vsyncadd [#allocation9], 4294966784 }
0x24ea   :  { %5987 = dma.done.wait [#allocation18], 768  }
0x24eb   :  { %5988 = vsyncadd [#allocation18], 4294966528 }
0x24ec   :  { %4600 = vsyncpa [#allocation8], 1 }
0x24ed   :  { %4601 = vsyncpa [#allocation11], 1 }
0x24ee   :  { %4602 = vsyncpa [#allocation14], 1 }
0x24ef   :  { %4603 = vsyncpa [#allocation9], 1 }
0x24f0   :  { %4604 = vsyncpa [#allocation18], 1 }

</bundles_post_ra>
